<compile_context>
chip_gen: v7x
topology: tpu7x:2x2x1
jax: 0.10.0
libtpu: 0.0.40
codegen_flags: <defaults>
</compile_context>

<pallas_src>
import functools

import jax
import jax.numpy as jnp
from jax.experimental import pallas as pl
from jax.experimental.pallas import tpu as pltpu


# ----------------------------------------------------------------------------
# Fused Pallas kernel: HBM row-gather + 2x LSTM (stacked batch) + MLP head
# ----------------------------------------------------------------------------
def rnnq_fused_kernel(goal_ref, tok1_ref, tok2_ref,      # SMEM int32 ids
                      ew_hbm,                            # HBM (pl.ANY) table (V, 4H)
                      whh_ref, head_ref,                 # VMEM weights
                      out_ref,                           # VMEM (B, 2) output
                      xw_scr, sem):                      # scratch: (T,2B,4H) + DMA sems
    T, B2, _ = xw_scr.shape
    H = whh_ref.shape[0]
    B = out_ref.shape[0]
    out_size = out_ref.shape[1]
    GP = head_ref.shape[0] - 4 * H - 8                   # padded goal one-hot width
    V = ew_hbm.shape[0]

    # ---- 1) HBM row-gather: only the 2B*T rows actually used.
    #      xw[t, m, :] = (embed @ W_ih + b_ih + b_hh)[token_id[m, t], :]
    #      stored time-major so each recurrent step reads one aligned tile.
    for m in range(B):
        for t in range(T):
            i1 = jnp.minimum(jnp.maximum(tok1_ref[m, t], 0), V - 1)
            pltpu.make_async_copy(
                ew_hbm.at[pl.ds(i1, 1), :],
                xw_scr.at[t, pl.ds(m, 1), :],
                sem.at[t, m]).start()
            i2 = jnp.minimum(jnp.maximum(tok2_ref[m, t], 0), V - 1)
            pltpu.make_async_copy(
                ew_hbm.at[pl.ds(i2, 1), :],
                xw_scr.at[t, pl.ds(B + m, 1), :],
                sem.at[t, B + m]).start()

    # Independent prologue work (overlaps with the in-flight gather).
    whh = whh_ref[...]                                   # (H, 4H)
    lane = jax.lax.broadcasted_iota(jnp.int32, (B2, 4 * H), 1)
    g_mask = (lane >= 2 * H) & (lane < 3 * H)            # hoisted, per-step reuse

    # goal one-hot (B, GP) from SMEM scalars; out-of-range goal -> all-zero row
    row = jax.lax.broadcasted_iota(jnp.int32, (B, GP), 0)
    col = jax.lax.broadcasted_iota(jnp.int32, (B, GP), 1)
    onehot = jnp.zeros((B, GP), jnp.float32)
    for b in range(B):
        onehot = jnp.where((row == b) & (col == goal_ref[b]), 1.0, onehot)

    # Wait for every gathered row before the recurrence touches xw_scr.
    for m in range(B2):
        for t in range(T):
            pltpu.make_async_copy(
                ew_hbm.at[pl.ds(0, 1), :],
                xw_scr.at[t, pl.ds(m, 1), :],
                sem.at[t, m]).wait()

    # ---- 2) LSTM recurrence: only h @ W_hh remains on the serial path.
    def step(t, carry):
        h, c = carry
        gates = xw_scr[t] + jnp.dot(h, whh, preferred_element_type=jnp.float32)
        # single-tanh activation: sigmoid(x) = 0.5 * tanh(0.5 * x) + 0.5
        y = jnp.where(g_mask, gates, 0.5 * gates)
        tnh = jnp.tanh(y)
        act = jnp.where(g_mask, tnh, 0.5 * tnh + 0.5)
        i_g = act[:, 0:H]
        f_g = act[:, H:2 * H]
        g_g = act[:, 2 * H:3 * H]
        o_g = act[:, 3 * H:4 * H]
        c_new = f_g * c + i_g * g_g
        h_new = o_g * jnp.tanh(c_new)
        return h_new, c_new

    h0 = jnp.zeros((B2, H), jnp.float32)
    c0 = jnp.zeros((B2, H), jnp.float32)
    h_fin, _ = jax.lax.fori_loop(0, T, step, (h0, c0), unroll=True)

    # ---- 3) MLP head, concat-free.  Packed-buffer layout (rows, lanes=H):
    #   [0:GP]        w1[:G]   (goal rows, zero-padded)
    #   [GP:GP+2H]    w1[G:]   (monster rows, split into two H-blocks)
    #   [GP+2H:+3H]   w2
    #   [GP+3H:+4H]   w3 (lanes >= out_size zero)
    #   rows GP+4H..  b1, b2, b3 (padded)
    w1g = head_ref[0:GP, :]
    w1m_a = head_ref[GP:GP + H, :]
    w1m_b = head_ref[GP + H:GP + 2 * H, :]
    w2 = head_ref[GP + 2 * H:GP + 3 * H, :]
    w3 = head_ref[GP + 3 * H:GP + 4 * H, :]
    b1 = head_ref[pl.ds(GP + 4 * H, 1), :]
    b2 = head_ref[pl.ds(GP + 4 * H + 1, 1), :]
    b3 = head_ref[pl.ds(GP + 4 * H + 2, 1), :]

    h_m1 = h_fin[0:B, :]
    h_m2 = h_fin[B:B2, :]
    h1 = jnp.maximum(
        jnp.dot(onehot, w1g, preferred_element_type=jnp.float32)
        + jnp.dot(h_m1, w1m_a, preferred_element_type=jnp.float32)
        + jnp.dot(h_m2, w1m_b, preferred_element_type=jnp.float32)
        + b1, 0.0)
    h2 = jnp.maximum(
        jnp.dot(h1, w2, preferred_element_type=jnp.float32) + b2, 0.0)
    o = jnp.dot(h2, w3, preferred_element_type=jnp.float32) + b3     # (B, H)
    out_ref[...] = o[:, 0:out_size]


def rnnq_forward(goal_ids, tok1, tok2, ew, whh, head, *, out_size=2):
    """One fused pallas_call for the whole RNNQ forward pass."""
    B, T = tok1.shape
    H = whh.shape[0]
    smem = pl.BlockSpec(memory_space=pltpu.MemorySpace.SMEM)
    vmem = pl.BlockSpec(memory_space=pltpu.MemorySpace.VMEM)
    hbm = pl.BlockSpec(memory_space=pl.ANY)      # embedding table stays in HBM
    return pl.pallas_call(
        rnnq_fused_kernel,
        out_shape=jax.ShapeDtypeStruct((B, out_size), jnp.float32),
        in_specs=[smem, smem, smem, hbm, vmem, vmem],
        out_specs=vmem,
        scratch_shapes=[
            pltpu.VMEM((T, 2 * B, 4 * H), jnp.float32),
            pltpu.SemaphoreType.DMA((T, 2 * B)),
        ],
    )(goal_ids, tok1, tok2, ew, whh, head)


# ----------------------------------------------------------------------------
# Model wrapper (deterministically-initialized port of RNNQ.forward)
# ----------------------------------------------------------------------------
class RNNQPallas:
    def __init__(self, goal_size, vocab_size=1000, hidden_size=32, seed=0):
        self.goal_size = goal_size
        self.hidden = hidden_size
        self.out_size = 2
        H = hidden_size
        key = jax.random.PRNGKey(seed)
        ks = jax.random.split(key, 12)

        def u(k, shape, bound):
            return jax.random.uniform(
                k, shape, jnp.float32, minval=-bound, maxval=bound)

        kH = 1.0 / jnp.sqrt(jnp.float32(H))
        # Embedding (vocab, H) -- torch default N(0,1)
        self.embed = jax.random.normal(ks[0], (vocab_size, H), jnp.float32)
        # LSTM weights stored (in, 4H); PyTorch gate order i, f, g, o
        self.wih = u(ks[1], (H, 4 * H), kH)
        self.whh = u(ks[2], (H, 4 * H), kH)
        self.b_lstm = u(ks[3], (1, 4 * H), kH) + u(ks[4], (1, 4 * H), kH)  # b_ih+b_hh
        # monster_encoder MLP (weights stored (in, out))
        in1 = goal_size + 2 * H
        k1 = 1.0 / jnp.sqrt(jnp.float32(in1))
        k2 = 1.0 / jnp.sqrt(jnp.float32(H))
        self.w1 = u(ks[5], (in1, H), k1)
        self.b1 = u(ks[6], (1, H), k1)
        self.w2 = u(ks[7], (H, H), k2)
        self.b2 = u(ks[8], (1, H), k2)
        self.w3 = u(ks[9], (H, self.out_size), k2)
        self.b3 = u(ks[10], (1, self.out_size), k2)

        # --- derived tables for the fused kernel (mathematically identical) ---
        # embedding lookup followed by the LSTM input projection == lookup into
        # a pre-projected table; fold both biases in as well.  Lives in HBM.
        self.ew = jnp.dot(self.embed, self.wih) + self.b_lstm        # (V, 4H)

        # Pack all head weights/biases into one (R, H) lane-aligned buffer.
        GP = ((goal_size + 7) // 8) * 8
        R = GP + 4 * H + 8
        head = jnp.zeros((R, H), jnp.float32)
        head = head.at[0:goal_size, :].set(self.w1[:goal_size])          # w1 goal rows
        head = head.at[GP:GP + 2 * H, :].set(self.w1[goal_size:])        # w1 monster rows
        head = head.at[GP + 2 * H:GP + 3 * H, :].set(self.w2)
        head = head.at[GP + 3 * H:GP + 4 * H, 0:self.out_size].set(self.w3)
        head = head.at[GP + 4 * H, :].set(self.b1[0])
        head = head.at[GP + 4 * H + 1, :].set(self.b2[0])
        head = head.at[GP + 4 * H + 2, 0:self.out_size].set(self.b3[0])
        self.head = head

        self._fwd = jax.jit(
            functools.partial(rnnq_forward, out_size=self.out_size))

    def forward(self, goal_ids, monster1_ids, monster2_ids):
        return self._fwd(
            jnp.asarray(goal_ids, jnp.int32),
            jnp.asarray(monster1_ids, jnp.int32),
            jnp.asarray(monster2_ids, jnp.int32),
            self.ew, self.whh, self.head)


# ----------------------------------------------------------------------------
# Pure-JAX reference (mirrors the original PyTorch forward)
# ----------------------------------------------------------------------------
def reference_forward(model, goal_ids, m1_ids, m2_ids):
    H = model.hidden

    def lstm_last(ids):
        x = jnp.take(model.embed, ids, axis=0)          # (B, T, H)
        Bb, Tt = ids.shape
        h = jnp.zeros((Bb, H), jnp.float32)
        c = jnp.zeros((Bb, H), jnp.float32)
        for t in range(Tt):
            gates = x[:, t, :] @ model.wih + h @ model.whh + model.b_lstm
            i = jax.nn.sigmoid(gates[:, 0:H])
            f = jax.nn.sigmoid(gates[:, H:2 * H])
            g = jnp.tanh(gates[:, 2 * H:3 * H])
            o = jax.nn.sigmoid(gates[:, 3 * H:4 * H])
            c = f * c + i * g
            h = o * jnp.tanh(c)
        return h

    goal = jax.nn.one_hot(goal_ids, model.goal_size, dtype=jnp.float32)
    m1 = lstm_last(m1_ids)
    m2 = lstm_last(m2_ids)
    feat = jnp.concatenate([goal, m1, m2], axis=-1)
    h1 = jnp.maximum(feat @ model.w1 + model.b1, 0.0)
    h2 = jnp.maximum(h1 @ model.w2 + model.b2, 0.0)
    return h2 @ model.w3 + model.b3


# ----------------------------------------------------------------------------
# Main
# ----------------------------------------------------------------------------
if __name__ == "__main__":
    B, T, GOAL_SIZE, VOCAB = 2, 8, 5, 1000

    key = jax.random.PRNGKey(0)
    k_goal, k_m1, k_m2 = jax.random.split(key, 3)
    goal_ids = jax.random.randint(k_goal, (B,), 0, GOAL_SIZE)
    monster1_ids = jax.random.randint(k_m1, (B, T), 0, VOCAB)
    monster2_ids = jax.random.randint(k_m2, (B, T), 0, VOCAB)

    model = RNNQPallas(goal_size=GOAL_SIZE, vocab_size=VOCAB, hidden_size=32, seed=0)
    out = model.forward(goal_ids, monster1_ids, monster2_ids)
    out = jax.block_until_ready(out)
    assert out.shape == (B, 2), out.shape

    ref = jax.block_until_ready(
        reference_forward(model, goal_ids, monster1_ids, monster2_ids))
    max_err = float(jnp.max(jnp.abs(out - ref)))
    assert max_err < 2e-2, f"mismatch vs reference: {max_err}"

    print("KERNEL_OK")
</pallas_src>

<mosaic_0001>
module attributes {stable_mosaic.version = 11 : i64} {
  func.func @rnnq_fused_kernel(%arg0: memref<2xi32, #tpu.memory_space<smem>>, %arg1: memref<2x8xi32, #tpu.memory_space<smem>>, %arg2: memref<2x8xi32, #tpu.memory_space<smem>>, %arg3: memref<1000x128xf32, #tpu.memory_space<any>>, %arg4: memref<32x128xf32, #tpu.memory_space<vmem>>, %arg5: memref<144x32xf32, #tpu.memory_space<vmem>>, %arg6: memref<2x2xf32, #tpu.memory_space<vmem>>, %arg7: memref<8x4x128xf32, #tpu.memory_space<vmem>>, %arg8: memref<8x4x!tpu.dma_semaphore, #tpu.memory_space<semaphore_mem>>) attributes {dimension_semantics = [], scalar_prefetch = 0 : i64, scratch_operands = 2 : i64, tpu.core_type = #tpu.core_type<tc>} {
    %c0 = arith.constant 0 : index
    %c0_0 = arith.constant 0 : index
    %0 = memref.load %arg1[%c0, %c0_0] : memref<2x8xi32, #tpu.memory_space<smem>>
    %c0_i32 = arith.constant 0 : i32
    %1 = arith.maxsi %0, %c0_i32 : i32
    %c999_i32 = arith.constant 999 : i32
    %2 = arith.minsi %1, %c999_i32 : i32
    %c0_i32_1 = arith.constant 0 : i32
    %c0_i32_2 = arith.constant 0 : i32
    %c0_i32_3 = arith.constant 0 : i32
    %c0_i32_4 = arith.constant 0 : i32
    %3 = tpu.memref_slice %arg3[%2, %c0_i32_4] : memref<1000x128xf32, #tpu.memory_space<any>> -> memref<1x128xf32, #tpu.memory_space<any>>
    %c0_i32_5 = arith.constant 0 : i32
    %c0_i32_6 = arith.constant 0 : i32
    %4 = tpu.memref_slice %arg7[%c0_i32_1, %c0_i32_5, %c0_i32_6] : memref<8x4x128xf32, #tpu.memory_space<vmem>> -> memref<1x1x128xf32, #tpu.memory_space<vmem>>
    %5 = tpu.memref_squeeze %4 : memref<1x1x128xf32, #tpu.memory_space<vmem>> -> memref<1x128xf32, #tpu.memory_space<vmem>>
    %6 = tpu.memref_slice %arg8[%c0_i32_2, %c0_i32_3] : memref<8x4x!tpu.dma_semaphore, #tpu.memory_space<semaphore_mem>> -> memref<1x1x!tpu.dma_semaphore, #tpu.memory_space<semaphore_mem>>
    %7 = tpu.memref_squeeze %6 : memref<1x1x!tpu.dma_semaphore, #tpu.memory_space<semaphore_mem>> -> memref<!tpu.dma_semaphore, #tpu.memory_space<semaphore_mem>>
    tpu.enqueue_dma source(%3 : memref<1x128xf32, #tpu.memory_space<any>>) target(%5 : memref<1x128xf32, #tpu.memory_space<vmem>>) target_semaphore(%7 : memref<!tpu.dma_semaphore, #tpu.memory_space<semaphore_mem>>)
    %c0_7 = arith.constant 0 : index
    %c0_8 = arith.constant 0 : index
    %8 = memref.load %arg2[%c0_7, %c0_8] : memref<2x8xi32, #tpu.memory_space<smem>>
    %c0_i32_9 = arith.constant 0 : i32
    %9 = arith.maxsi %8, %c0_i32_9 : i32
    %c999_i32_10 = arith.constant 999 : i32
    %10 = arith.minsi %9, %c999_i32_10 : i32
    %c0_i32_11 = arith.constant 0 : i32
    %c0_i32_12 = arith.constant 0 : i32
    %c2_i32 = arith.constant 2 : i32
    %c0_i32_13 = arith.constant 0 : i32
    %11 = tpu.memref_slice %arg3[%10, %c0_i32_13] : memref<1000x128xf32, #tpu.memory_space<any>> -> memref<1x128xf32, #tpu.memory_space<any>>
    %c2_i32_14 = arith.constant 2 : i32
    %c0_i32_15 = arith.constant 0 : i32
    %12 = tpu.memref_slice %arg7[%c0_i32_11, %c2_i32_14, %c0_i32_15] : memref<8x4x128xf32, #tpu.memory_space<vmem>> -> memref<1x1x128xf32, #tpu.memory_space<vmem>>
    %13 = tpu.memref_squeeze %12 : memref<1x1x128xf32, #tpu.memory_space<vmem>> -> memref<1x128xf32, #tpu.memory_space<vmem>>
    %14 = tpu.memref_slice %arg8[%c0_i32_12, %c2_i32] : memref<8x4x!tpu.dma_semaphore, #tpu.memory_space<semaphore_mem>> -> memref<1x1x!tpu.dma_semaphore, #tpu.memory_space<semaphore_mem>>
    %15 = tpu.memref_squeeze %14 : memref<1x1x!tpu.dma_semaphore, #tpu.memory_space<semaphore_mem>> -> memref<!tpu.dma_semaphore, #tpu.memory_space<semaphore_mem>>
    tpu.enqueue_dma source(%11 : memref<1x128xf32, #tpu.memory_space<any>>) target(%13 : memref<1x128xf32, #tpu.memory_space<vmem>>) target_semaphore(%15 : memref<!tpu.dma_semaphore, #tpu.memory_space<semaphore_mem>>)
    %c0_16 = arith.constant 0 : index
    %c1 = arith.constant 1 : index
    %16 = memref.load %arg1[%c0_16, %c1] : memref<2x8xi32, #tpu.memory_space<smem>>
    %c0_i32_17 = arith.constant 0 : i32
    %17 = arith.maxsi %16, %c0_i32_17 : i32
    %c999_i32_18 = arith.constant 999 : i32
    %18 = arith.minsi %17, %c999_i32_18 : i32
    %c1_i32 = arith.constant 1 : i32
    %c1_i32_19 = arith.constant 1 : i32
    %c0_i32_20 = arith.constant 0 : i32
    %c0_i32_21 = arith.constant 0 : i32
    %19 = tpu.memref_slice %arg3[%18, %c0_i32_21] : memref<1000x128xf32, #tpu.memory_space<any>> -> memref<1x128xf32, #tpu.memory_space<any>>
    %c0_i32_22 = arith.constant 0 : i32
    %c0_i32_23 = arith.constant 0 : i32
    %20 = tpu.memref_slice %arg7[%c1_i32, %c0_i32_22, %c0_i32_23] : memref<8x4x128xf32, #tpu.memory_space<vmem>> -> memref<1x1x128xf32, #tpu.memory_space<vmem>>
    %21 = tpu.memref_squeeze %20 : memref<1x1x128xf32, #tpu.memory_space<vmem>> -> memref<1x128xf32, #tpu.memory_space<vmem>>
    %22 = tpu.memref_slice %arg8[%c1_i32_19, %c0_i32_20] : memref<8x4x!tpu.dma_semaphore, #tpu.memory_space<semaphore_mem>> -> memref<1x1x!tpu.dma_semaphore, #tpu.memory_space<semaphore_mem>>
    %23 = tpu.memref_squeeze %22 : memref<1x1x!tpu.dma_semaphore, #tpu.memory_space<semaphore_mem>> -> memref<!tpu.dma_semaphore, #tpu.memory_space<semaphore_mem>>
    tpu.enqueue_dma source(%19 : memref<1x128xf32, #tpu.memory_space<any>>) target(%21 : memref<1x128xf32, #tpu.memory_space<vmem>>) target_semaphore(%23 : memref<!tpu.dma_semaphore, #tpu.memory_space<semaphore_mem>>)
    %c0_24 = arith.constant 0 : index
    %c1_25 = arith.constant 1 : index
    %24 = memref.load %arg2[%c0_24, %c1_25] : memref<2x8xi32, #tpu.memory_space<smem>>
    %c0_i32_26 = arith.constant 0 : i32
    %25 = arith.maxsi %24, %c0_i32_26 : i32
    %c999_i32_27 = arith.constant 999 : i32
    %26 = arith.minsi %25, %c999_i32_27 : i32
    %c1_i32_28 = arith.constant 1 : i32
    %c1_i32_29 = arith.constant 1 : i32
    %c2_i32_30 = arith.constant 2 : i32
    %c0_i32_31 = arith.constant 0 : i32
    %27 = tpu.memref_slice %arg3[%26, %c0_i32_31] : memref<1000x128xf32, #tpu.memory_space<any>> -> memref<1x128xf32, #tpu.memory_space<any>>
    %c2_i32_32 = arith.constant 2 : i32
    %c0_i32_33 = arith.constant 0 : i32
    %28 = tpu.memref_slice %arg7[%c1_i32_28, %c2_i32_32, %c0_i32_33] : memref<8x4x128xf32, #tpu.memory_space<vmem>> -> memref<1x1x128xf32, #tpu.memory_space<vmem>>
    %29 = tpu.memref_squeeze %28 : memref<1x1x128xf32, #tpu.memory_space<vmem>> -> memref<1x128xf32, #tpu.memory_space<vmem>>
    %30 = tpu.memref_slice %arg8[%c1_i32_29, %c2_i32_30] : memref<8x4x!tpu.dma_semaphore, #tpu.memory_space<semaphore_mem>> -> memref<1x1x!tpu.dma_semaphore, #tpu.memory_space<semaphore_mem>>
    %31 = tpu.memref_squeeze %30 : memref<1x1x!tpu.dma_semaphore, #tpu.memory_space<semaphore_mem>> -> memref<!tpu.dma_semaphore, #tpu.memory_space<semaphore_mem>>
    tpu.enqueue_dma source(%27 : memref<1x128xf32, #tpu.memory_space<any>>) target(%29 : memref<1x128xf32, #tpu.memory_space<vmem>>) target_semaphore(%31 : memref<!tpu.dma_semaphore, #tpu.memory_space<semaphore_mem>>)
    %c0_34 = arith.constant 0 : index
    %c2 = arith.constant 2 : index
    %32 = memref.load %arg1[%c0_34, %c2] : memref<2x8xi32, #tpu.memory_space<smem>>
    %c0_i32_35 = arith.constant 0 : i32
    %33 = arith.maxsi %32, %c0_i32_35 : i32
    %c999_i32_36 = arith.constant 999 : i32
    %34 = arith.minsi %33, %c999_i32_36 : i32
    %c2_i32_37 = arith.constant 2 : i32
    %c2_i32_38 = arith.constant 2 : i32
    %c0_i32_39 = arith.constant 0 : i32
    %c0_i32_40 = arith.constant 0 : i32
    %35 = tpu.memref_slice %arg3[%34, %c0_i32_40] : memref<1000x128xf32, #tpu.memory_space<any>> -> memref<1x128xf32, #tpu.memory_space<any>>
    %c0_i32_41 = arith.constant 0 : i32
    %c0_i32_42 = arith.constant 0 : i32
    %36 = tpu.memref_slice %arg7[%c2_i32_37, %c0_i32_41, %c0_i32_42] : memref<8x4x128xf32, #tpu.memory_space<vmem>> -> memref<1x1x128xf32, #tpu.memory_space<vmem>>
    %37 = tpu.memref_squeeze %36 : memref<1x1x128xf32, #tpu.memory_space<vmem>> -> memref<1x128xf32, #tpu.memory_space<vmem>>
    %38 = tpu.memref_slice %arg8[%c2_i32_38, %c0_i32_39] : memref<8x4x!tpu.dma_semaphore, #tpu.memory_space<semaphore_mem>> -> memref<1x1x!tpu.dma_semaphore, #tpu.memory_space<semaphore_mem>>
    %39 = tpu.memref_squeeze %38 : memref<1x1x!tpu.dma_semaphore, #tpu.memory_space<semaphore_mem>> -> memref<!tpu.dma_semaphore, #tpu.memory_space<semaphore_mem>>
    tpu.enqueue_dma source(%35 : memref<1x128xf32, #tpu.memory_space<any>>) target(%37 : memref<1x128xf32, #tpu.memory_space<vmem>>) target_semaphore(%39 : memref<!tpu.dma_semaphore, #tpu.memory_space<semaphore_mem>>)
    %c0_43 = arith.constant 0 : index
    %c2_44 = arith.constant 2 : index
    %40 = memref.load %arg2[%c0_43, %c2_44] : memref<2x8xi32, #tpu.memory_space<smem>>
    %c0_i32_45 = arith.constant 0 : i32
    %41 = arith.maxsi %40, %c0_i32_45 : i32
    %c999_i32_46 = arith.constant 999 : i32
    %42 = arith.minsi %41, %c999_i32_46 : i32
    %c2_i32_47 = arith.constant 2 : i32
    %c2_i32_48 = arith.constant 2 : i32
    %c2_i32_49 = arith.constant 2 : i32
    %c0_i32_50 = arith.constant 0 : i32
    %43 = tpu.memref_slice %arg3[%42, %c0_i32_50] : memref<1000x128xf32, #tpu.memory_space<any>> -> memref<1x128xf32, #tpu.memory_space<any>>
    %c2_i32_51 = arith.constant 2 : i32
    %c0_i32_52 = arith.constant 0 : i32
    %44 = tpu.memref_slice %arg7[%c2_i32_47, %c2_i32_51, %c0_i32_52] : memref<8x4x128xf32, #tpu.memory_space<vmem>> -> memref<1x1x128xf32, #tpu.memory_space<vmem>>
    %45 = tpu.memref_squeeze %44 : memref<1x1x128xf32, #tpu.memory_space<vmem>> -> memref<1x128xf32, #tpu.memory_space<vmem>>
    %46 = tpu.memref_slice %arg8[%c2_i32_48, %c2_i32_49] : memref<8x4x!tpu.dma_semaphore, #tpu.memory_space<semaphore_mem>> -> memref<1x1x!tpu.dma_semaphore, #tpu.memory_space<semaphore_mem>>
    %47 = tpu.memref_squeeze %46 : memref<1x1x!tpu.dma_semaphore, #tpu.memory_space<semaphore_mem>> -> memref<!tpu.dma_semaphore, #tpu.memory_space<semaphore_mem>>
    tpu.enqueue_dma source(%43 : memref<1x128xf32, #tpu.memory_space<any>>) target(%45 : memref<1x128xf32, #tpu.memory_space<vmem>>) target_semaphore(%47 : memref<!tpu.dma_semaphore, #tpu.memory_space<semaphore_mem>>)
    %c0_53 = arith.constant 0 : index
    %c3 = arith.constant 3 : index
    %48 = memref.load %arg1[%c0_53, %c3] : memref<2x8xi32, #tpu.memory_space<smem>>
    %c0_i32_54 = arith.constant 0 : i32
    %49 = arith.maxsi %48, %c0_i32_54 : i32
    %c999_i32_55 = arith.constant 999 : i32
    %50 = arith.minsi %49, %c999_i32_55 : i32
    %c3_i32 = arith.constant 3 : i32
    %c3_i32_56 = arith.constant 3 : i32
    %c0_i32_57 = arith.constant 0 : i32
    %c0_i32_58 = arith.constant 0 : i32
    %51 = tpu.memref_slice %arg3[%50, %c0_i32_58] : memref<1000x128xf32, #tpu.memory_space<any>> -> memref<1x128xf32, #tpu.memory_space<any>>
    %c0_i32_59 = arith.constant 0 : i32
    %c0_i32_60 = arith.constant 0 : i32
    %52 = tpu.memref_slice %arg7[%c3_i32, %c0_i32_59, %c0_i32_60] : memref<8x4x128xf32, #tpu.memory_space<vmem>> -> memref<1x1x128xf32, #tpu.memory_space<vmem>>
    %53 = tpu.memref_squeeze %52 : memref<1x1x128xf32, #tpu.memory_space<vmem>> -> memref<1x128xf32, #tpu.memory_space<vmem>>
    %54 = tpu.memref_slice %arg8[%c3_i32_56, %c0_i32_57] : memref<8x4x!tpu.dma_semaphore, #tpu.memory_space<semaphore_mem>> -> memref<1x1x!tpu.dma_semaphore, #tpu.memory_space<semaphore_mem>>
    %55 = tpu.memref_squeeze %54 : memref<1x1x!tpu.dma_semaphore, #tpu.memory_space<semaphore_mem>> -> memref<!tpu.dma_semaphore, #tpu.memory_space<semaphore_mem>>
    tpu.enqueue_dma source(%51 : memref<1x128xf32, #tpu.memory_space<any>>) target(%53 : memref<1x128xf32, #tpu.memory_space<vmem>>) target_semaphore(%55 : memref<!tpu.dma_semaphore, #tpu.memory_space<semaphore_mem>>)
    %c0_61 = arith.constant 0 : index
    %c3_62 = arith.constant 3 : index
    %56 = memref.load %arg2[%c0_61, %c3_62] : memref<2x8xi32, #tpu.memory_space<smem>>
    %c0_i32_63 = arith.constant 0 : i32
    %57 = arith.maxsi %56, %c0_i32_63 : i32
    %c999_i32_64 = arith.constant 999 : i32
    %58 = arith.minsi %57, %c999_i32_64 : i32
    %c3_i32_65 = arith.constant 3 : i32
    %c3_i32_66 = arith.constant 3 : i32
    %c2_i32_67 = arith.constant 2 : i32
    %c0_i32_68 = arith.constant 0 : i32
    %59 = tpu.memref_slice %arg3[%58, %c0_i32_68] : memref<1000x128xf32, #tpu.memory_space<any>> -> memref<1x128xf32, #tpu.memory_space<any>>
    %c2_i32_69 = arith.constant 2 : i32
    %c0_i32_70 = arith.constant 0 : i32
    %60 = tpu.memref_slice %arg7[%c3_i32_65, %c2_i32_69, %c0_i32_70] : memref<8x4x128xf32, #tpu.memory_space<vmem>> -> memref<1x1x128xf32, #tpu.memory_space<vmem>>
    %61 = tpu.memref_squeeze %60 : memref<1x1x128xf32, #tpu.memory_space<vmem>> -> memref<1x128xf32, #tpu.memory_space<vmem>>
    %62 = tpu.memref_slice %arg8[%c3_i32_66, %c2_i32_67] : memref<8x4x!tpu.dma_semaphore, #tpu.memory_space<semaphore_mem>> -> memref<1x1x!tpu.dma_semaphore, #tpu.memory_space<semaphore_mem>>
    %63 = tpu.memref_squeeze %62 : memref<1x1x!tpu.dma_semaphore, #tpu.memory_space<semaphore_mem>> -> memref<!tpu.dma_semaphore, #tpu.memory_space<semaphore_mem>>
    tpu.enqueue_dma source(%59 : memref<1x128xf32, #tpu.memory_space<any>>) target(%61 : memref<1x128xf32, #tpu.memory_space<vmem>>) target_semaphore(%63 : memref<!tpu.dma_semaphore, #tpu.memory_space<semaphore_mem>>)
    %c0_71 = arith.constant 0 : index
    %c4 = arith.constant 4 : index
    %64 = memref.load %arg1[%c0_71, %c4] : memref<2x8xi32, #tpu.memory_space<smem>>
    %c0_i32_72 = arith.constant 0 : i32
    %65 = arith.maxsi %64, %c0_i32_72 : i32
    %c999_i32_73 = arith.constant 999 : i32
    %66 = arith.minsi %65, %c999_i32_73 : i32
    %c4_i32 = arith.constant 4 : i32
    %c4_i32_74 = arith.constant 4 : i32
    %c0_i32_75 = arith.constant 0 : i32
    %c0_i32_76 = arith.constant 0 : i32
    %67 = tpu.memref_slice %arg3[%66, %c0_i32_76] : memref<1000x128xf32, #tpu.memory_space<any>> -> memref<1x128xf32, #tpu.memory_space<any>>
    %c0_i32_77 = arith.constant 0 : i32
    %c0_i32_78 = arith.constant 0 : i32
    %68 = tpu.memref_slice %arg7[%c4_i32, %c0_i32_77, %c0_i32_78] : memref<8x4x128xf32, #tpu.memory_space<vmem>> -> memref<1x1x128xf32, #tpu.memory_space<vmem>>
    %69 = tpu.memref_squeeze %68 : memref<1x1x128xf32, #tpu.memory_space<vmem>> -> memref<1x128xf32, #tpu.memory_space<vmem>>
    %70 = tpu.memref_slice %arg8[%c4_i32_74, %c0_i32_75] : memref<8x4x!tpu.dma_semaphore, #tpu.memory_space<semaphore_mem>> -> memref<1x1x!tpu.dma_semaphore, #tpu.memory_space<semaphore_mem>>
    %71 = tpu.memref_squeeze %70 : memref<1x1x!tpu.dma_semaphore, #tpu.memory_space<semaphore_mem>> -> memref<!tpu.dma_semaphore, #tpu.memory_space<semaphore_mem>>
    tpu.enqueue_dma source(%67 : memref<1x128xf32, #tpu.memory_space<any>>) target(%69 : memref<1x128xf32, #tpu.memory_space<vmem>>) target_semaphore(%71 : memref<!tpu.dma_semaphore, #tpu.memory_space<semaphore_mem>>)
    %c0_79 = arith.constant 0 : index
    %c4_80 = arith.constant 4 : index
    %72 = memref.load %arg2[%c0_79, %c4_80] : memref<2x8xi32, #tpu.memory_space<smem>>
    %c0_i32_81 = arith.constant 0 : i32
    %73 = arith.maxsi %72, %c0_i32_81 : i32
    %c999_i32_82 = arith.constant 999 : i32
    %74 = arith.minsi %73, %c999_i32_82 : i32
    %c4_i32_83 = arith.constant 4 : i32
    %c4_i32_84 = arith.constant 4 : i32
    %c2_i32_85 = arith.constant 2 : i32
    %c0_i32_86 = arith.constant 0 : i32
    %75 = tpu.memref_slice %arg3[%74, %c0_i32_86] : memref<1000x128xf32, #tpu.memory_space<any>> -> memref<1x128xf32, #tpu.memory_space<any>>
    %c2_i32_87 = arith.constant 2 : i32
    %c0_i32_88 = arith.constant 0 : i32
    %76 = tpu.memref_slice %arg7[%c4_i32_83, %c2_i32_87, %c0_i32_88] : memref<8x4x128xf32, #tpu.memory_space<vmem>> -> memref<1x1x128xf32, #tpu.memory_space<vmem>>
    %77 = tpu.memref_squeeze %76 : memref<1x1x128xf32, #tpu.memory_space<vmem>> -> memref<1x128xf32, #tpu.memory_space<vmem>>
    %78 = tpu.memref_slice %arg8[%c4_i32_84, %c2_i32_85] : memref<8x4x!tpu.dma_semaphore, #tpu.memory_space<semaphore_mem>> -> memref<1x1x!tpu.dma_semaphore, #tpu.memory_space<semaphore_mem>>
    %79 = tpu.memref_squeeze %78 : memref<1x1x!tpu.dma_semaphore, #tpu.memory_space<semaphore_mem>> -> memref<!tpu.dma_semaphore, #tpu.memory_space<semaphore_mem>>
    tpu.enqueue_dma source(%75 : memref<1x128xf32, #tpu.memory_space<any>>) target(%77 : memref<1x128xf32, #tpu.memory_space<vmem>>) target_semaphore(%79 : memref<!tpu.dma_semaphore, #tpu.memory_space<semaphore_mem>>)
    %c0_89 = arith.constant 0 : index
    %c5 = arith.constant 5 : index
    %80 = memref.load %arg1[%c0_89, %c5] : memref<2x8xi32, #tpu.memory_space<smem>>
    %c0_i32_90 = arith.constant 0 : i32
    %81 = arith.maxsi %80, %c0_i32_90 : i32
    %c999_i32_91 = arith.constant 999 : i32
    %82 = arith.minsi %81, %c999_i32_91 : i32
    %c5_i32 = arith.constant 5 : i32
    %c5_i32_92 = arith.constant 5 : i32
    %c0_i32_93 = arith.constant 0 : i32
    %c0_i32_94 = arith.constant 0 : i32
    %83 = tpu.memref_slice %arg3[%82, %c0_i32_94] : memref<1000x128xf32, #tpu.memory_space<any>> -> memref<1x128xf32, #tpu.memory_space<any>>
    %c0_i32_95 = arith.constant 0 : i32
    %c0_i32_96 = arith.constant 0 : i32
    %84 = tpu.memref_slice %arg7[%c5_i32, %c0_i32_95, %c0_i32_96] : memref<8x4x128xf32, #tpu.memory_space<vmem>> -> memref<1x1x128xf32, #tpu.memory_space<vmem>>
    %85 = tpu.memref_squeeze %84 : memref<1x1x128xf32, #tpu.memory_space<vmem>> -> memref<1x128xf32, #tpu.memory_space<vmem>>
    %86 = tpu.memref_slice %arg8[%c5_i32_92, %c0_i32_93] : memref<8x4x!tpu.dma_semaphore, #tpu.memory_space<semaphore_mem>> -> memref<1x1x!tpu.dma_semaphore, #tpu.memory_space<semaphore_mem>>
    %87 = tpu.memref_squeeze %86 : memref<1x1x!tpu.dma_semaphore, #tpu.memory_space<semaphore_mem>> -> memref<!tpu.dma_semaphore, #tpu.memory_space<semaphore_mem>>
    tpu.enqueue_dma source(%83 : memref<1x128xf32, #tpu.memory_space<any>>) target(%85 : memref<1x128xf32, #tpu.memory_space<vmem>>) target_semaphore(%87 : memref<!tpu.dma_semaphore, #tpu.memory_space<semaphore_mem>>)
    %c0_97 = arith.constant 0 : index
    %c5_98 = arith.constant 5 : index
    %88 = memref.load %arg2[%c0_97, %c5_98] : memref<2x8xi32, #tpu.memory_space<smem>>
    %c0_i32_99 = arith.constant 0 : i32
    %89 = arith.maxsi %88, %c0_i32_99 : i32
    %c999_i32_100 = arith.constant 999 : i32
    %90 = arith.minsi %89, %c999_i32_100 : i32
    %c5_i32_101 = arith.constant 5 : i32
    %c5_i32_102 = arith.constant 5 : i32
    %c2_i32_103 = arith.constant 2 : i32
    %c0_i32_104 = arith.constant 0 : i32
    %91 = tpu.memref_slice %arg3[%90, %c0_i32_104] : memref<1000x128xf32, #tpu.memory_space<any>> -> memref<1x128xf32, #tpu.memory_space<any>>
    %c2_i32_105 = arith.constant 2 : i32
    %c0_i32_106 = arith.constant 0 : i32
    %92 = tpu.memref_slice %arg7[%c5_i32_101, %c2_i32_105, %c0_i32_106] : memref<8x4x128xf32, #tpu.memory_space<vmem>> -> memref<1x1x128xf32, #tpu.memory_space<vmem>>
    %93 = tpu.memref_squeeze %92 : memref<1x1x128xf32, #tpu.memory_space<vmem>> -> memref<1x128xf32, #tpu.memory_space<vmem>>
    %94 = tpu.memref_slice %arg8[%c5_i32_102, %c2_i32_103] : memref<8x4x!tpu.dma_semaphore, #tpu.memory_space<semaphore_mem>> -> memref<1x1x!tpu.dma_semaphore, #tpu.memory_space<semaphore_mem>>
    %95 = tpu.memref_squeeze %94 : memref<1x1x!tpu.dma_semaphore, #tpu.memory_space<semaphore_mem>> -> memref<!tpu.dma_semaphore, #tpu.memory_space<semaphore_mem>>
    tpu.enqueue_dma source(%91 : memref<1x128xf32, #tpu.memory_space<any>>) target(%93 : memref<1x128xf32, #tpu.memory_space<vmem>>) target_semaphore(%95 : memref<!tpu.dma_semaphore, #tpu.memory_space<semaphore_mem>>)
    %c0_107 = arith.constant 0 : index
    %c6 = arith.constant 6 : index
    %96 = memref.load %arg1[%c0_107, %c6] : memref<2x8xi32, #tpu.memory_space<smem>>
    %c0_i32_108 = arith.constant 0 : i32
    %97 = arith.maxsi %96, %c0_i32_108 : i32
    %c999_i32_109 = arith.constant 999 : i32
    %98 = arith.minsi %97, %c999_i32_109 : i32
    %c6_i32 = arith.constant 6 : i32
    %c6_i32_110 = arith.constant 6 : i32
    %c0_i32_111 = arith.constant 0 : i32
    %c0_i32_112 = arith.constant 0 : i32
    %99 = tpu.memref_slice %arg3[%98, %c0_i32_112] : memref<1000x128xf32, #tpu.memory_space<any>> -> memref<1x128xf32, #tpu.memory_space<any>>
    %c0_i32_113 = arith.constant 0 : i32
    %c0_i32_114 = arith.constant 0 : i32
    %100 = tpu.memref_slice %arg7[%c6_i32, %c0_i32_113, %c0_i32_114] : memref<8x4x128xf32, #tpu.memory_space<vmem>> -> memref<1x1x128xf32, #tpu.memory_space<vmem>>
    %101 = tpu.memref_squeeze %100 : memref<1x1x128xf32, #tpu.memory_space<vmem>> -> memref<1x128xf32, #tpu.memory_space<vmem>>
    %102 = tpu.memref_slice %arg8[%c6_i32_110, %c0_i32_111] : memref<8x4x!tpu.dma_semaphore, #tpu.memory_space<semaphore_mem>> -> memref<1x1x!tpu.dma_semaphore, #tpu.memory_space<semaphore_mem>>
    %103 = tpu.memref_squeeze %102 : memref<1x1x!tpu.dma_semaphore, #tpu.memory_space<semaphore_mem>> -> memref<!tpu.dma_semaphore, #tpu.memory_space<semaphore_mem>>
    tpu.enqueue_dma source(%99 : memref<1x128xf32, #tpu.memory_space<any>>) target(%101 : memref<1x128xf32, #tpu.memory_space<vmem>>) target_semaphore(%103 : memref<!tpu.dma_semaphore, #tpu.memory_space<semaphore_mem>>)
    %c0_115 = arith.constant 0 : index
    %c6_116 = arith.constant 6 : index
    %104 = memref.load %arg2[%c0_115, %c6_116] : memref<2x8xi32, #tpu.memory_space<smem>>
    %c0_i32_117 = arith.constant 0 : i32
    %105 = arith.maxsi %104, %c0_i32_117 : i32
    %c999_i32_118 = arith.constant 999 : i32
    %106 = arith.minsi %105, %c999_i32_118 : i32
    %c6_i32_119 = arith.constant 6 : i32
    %c6_i32_120 = arith.constant 6 : i32
    %c2_i32_121 = arith.constant 2 : i32
    %c0_i32_122 = arith.constant 0 : i32
    %107 = tpu.memref_slice %arg3[%106, %c0_i32_122] : memref<1000x128xf32, #tpu.memory_space<any>> -> memref<1x128xf32, #tpu.memory_space<any>>
    %c2_i32_123 = arith.constant 2 : i32
    %c0_i32_124 = arith.constant 0 : i32
    %108 = tpu.memref_slice %arg7[%c6_i32_119, %c2_i32_123, %c0_i32_124] : memref<8x4x128xf32, #tpu.memory_space<vmem>> -> memref<1x1x128xf32, #tpu.memory_space<vmem>>
    %109 = tpu.memref_squeeze %108 : memref<1x1x128xf32, #tpu.memory_space<vmem>> -> memref<1x128xf32, #tpu.memory_space<vmem>>
    %110 = tpu.memref_slice %arg8[%c6_i32_120, %c2_i32_121] : memref<8x4x!tpu.dma_semaphore, #tpu.memory_space<semaphore_mem>> -> memref<1x1x!tpu.dma_semaphore, #tpu.memory_space<semaphore_mem>>
    %111 = tpu.memref_squeeze %110 : memref<1x1x!tpu.dma_semaphore, #tpu.memory_space<semaphore_mem>> -> memref<!tpu.dma_semaphore, #tpu.memory_space<semaphore_mem>>
    tpu.enqueue_dma source(%107 : memref<1x128xf32, #tpu.memory_space<any>>) target(%109 : memref<1x128xf32, #tpu.memory_space<vmem>>) target_semaphore(%111 : memref<!tpu.dma_semaphore, #tpu.memory_space<semaphore_mem>>)
    %c0_125 = arith.constant 0 : index
    %c7 = arith.constant 7 : index
    %112 = memref.load %arg1[%c0_125, %c7] : memref<2x8xi32, #tpu.memory_space<smem>>
    %c0_i32_126 = arith.constant 0 : i32
    %113 = arith.maxsi %112, %c0_i32_126 : i32
    %c999_i32_127 = arith.constant 999 : i32
    %114 = arith.minsi %113, %c999_i32_127 : i32
    %c7_i32 = arith.constant 7 : i32
    %c7_i32_128 = arith.constant 7 : i32
    %c0_i32_129 = arith.constant 0 : i32
    %c0_i32_130 = arith.constant 0 : i32
    %115 = tpu.memref_slice %arg3[%114, %c0_i32_130] : memref<1000x128xf32, #tpu.memory_space<any>> -> memref<1x128xf32, #tpu.memory_space<any>>
    %c0_i32_131 = arith.constant 0 : i32
    %c0_i32_132 = arith.constant 0 : i32
    %116 = tpu.memref_slice %arg7[%c7_i32, %c0_i32_131, %c0_i32_132] : memref<8x4x128xf32, #tpu.memory_space<vmem>> -> memref<1x1x128xf32, #tpu.memory_space<vmem>>
    %117 = tpu.memref_squeeze %116 : memref<1x1x128xf32, #tpu.memory_space<vmem>> -> memref<1x128xf32, #tpu.memory_space<vmem>>
    %118 = tpu.memref_slice %arg8[%c7_i32_128, %c0_i32_129] : memref<8x4x!tpu.dma_semaphore, #tpu.memory_space<semaphore_mem>> -> memref<1x1x!tpu.dma_semaphore, #tpu.memory_space<semaphore_mem>>
    %119 = tpu.memref_squeeze %118 : memref<1x1x!tpu.dma_semaphore, #tpu.memory_space<semaphore_mem>> -> memref<!tpu.dma_semaphore, #tpu.memory_space<semaphore_mem>>
    tpu.enqueue_dma source(%115 : memref<1x128xf32, #tpu.memory_space<any>>) target(%117 : memref<1x128xf32, #tpu.memory_space<vmem>>) target_semaphore(%119 : memref<!tpu.dma_semaphore, #tpu.memory_space<semaphore_mem>>)
    %c0_133 = arith.constant 0 : index
    %c7_134 = arith.constant 7 : index
    %120 = memref.load %arg2[%c0_133, %c7_134] : memref<2x8xi32, #tpu.memory_space<smem>>
    %c0_i32_135 = arith.constant 0 : i32
    %121 = arith.maxsi %120, %c0_i32_135 : i32
    %c999_i32_136 = arith.constant 999 : i32
    %122 = arith.minsi %121, %c999_i32_136 : i32
    %c7_i32_137 = arith.constant 7 : i32
    %c7_i32_138 = arith.constant 7 : i32
    %c2_i32_139 = arith.constant 2 : i32
    %c0_i32_140 = arith.constant 0 : i32
    %123 = tpu.memref_slice %arg3[%122, %c0_i32_140] : memref<1000x128xf32, #tpu.memory_space<any>> -> memref<1x128xf32, #tpu.memory_space<any>>
    %c2_i32_141 = arith.constant 2 : i32
    %c0_i32_142 = arith.constant 0 : i32
    %124 = tpu.memref_slice %arg7[%c7_i32_137, %c2_i32_141, %c0_i32_142] : memref<8x4x128xf32, #tpu.memory_space<vmem>> -> memref<1x1x128xf32, #tpu.memory_space<vmem>>
    %125 = tpu.memref_squeeze %124 : memref<1x1x128xf32, #tpu.memory_space<vmem>> -> memref<1x128xf32, #tpu.memory_space<vmem>>
    %126 = tpu.memref_slice %arg8[%c7_i32_138, %c2_i32_139] : memref<8x4x!tpu.dma_semaphore, #tpu.memory_space<semaphore_mem>> -> memref<1x1x!tpu.dma_semaphore, #tpu.memory_space<semaphore_mem>>
    %127 = tpu.memref_squeeze %126 : memref<1x1x!tpu.dma_semaphore, #tpu.memory_space<semaphore_mem>> -> memref<!tpu.dma_semaphore, #tpu.memory_space<semaphore_mem>>
    tpu.enqueue_dma source(%123 : memref<1x128xf32, #tpu.memory_space<any>>) target(%125 : memref<1x128xf32, #tpu.memory_space<vmem>>) target_semaphore(%127 : memref<!tpu.dma_semaphore, #tpu.memory_space<semaphore_mem>>)
    %c1_143 = arith.constant 1 : index
    %c0_144 = arith.constant 0 : index
    %128 = memref.load %arg1[%c1_143, %c0_144] : memref<2x8xi32, #tpu.memory_space<smem>>
    %c0_i32_145 = arith.constant 0 : i32
    %129 = arith.maxsi %128, %c0_i32_145 : i32
    %c999_i32_146 = arith.constant 999 : i32
    %130 = arith.minsi %129, %c999_i32_146 : i32
    %c0_i32_147 = arith.constant 0 : i32
    %c0_i32_148 = arith.constant 0 : i32
    %c1_i32_149 = arith.constant 1 : i32
    %c0_i32_150 = arith.constant 0 : i32
    %131 = tpu.memref_slice %arg3[%130, %c0_i32_150] : memref<1000x128xf32, #tpu.memory_space<any>> -> memref<1x128xf32, #tpu.memory_space<any>>
    %c1_i32_151 = arith.constant 1 : i32
    %c0_i32_152 = arith.constant 0 : i32
    %132 = tpu.memref_slice %arg7[%c0_i32_147, %c1_i32_151, %c0_i32_152] : memref<8x4x128xf32, #tpu.memory_space<vmem>> -> memref<1x1x128xf32, #tpu.memory_space<vmem>>
    %133 = tpu.memref_squeeze %132 : memref<1x1x128xf32, #tpu.memory_space<vmem>> -> memref<1x128xf32, #tpu.memory_space<vmem>>
    %134 = tpu.memref_slice %arg8[%c0_i32_148, %c1_i32_149] : memref<8x4x!tpu.dma_semaphore, #tpu.memory_space<semaphore_mem>> -> memref<1x1x!tpu.dma_semaphore, #tpu.memory_space<semaphore_mem>>
    %135 = tpu.memref_squeeze %134 : memref<1x1x!tpu.dma_semaphore, #tpu.memory_space<semaphore_mem>> -> memref<!tpu.dma_semaphore, #tpu.memory_space<semaphore_mem>>
    tpu.enqueue_dma source(%131 : memref<1x128xf32, #tpu.memory_space<any>>) target(%133 : memref<1x128xf32, #tpu.memory_space<vmem>>) target_semaphore(%135 : memref<!tpu.dma_semaphore, #tpu.memory_space<semaphore_mem>>)
    %c1_153 = arith.constant 1 : index
    %c0_154 = arith.constant 0 : index
    %136 = memref.load %arg2[%c1_153, %c0_154] : memref<2x8xi32, #tpu.memory_space<smem>>
    %c0_i32_155 = arith.constant 0 : i32
    %137 = arith.maxsi %136, %c0_i32_155 : i32
    %c999_i32_156 = arith.constant 999 : i32
    %138 = arith.minsi %137, %c999_i32_156 : i32
    %c0_i32_157 = arith.constant 0 : i32
    %c0_i32_158 = arith.constant 0 : i32
    %c3_i32_159 = arith.constant 3 : i32
    %c0_i32_160 = arith.constant 0 : i32
    %139 = tpu.memref_slice %arg3[%138, %c0_i32_160] : memref<1000x128xf32, #tpu.memory_space<any>> -> memref<1x128xf32, #tpu.memory_space<any>>
    %c3_i32_161 = arith.constant 3 : i32
    %c0_i32_162 = arith.constant 0 : i32
    %140 = tpu.memref_slice %arg7[%c0_i32_157, %c3_i32_161, %c0_i32_162] : memref<8x4x128xf32, #tpu.memory_space<vmem>> -> memref<1x1x128xf32, #tpu.memory_space<vmem>>
    %141 = tpu.memref_squeeze %140 : memref<1x1x128xf32, #tpu.memory_space<vmem>> -> memref<1x128xf32, #tpu.memory_space<vmem>>
    %142 = tpu.memref_slice %arg8[%c0_i32_158, %c3_i32_159] : memref<8x4x!tpu.dma_semaphore, #tpu.memory_space<semaphore_mem>> -> memref<1x1x!tpu.dma_semaphore, #tpu.memory_space<semaphore_mem>>
    %143 = tpu.memref_squeeze %142 : memref<1x1x!tpu.dma_semaphore, #tpu.memory_space<semaphore_mem>> -> memref<!tpu.dma_semaphore, #tpu.memory_space<semaphore_mem>>
    tpu.enqueue_dma source(%139 : memref<1x128xf32, #tpu.memory_space<any>>) target(%141 : memref<1x128xf32, #tpu.memory_space<vmem>>) target_semaphore(%143 : memref<!tpu.dma_semaphore, #tpu.memory_space<semaphore_mem>>)
    %c1_163 = arith.constant 1 : index
    %c1_164 = arith.constant 1 : index
    %144 = memref.load %arg1[%c1_163, %c1_164] : memref<2x8xi32, #tpu.memory_space<smem>>
    %c0_i32_165 = arith.constant 0 : i32
    %145 = arith.maxsi %144, %c0_i32_165 : i32
    %c999_i32_166 = arith.constant 999 : i32
    %146 = arith.minsi %145, %c999_i32_166 : i32
    %c1_i32_167 = arith.constant 1 : i32
    %c1_i32_168 = arith.constant 1 : i32
    %c1_i32_169 = arith.constant 1 : i32
    %c0_i32_170 = arith.constant 0 : i32
    %147 = tpu.memref_slice %arg3[%146, %c0_i32_170] : memref<1000x128xf32, #tpu.memory_space<any>> -> memref<1x128xf32, #tpu.memory_space<any>>
    %c1_i32_171 = arith.constant 1 : i32
    %c0_i32_172 = arith.constant 0 : i32
    %148 = tpu.memref_slice %arg7[%c1_i32_167, %c1_i32_171, %c0_i32_172] : memref<8x4x128xf32, #tpu.memory_space<vmem>> -> memref<1x1x128xf32, #tpu.memory_space<vmem>>
    %149 = tpu.memref_squeeze %148 : memref<1x1x128xf32, #tpu.memory_space<vmem>> -> memref<1x128xf32, #tpu.memory_space<vmem>>
    %150 = tpu.memref_slice %arg8[%c1_i32_168, %c1_i32_169] : memref<8x4x!tpu.dma_semaphore, #tpu.memory_space<semaphore_mem>> -> memref<1x1x!tpu.dma_semaphore, #tpu.memory_space<semaphore_mem>>
    %151 = tpu.memref_squeeze %150 : memref<1x1x!tpu.dma_semaphore, #tpu.memory_space<semaphore_mem>> -> memref<!tpu.dma_semaphore, #tpu.memory_space<semaphore_mem>>
    tpu.enqueue_dma source(%147 : memref<1x128xf32, #tpu.memory_space<any>>) target(%149 : memref<1x128xf32, #tpu.memory_space<vmem>>) target_semaphore(%151 : memref<!tpu.dma_semaphore, #tpu.memory_space<semaphore_mem>>)
    %c1_173 = arith.constant 1 : index
    %c1_174 = arith.constant 1 : index
    %152 = memref.load %arg2[%c1_173, %c1_174] : memref<2x8xi32, #tpu.memory_space<smem>>
    %c0_i32_175 = arith.constant 0 : i32
    %153 = arith.maxsi %152, %c0_i32_175 : i32
    %c999_i32_176 = arith.constant 999 : i32
    %154 = arith.minsi %153, %c999_i32_176 : i32
    %c1_i32_177 = arith.constant 1 : i32
    %c1_i32_178 = arith.constant 1 : i32
    %c3_i32_179 = arith.constant 3 : i32
    %c0_i32_180 = arith.constant 0 : i32
    %155 = tpu.memref_slice %arg3[%154, %c0_i32_180] : memref<1000x128xf32, #tpu.memory_space<any>> -> memref<1x128xf32, #tpu.memory_space<any>>
    %c3_i32_181 = arith.constant 3 : i32
    %c0_i32_182 = arith.constant 0 : i32
    %156 = tpu.memref_slice %arg7[%c1_i32_177, %c3_i32_181, %c0_i32_182] : memref<8x4x128xf32, #tpu.memory_space<vmem>> -> memref<1x1x128xf32, #tpu.memory_space<vmem>>
    %157 = tpu.memref_squeeze %156 : memref<1x1x128xf32, #tpu.memory_space<vmem>> -> memref<1x128xf32, #tpu.memory_space<vmem>>
    %158 = tpu.memref_slice %arg8[%c1_i32_178, %c3_i32_179] : memref<8x4x!tpu.dma_semaphore, #tpu.memory_space<semaphore_mem>> -> memref<1x1x!tpu.dma_semaphore, #tpu.memory_space<semaphore_mem>>
    %159 = tpu.memref_squeeze %158 : memref<1x1x!tpu.dma_semaphore, #tpu.memory_space<semaphore_mem>> -> memref<!tpu.dma_semaphore, #tpu.memory_space<semaphore_mem>>
    tpu.enqueue_dma source(%155 : memref<1x128xf32, #tpu.memory_space<any>>) target(%157 : memref<1x128xf32, #tpu.memory_space<vmem>>) target_semaphore(%159 : memref<!tpu.dma_semaphore, #tpu.memory_space<semaphore_mem>>)
    %c1_183 = arith.constant 1 : index
    %c2_184 = arith.constant 2 : index
    %160 = memref.load %arg1[%c1_183, %c2_184] : memref<2x8xi32, #tpu.memory_space<smem>>
    %c0_i32_185 = arith.constant 0 : i32
    %161 = arith.maxsi %160, %c0_i32_185 : i32
    %c999_i32_186 = arith.constant 999 : i32
    %162 = arith.minsi %161, %c999_i32_186 : i32
    %c2_i32_187 = arith.constant 2 : i32
    %c2_i32_188 = arith.constant 2 : i32
    %c1_i32_189 = arith.constant 1 : i32
    %c0_i32_190 = arith.constant 0 : i32
    %163 = tpu.memref_slice %arg3[%162, %c0_i32_190] : memref<1000x128xf32, #tpu.memory_space<any>> -> memref<1x128xf32, #tpu.memory_space<any>>
    %c1_i32_191 = arith.constant 1 : i32
    %c0_i32_192 = arith.constant 0 : i32
    %164 = tpu.memref_slice %arg7[%c2_i32_187, %c1_i32_191, %c0_i32_192] : memref<8x4x128xf32, #tpu.memory_space<vmem>> -> memref<1x1x128xf32, #tpu.memory_space<vmem>>
    %165 = tpu.memref_squeeze %164 : memref<1x1x128xf32, #tpu.memory_space<vmem>> -> memref<1x128xf32, #tpu.memory_space<vmem>>
    %166 = tpu.memref_slice %arg8[%c2_i32_188, %c1_i32_189] : memref<8x4x!tpu.dma_semaphore, #tpu.memory_space<semaphore_mem>> -> memref<1x1x!tpu.dma_semaphore, #tpu.memory_space<semaphore_mem>>
    %167 = tpu.memref_squeeze %166 : memref<1x1x!tpu.dma_semaphore, #tpu.memory_space<semaphore_mem>> -> memref<!tpu.dma_semaphore, #tpu.memory_space<semaphore_mem>>
    tpu.enqueue_dma source(%163 : memref<1x128xf32, #tpu.memory_space<any>>) target(%165 : memref<1x128xf32, #tpu.memory_space<vmem>>) target_semaphore(%167 : memref<!tpu.dma_semaphore, #tpu.memory_space<semaphore_mem>>)
    %c1_193 = arith.constant 1 : index
    %c2_194 = arith.constant 2 : index
    %168 = memref.load %arg2[%c1_193, %c2_194] : memref<2x8xi32, #tpu.memory_space<smem>>
    %c0_i32_195 = arith.constant 0 : i32
    %169 = arith.maxsi %168, %c0_i32_195 : i32
    %c999_i32_196 = arith.constant 999 : i32
    %170 = arith.minsi %169, %c999_i32_196 : i32
    %c2_i32_197 = arith.constant 2 : i32
    %c2_i32_198 = arith.constant 2 : i32
    %c3_i32_199 = arith.constant 3 : i32
    %c0_i32_200 = arith.constant 0 : i32
    %171 = tpu.memref_slice %arg3[%170, %c0_i32_200] : memref<1000x128xf32, #tpu.memory_space<any>> -> memref<1x128xf32, #tpu.memory_space<any>>
    %c3_i32_201 = arith.constant 3 : i32
    %c0_i32_202 = arith.constant 0 : i32
    %172 = tpu.memref_slice %arg7[%c2_i32_197, %c3_i32_201, %c0_i32_202] : memref<8x4x128xf32, #tpu.memory_space<vmem>> -> memref<1x1x128xf32, #tpu.memory_space<vmem>>
    %173 = tpu.memref_squeeze %172 : memref<1x1x128xf32, #tpu.memory_space<vmem>> -> memref<1x128xf32, #tpu.memory_space<vmem>>
    %174 = tpu.memref_slice %arg8[%c2_i32_198, %c3_i32_199] : memref<8x4x!tpu.dma_semaphore, #tpu.memory_space<semaphore_mem>> -> memref<1x1x!tpu.dma_semaphore, #tpu.memory_space<semaphore_mem>>
    %175 = tpu.memref_squeeze %174 : memref<1x1x!tpu.dma_semaphore, #tpu.memory_space<semaphore_mem>> -> memref<!tpu.dma_semaphore, #tpu.memory_space<semaphore_mem>>
    tpu.enqueue_dma source(%171 : memref<1x128xf32, #tpu.memory_space<any>>) target(%173 : memref<1x128xf32, #tpu.memory_space<vmem>>) target_semaphore(%175 : memref<!tpu.dma_semaphore, #tpu.memory_space<semaphore_mem>>)
    %c1_203 = arith.constant 1 : index
    %c3_204 = arith.constant 3 : index
    %176 = memref.load %arg1[%c1_203, %c3_204] : memref<2x8xi32, #tpu.memory_space<smem>>
    %c0_i32_205 = arith.constant 0 : i32
    %177 = arith.maxsi %176, %c0_i32_205 : i32
    %c999_i32_206 = arith.constant 999 : i32
    %178 = arith.minsi %177, %c999_i32_206 : i32
    %c3_i32_207 = arith.constant 3 : i32
    %c3_i32_208 = arith.constant 3 : i32
    %c1_i32_209 = arith.constant 1 : i32
    %c0_i32_210 = arith.constant 0 : i32
    %179 = tpu.memref_slice %arg3[%178, %c0_i32_210] : memref<1000x128xf32, #tpu.memory_space<any>> -> memref<1x128xf32, #tpu.memory_space<any>>
    %c1_i32_211 = arith.constant 1 : i32
    %c0_i32_212 = arith.constant 0 : i32
    %180 = tpu.memref_slice %arg7[%c3_i32_207, %c1_i32_211, %c0_i32_212] : memref<8x4x128xf32, #tpu.memory_space<vmem>> -> memref<1x1x128xf32, #tpu.memory_space<vmem>>
    %181 = tpu.memref_squeeze %180 : memref<1x1x128xf32, #tpu.memory_space<vmem>> -> memref<1x128xf32, #tpu.memory_space<vmem>>
    %182 = tpu.memref_slice %arg8[%c3_i32_208, %c1_i32_209] : memref<8x4x!tpu.dma_semaphore, #tpu.memory_space<semaphore_mem>> -> memref<1x1x!tpu.dma_semaphore, #tpu.memory_space<semaphore_mem>>
    %183 = tpu.memref_squeeze %182 : memref<1x1x!tpu.dma_semaphore, #tpu.memory_space<semaphore_mem>> -> memref<!tpu.dma_semaphore, #tpu.memory_space<semaphore_mem>>
    tpu.enqueue_dma source(%179 : memref<1x128xf32, #tpu.memory_space<any>>) target(%181 : memref<1x128xf32, #tpu.memory_space<vmem>>) target_semaphore(%183 : memref<!tpu.dma_semaphore, #tpu.memory_space<semaphore_mem>>)
    %c1_213 = arith.constant 1 : index
    %c3_214 = arith.constant 3 : index
    %184 = memref.load %arg2[%c1_213, %c3_214] : memref<2x8xi32, #tpu.memory_space<smem>>
    %c0_i32_215 = arith.constant 0 : i32
    %185 = arith.maxsi %184, %c0_i32_215 : i32
    %c999_i32_216 = arith.constant 999 : i32
    %186 = arith.minsi %185, %c999_i32_216 : i32
    %c3_i32_217 = arith.constant 3 : i32
    %c3_i32_218 = arith.constant 3 : i32
    %c3_i32_219 = arith.constant 3 : i32
    %c0_i32_220 = arith.constant 0 : i32
    %187 = tpu.memref_slice %arg3[%186, %c0_i32_220] : memref<1000x128xf32, #tpu.memory_space<any>> -> memref<1x128xf32, #tpu.memory_space<any>>
    %c3_i32_221 = arith.constant 3 : i32
    %c0_i32_222 = arith.constant 0 : i32
    %188 = tpu.memref_slice %arg7[%c3_i32_217, %c3_i32_221, %c0_i32_222] : memref<8x4x128xf32, #tpu.memory_space<vmem>> -> memref<1x1x128xf32, #tpu.memory_space<vmem>>
    %189 = tpu.memref_squeeze %188 : memref<1x1x128xf32, #tpu.memory_space<vmem>> -> memref<1x128xf32, #tpu.memory_space<vmem>>
    %190 = tpu.memref_slice %arg8[%c3_i32_218, %c3_i32_219] : memref<8x4x!tpu.dma_semaphore, #tpu.memory_space<semaphore_mem>> -> memref<1x1x!tpu.dma_semaphore, #tpu.memory_space<semaphore_mem>>
    %191 = tpu.memref_squeeze %190 : memref<1x1x!tpu.dma_semaphore, #tpu.memory_space<semaphore_mem>> -> memref<!tpu.dma_semaphore, #tpu.memory_space<semaphore_mem>>
    tpu.enqueue_dma source(%187 : memref<1x128xf32, #tpu.memory_space<any>>) target(%189 : memref<1x128xf32, #tpu.memory_space<vmem>>) target_semaphore(%191 : memref<!tpu.dma_semaphore, #tpu.memory_space<semaphore_mem>>)
    %c1_223 = arith.constant 1 : index
    %c4_224 = arith.constant 4 : index
    %192 = memref.load %arg1[%c1_223, %c4_224] : memref<2x8xi32, #tpu.memory_space<smem>>
    %c0_i32_225 = arith.constant 0 : i32
    %193 = arith.maxsi %192, %c0_i32_225 : i32
    %c999_i32_226 = arith.constant 999 : i32
    %194 = arith.minsi %193, %c999_i32_226 : i32
    %c4_i32_227 = arith.constant 4 : i32
    %c4_i32_228 = arith.constant 4 : i32
    %c1_i32_229 = arith.constant 1 : i32
    %c0_i32_230 = arith.constant 0 : i32
    %195 = tpu.memref_slice %arg3[%194, %c0_i32_230] : memref<1000x128xf32, #tpu.memory_space<any>> -> memref<1x128xf32, #tpu.memory_space<any>>
    %c1_i32_231 = arith.constant 1 : i32
    %c0_i32_232 = arith.constant 0 : i32
    %196 = tpu.memref_slice %arg7[%c4_i32_227, %c1_i32_231, %c0_i32_232] : memref<8x4x128xf32, #tpu.memory_space<vmem>> -> memref<1x1x128xf32, #tpu.memory_space<vmem>>
    %197 = tpu.memref_squeeze %196 : memref<1x1x128xf32, #tpu.memory_space<vmem>> -> memref<1x128xf32, #tpu.memory_space<vmem>>
    %198 = tpu.memref_slice %arg8[%c4_i32_228, %c1_i32_229] : memref<8x4x!tpu.dma_semaphore, #tpu.memory_space<semaphore_mem>> -> memref<1x1x!tpu.dma_semaphore, #tpu.memory_space<semaphore_mem>>
    %199 = tpu.memref_squeeze %198 : memref<1x1x!tpu.dma_semaphore, #tpu.memory_space<semaphore_mem>> -> memref<!tpu.dma_semaphore, #tpu.memory_space<semaphore_mem>>
    tpu.enqueue_dma source(%195 : memref<1x128xf32, #tpu.memory_space<any>>) target(%197 : memref<1x128xf32, #tpu.memory_space<vmem>>) target_semaphore(%199 : memref<!tpu.dma_semaphore, #tpu.memory_space<semaphore_mem>>)
    %c1_233 = arith.constant 1 : index
    %c4_234 = arith.constant 4 : index
    %200 = memref.load %arg2[%c1_233, %c4_234] : memref<2x8xi32, #tpu.memory_space<smem>>
    %c0_i32_235 = arith.constant 0 : i32
    %201 = arith.maxsi %200, %c0_i32_235 : i32
    %c999_i32_236 = arith.constant 999 : i32
    %202 = arith.minsi %201, %c999_i32_236 : i32
    %c4_i32_237 = arith.constant 4 : i32
    %c4_i32_238 = arith.constant 4 : i32
    %c3_i32_239 = arith.constant 3 : i32
    %c0_i32_240 = arith.constant 0 : i32
    %203 = tpu.memref_slice %arg3[%202, %c0_i32_240] : memref<1000x128xf32, #tpu.memory_space<any>> -> memref<1x128xf32, #tpu.memory_space<any>>
    %c3_i32_241 = arith.constant 3 : i32
    %c0_i32_242 = arith.constant 0 : i32
    %204 = tpu.memref_slice %arg7[%c4_i32_237, %c3_i32_241, %c0_i32_242] : memref<8x4x128xf32, #tpu.memory_space<vmem>> -> memref<1x1x128xf32, #tpu.memory_space<vmem>>
    %205 = tpu.memref_squeeze %204 : memref<1x1x128xf32, #tpu.memory_space<vmem>> -> memref<1x128xf32, #tpu.memory_space<vmem>>
    %206 = tpu.memref_slice %arg8[%c4_i32_238, %c3_i32_239] : memref<8x4x!tpu.dma_semaphore, #tpu.memory_space<semaphore_mem>> -> memref<1x1x!tpu.dma_semaphore, #tpu.memory_space<semaphore_mem>>
    %207 = tpu.memref_squeeze %206 : memref<1x1x!tpu.dma_semaphore, #tpu.memory_space<semaphore_mem>> -> memref<!tpu.dma_semaphore, #tpu.memory_space<semaphore_mem>>
    tpu.enqueue_dma source(%203 : memref<1x128xf32, #tpu.memory_space<any>>) target(%205 : memref<1x128xf32, #tpu.memory_space<vmem>>) target_semaphore(%207 : memref<!tpu.dma_semaphore, #tpu.memory_space<semaphore_mem>>)
    %c1_243 = arith.constant 1 : index
    %c5_244 = arith.constant 5 : index
    %208 = memref.load %arg1[%c1_243, %c5_244] : memref<2x8xi32, #tpu.memory_space<smem>>
    %c0_i32_245 = arith.constant 0 : i32
    %209 = arith.maxsi %208, %c0_i32_245 : i32
    %c999_i32_246 = arith.constant 999 : i32
    %210 = arith.minsi %209, %c999_i32_246 : i32
    %c5_i32_247 = arith.constant 5 : i32
    %c5_i32_248 = arith.constant 5 : i32
    %c1_i32_249 = arith.constant 1 : i32
    %c0_i32_250 = arith.constant 0 : i32
    %211 = tpu.memref_slice %arg3[%210, %c0_i32_250] : memref<1000x128xf32, #tpu.memory_space<any>> -> memref<1x128xf32, #tpu.memory_space<any>>
    %c1_i32_251 = arith.constant 1 : i32
    %c0_i32_252 = arith.constant 0 : i32
    %212 = tpu.memref_slice %arg7[%c5_i32_247, %c1_i32_251, %c0_i32_252] : memref<8x4x128xf32, #tpu.memory_space<vmem>> -> memref<1x1x128xf32, #tpu.memory_space<vmem>>
    %213 = tpu.memref_squeeze %212 : memref<1x1x128xf32, #tpu.memory_space<vmem>> -> memref<1x128xf32, #tpu.memory_space<vmem>>
    %214 = tpu.memref_slice %arg8[%c5_i32_248, %c1_i32_249] : memref<8x4x!tpu.dma_semaphore, #tpu.memory_space<semaphore_mem>> -> memref<1x1x!tpu.dma_semaphore, #tpu.memory_space<semaphore_mem>>
    %215 = tpu.memref_squeeze %214 : memref<1x1x!tpu.dma_semaphore, #tpu.memory_space<semaphore_mem>> -> memref<!tpu.dma_semaphore, #tpu.memory_space<semaphore_mem>>
    tpu.enqueue_dma source(%211 : memref<1x128xf32, #tpu.memory_space<any>>) target(%213 : memref<1x128xf32, #tpu.memory_space<vmem>>) target_semaphore(%215 : memref<!tpu.dma_semaphore, #tpu.memory_space<semaphore_mem>>)
    %c1_253 = arith.constant 1 : index
    %c5_254 = arith.constant 5 : index
    %216 = memref.load %arg2[%c1_253, %c5_254] : memref<2x8xi32, #tpu.memory_space<smem>>
    %c0_i32_255 = arith.constant 0 : i32
    %217 = arith.maxsi %216, %c0_i32_255 : i32
    %c999_i32_256 = arith.constant 999 : i32
    %218 = arith.minsi %217, %c999_i32_256 : i32
    %c5_i32_257 = arith.constant 5 : i32
    %c5_i32_258 = arith.constant 5 : i32
    %c3_i32_259 = arith.constant 3 : i32
    %c0_i32_260 = arith.constant 0 : i32
    %219 = tpu.memref_slice %arg3[%218, %c0_i32_260] : memref<1000x128xf32, #tpu.memory_space<any>> -> memref<1x128xf32, #tpu.memory_space<any>>
    %c3_i32_261 = arith.constant 3 : i32
    %c0_i32_262 = arith.constant 0 : i32
    %220 = tpu.memref_slice %arg7[%c5_i32_257, %c3_i32_261, %c0_i32_262] : memref<8x4x128xf32, #tpu.memory_space<vmem>> -> memref<1x1x128xf32, #tpu.memory_space<vmem>>
    %221 = tpu.memref_squeeze %220 : memref<1x1x128xf32, #tpu.memory_space<vmem>> -> memref<1x128xf32, #tpu.memory_space<vmem>>
    %222 = tpu.memref_slice %arg8[%c5_i32_258, %c3_i32_259] : memref<8x4x!tpu.dma_semaphore, #tpu.memory_space<semaphore_mem>> -> memref<1x1x!tpu.dma_semaphore, #tpu.memory_space<semaphore_mem>>
    %223 = tpu.memref_squeeze %222 : memref<1x1x!tpu.dma_semaphore, #tpu.memory_space<semaphore_mem>> -> memref<!tpu.dma_semaphore, #tpu.memory_space<semaphore_mem>>
    tpu.enqueue_dma source(%219 : memref<1x128xf32, #tpu.memory_space<any>>) target(%221 : memref<1x128xf32, #tpu.memory_space<vmem>>) target_semaphore(%223 : memref<!tpu.dma_semaphore, #tpu.memory_space<semaphore_mem>>)
    %c1_263 = arith.constant 1 : index
    %c6_264 = arith.constant 6 : index
    %224 = memref.load %arg1[%c1_263, %c6_264] : memref<2x8xi32, #tpu.memory_space<smem>>
    %c0_i32_265 = arith.constant 0 : i32
    %225 = arith.maxsi %224, %c0_i32_265 : i32
    %c999_i32_266 = arith.constant 999 : i32
    %226 = arith.minsi %225, %c999_i32_266 : i32
    %c6_i32_267 = arith.constant 6 : i32
    %c6_i32_268 = arith.constant 6 : i32
    %c1_i32_269 = arith.constant 1 : i32
    %c0_i32_270 = arith.constant 0 : i32
    %227 = tpu.memref_slice %arg3[%226, %c0_i32_270] : memref<1000x128xf32, #tpu.memory_space<any>> -> memref<1x128xf32, #tpu.memory_space<any>>
    %c1_i32_271 = arith.constant 1 : i32
    %c0_i32_272 = arith.constant 0 : i32
    %228 = tpu.memref_slice %arg7[%c6_i32_267, %c1_i32_271, %c0_i32_272] : memref<8x4x128xf32, #tpu.memory_space<vmem>> -> memref<1x1x128xf32, #tpu.memory_space<vmem>>
    %229 = tpu.memref_squeeze %228 : memref<1x1x128xf32, #tpu.memory_space<vmem>> -> memref<1x128xf32, #tpu.memory_space<vmem>>
    %230 = tpu.memref_slice %arg8[%c6_i32_268, %c1_i32_269] : memref<8x4x!tpu.dma_semaphore, #tpu.memory_space<semaphore_mem>> -> memref<1x1x!tpu.dma_semaphore, #tpu.memory_space<semaphore_mem>>
    %231 = tpu.memref_squeeze %230 : memref<1x1x!tpu.dma_semaphore, #tpu.memory_space<semaphore_mem>> -> memref<!tpu.dma_semaphore, #tpu.memory_space<semaphore_mem>>
    tpu.enqueue_dma source(%227 : memref<1x128xf32, #tpu.memory_space<any>>) target(%229 : memref<1x128xf32, #tpu.memory_space<vmem>>) target_semaphore(%231 : memref<!tpu.dma_semaphore, #tpu.memory_space<semaphore_mem>>)
    %c1_273 = arith.constant 1 : index
    %c6_274 = arith.constant 6 : index
    %232 = memref.load %arg2[%c1_273, %c6_274] : memref<2x8xi32, #tpu.memory_space<smem>>
    %c0_i32_275 = arith.constant 0 : i32
    %233 = arith.maxsi %232, %c0_i32_275 : i32
    %c999_i32_276 = arith.constant 999 : i32
    %234 = arith.minsi %233, %c999_i32_276 : i32
    %c6_i32_277 = arith.constant 6 : i32
    %c6_i32_278 = arith.constant 6 : i32
    %c3_i32_279 = arith.constant 3 : i32
    %c0_i32_280 = arith.constant 0 : i32
    %235 = tpu.memref_slice %arg3[%234, %c0_i32_280] : memref<1000x128xf32, #tpu.memory_space<any>> -> memref<1x128xf32, #tpu.memory_space<any>>
    %c3_i32_281 = arith.constant 3 : i32
    %c0_i32_282 = arith.constant 0 : i32
    %236 = tpu.memref_slice %arg7[%c6_i32_277, %c3_i32_281, %c0_i32_282] : memref<8x4x128xf32, #tpu.memory_space<vmem>> -> memref<1x1x128xf32, #tpu.memory_space<vmem>>
    %237 = tpu.memref_squeeze %236 : memref<1x1x128xf32, #tpu.memory_space<vmem>> -> memref<1x128xf32, #tpu.memory_space<vmem>>
    %238 = tpu.memref_slice %arg8[%c6_i32_278, %c3_i32_279] : memref<8x4x!tpu.dma_semaphore, #tpu.memory_space<semaphore_mem>> -> memref<1x1x!tpu.dma_semaphore, #tpu.memory_space<semaphore_mem>>
    %239 = tpu.memref_squeeze %238 : memref<1x1x!tpu.dma_semaphore, #tpu.memory_space<semaphore_mem>> -> memref<!tpu.dma_semaphore, #tpu.memory_space<semaphore_mem>>
    tpu.enqueue_dma source(%235 : memref<1x128xf32, #tpu.memory_space<any>>) target(%237 : memref<1x128xf32, #tpu.memory_space<vmem>>) target_semaphore(%239 : memref<!tpu.dma_semaphore, #tpu.memory_space<semaphore_mem>>)
    %c1_283 = arith.constant 1 : index
    %c7_284 = arith.constant 7 : index
    %240 = memref.load %arg1[%c1_283, %c7_284] : memref<2x8xi32, #tpu.memory_space<smem>>
    %c0_i32_285 = arith.constant 0 : i32
    %241 = arith.maxsi %240, %c0_i32_285 : i32
    %c999_i32_286 = arith.constant 999 : i32
    %242 = arith.minsi %241, %c999_i32_286 : i32
    %c7_i32_287 = arith.constant 7 : i32
    %c7_i32_288 = arith.constant 7 : i32
    %c1_i32_289 = arith.constant 1 : i32
    %c0_i32_290 = arith.constant 0 : i32
    %243 = tpu.memref_slice %arg3[%242, %c0_i32_290] : memref<1000x128xf32, #tpu.memory_space<any>> -> memref<1x128xf32, #tpu.memory_space<any>>
    %c1_i32_291 = arith.constant 1 : i32
    %c0_i32_292 = arith.constant 0 : i32
    %244 = tpu.memref_slice %arg7[%c7_i32_287, %c1_i32_291, %c0_i32_292] : memref<8x4x128xf32, #tpu.memory_space<vmem>> -> memref<1x1x128xf32, #tpu.memory_space<vmem>>
    %245 = tpu.memref_squeeze %244 : memref<1x1x128xf32, #tpu.memory_space<vmem>> -> memref<1x128xf32, #tpu.memory_space<vmem>>
    %246 = tpu.memref_slice %arg8[%c7_i32_288, %c1_i32_289] : memref<8x4x!tpu.dma_semaphore, #tpu.memory_space<semaphore_mem>> -> memref<1x1x!tpu.dma_semaphore, #tpu.memory_space<semaphore_mem>>
    %247 = tpu.memref_squeeze %246 : memref<1x1x!tpu.dma_semaphore, #tpu.memory_space<semaphore_mem>> -> memref<!tpu.dma_semaphore, #tpu.memory_space<semaphore_mem>>
    tpu.enqueue_dma source(%243 : memref<1x128xf32, #tpu.memory_space<any>>) target(%245 : memref<1x128xf32, #tpu.memory_space<vmem>>) target_semaphore(%247 : memref<!tpu.dma_semaphore, #tpu.memory_space<semaphore_mem>>)
    %c1_293 = arith.constant 1 : index
    %c7_294 = arith.constant 7 : index
    %248 = memref.load %arg2[%c1_293, %c7_294] : memref<2x8xi32, #tpu.memory_space<smem>>
    %c0_i32_295 = arith.constant 0 : i32
    %249 = arith.maxsi %248, %c0_i32_295 : i32
    %c999_i32_296 = arith.constant 999 : i32
    %250 = arith.minsi %249, %c999_i32_296 : i32
    %c7_i32_297 = arith.constant 7 : i32
    %c7_i32_298 = arith.constant 7 : i32
    %c3_i32_299 = arith.constant 3 : i32
    %c0_i32_300 = arith.constant 0 : i32
    %251 = tpu.memref_slice %arg3[%250, %c0_i32_300] : memref<1000x128xf32, #tpu.memory_space<any>> -> memref<1x128xf32, #tpu.memory_space<any>>
    %c3_i32_301 = arith.constant 3 : i32
    %c0_i32_302 = arith.constant 0 : i32
    %252 = tpu.memref_slice %arg7[%c7_i32_297, %c3_i32_301, %c0_i32_302] : memref<8x4x128xf32, #tpu.memory_space<vmem>> -> memref<1x1x128xf32, #tpu.memory_space<vmem>>
    %253 = tpu.memref_squeeze %252 : memref<1x1x128xf32, #tpu.memory_space<vmem>> -> memref<1x128xf32, #tpu.memory_space<vmem>>
    %254 = tpu.memref_slice %arg8[%c7_i32_298, %c3_i32_299] : memref<8x4x!tpu.dma_semaphore, #tpu.memory_space<semaphore_mem>> -> memref<1x1x!tpu.dma_semaphore, #tpu.memory_space<semaphore_mem>>
    %255 = tpu.memref_squeeze %254 : memref<1x1x!tpu.dma_semaphore, #tpu.memory_space<semaphore_mem>> -> memref<!tpu.dma_semaphore, #tpu.memory_space<semaphore_mem>>
    tpu.enqueue_dma source(%251 : memref<1x128xf32, #tpu.memory_space<any>>) target(%253 : memref<1x128xf32, #tpu.memory_space<vmem>>) target_semaphore(%255 : memref<!tpu.dma_semaphore, #tpu.memory_space<semaphore_mem>>)
    %c0_303 = arith.constant 0 : index
    %c0_304 = arith.constant 0 : index
    %256 = vector.load %arg4[%c0_303, %c0_304] : memref<32x128xf32, #tpu.memory_space<vmem>>, vector<32x128xf32>
    %257 = tpu.iota {dimensions = array<i32: 1>} : vector<4x128xi32>
    %c64_i32 = arith.constant 64 : i32
    %258 = vector.broadcast %c64_i32 : i32 to vector<4x128xi32>
    %259 = arith.cmpi sge, %257, %258 : vector<4x128xi32>
    %c96_i32 = arith.constant 96 : i32
    %260 = vector.broadcast %c96_i32 : i32 to vector<4x128xi32>
    %261 = arith.cmpi slt, %257, %260 : vector<4x128xi32>
    %262 = arith.andi %259, %261 : vector<4x128xi1>
    %263 = tpu.iota {dimensions = array<i32: 0>} : vector<2x8xi32>
    %264 = tpu.iota {dimensions = array<i32: 1>} : vector<2x8xi32>
    %cst = arith.constant 0.000000e+00 : f32
    %265 = vector.broadcast %cst : f32 to vector<2x8xf32>
    %c0_i32_305 = arith.constant 0 : i32
    %266 = vector.broadcast %c0_i32_305 : i32 to vector<2x8xi32>
    %267 = arith.cmpi eq, %263, %266 : vector<2x8xi32>
    %c0_306 = arith.constant 0 : index
    %268 = memref.load %arg0[%c0_306] : memref<2xi32, #tpu.memory_space<smem>>
    %269 = vector.broadcast %268 : i32 to vector<2x8xi32>
    %270 = arith.cmpi eq, %264, %269 : vector<2x8xi32>
    %271 = arith.andi %267, %270 : vector<2x8xi1>
    %cst_307 = arith.constant 1.000000e+00 : f32
    %272 = vector.broadcast %cst_307 : f32 to vector<2x8xf32>
    %273 = arith.select %271, %272, %265 : vector<2x8xi1>, vector<2x8xf32>
    %c1_i32_308 = arith.constant 1 : i32
    %274 = vector.broadcast %c1_i32_308 : i32 to vector<2x8xi32>
    %275 = arith.cmpi eq, %263, %274 : vector<2x8xi32>
    %c1_309 = arith.constant 1 : index
    %276 = memref.load %arg0[%c1_309] : memref<2xi32, #tpu.memory_space<smem>>
    %277 = vector.broadcast %276 : i32 to vector<2x8xi32>
    %278 = arith.cmpi eq, %264, %277 : vector<2x8xi32>
    %279 = arith.andi %275, %278 : vector<2x8xi1>
    %cst_310 = arith.constant 1.000000e+00 : f32
    %280 = vector.broadcast %cst_310 : f32 to vector<2x8xf32>
    %281 = arith.select %279, %280, %273 : vector<2x8xi1>, vector<2x8xf32>
    %c0_i32_311 = arith.constant 0 : i32
    %c0_i32_312 = arith.constant 0 : i32
    %c0_i32_313 = arith.constant 0 : i32
    %c0_i32_314 = arith.constant 0 : i32
    %c0_i32_315 = arith.constant 0 : i32
    %282 = tpu.memref_slice %arg3[%c0_i32_314, %c0_i32_315] : memref<1000x128xf32, #tpu.memory_space<any>> -> memref<1x128xf32, #tpu.memory_space<any>>
    %c0_i32_316 = arith.constant 0 : i32
    %c0_i32_317 = arith.constant 0 : i32
    %283 = tpu.memref_slice %arg7[%c0_i32_311, %c0_i32_316, %c0_i32_317] : memref<8x4x128xf32, #tpu.memory_space<vmem>> -> memref<1x1x128xf32, #tpu.memory_space<vmem>>
    %284 = tpu.memref_squeeze %283 : memref<1x1x128xf32, #tpu.memory_space<vmem>> -> memref<1x128xf32, #tpu.memory_space<vmem>>
    %285 = tpu.memref_slice %arg8[%c0_i32_312, %c0_i32_313] : memref<8x4x!tpu.dma_semaphore, #tpu.memory_space<semaphore_mem>> -> memref<1x1x!tpu.dma_semaphore, #tpu.memory_space<semaphore_mem>>
    %286 = tpu.memref_squeeze %285 : memref<1x1x!tpu.dma_semaphore, #tpu.memory_space<semaphore_mem>> -> memref<!tpu.dma_semaphore, #tpu.memory_space<semaphore_mem>>
    tpu.wait_dma2 semaphore(%286 : memref<!tpu.dma_semaphore, #tpu.memory_space<semaphore_mem>>) src(%282 : memref<1x128xf32, #tpu.memory_space<any>>) dst(%284 : memref<1x128xf32, #tpu.memory_space<vmem>>)
    %c1_i32_318 = arith.constant 1 : i32
    %c1_i32_319 = arith.constant 1 : i32
    %c0_i32_320 = arith.constant 0 : i32
    %c0_i32_321 = arith.constant 0 : i32
    %c0_i32_322 = arith.constant 0 : i32
    %287 = tpu.memref_slice %arg3[%c0_i32_321, %c0_i32_322] : memref<1000x128xf32, #tpu.memory_space<any>> -> memref<1x128xf32, #tpu.memory_space<any>>
    %c0_i32_323 = arith.constant 0 : i32
    %c0_i32_324 = arith.constant 0 : i32
    %288 = tpu.memref_slice %arg7[%c1_i32_318, %c0_i32_323, %c0_i32_324] : memref<8x4x128xf32, #tpu.memory_space<vmem>> -> memref<1x1x128xf32, #tpu.memory_space<vmem>>
    %289 = tpu.memref_squeeze %288 : memref<1x1x128xf32, #tpu.memory_space<vmem>> -> memref<1x128xf32, #tpu.memory_space<vmem>>
    %290 = tpu.memref_slice %arg8[%c1_i32_319, %c0_i32_320] : memref<8x4x!tpu.dma_semaphore, #tpu.memory_space<semaphore_mem>> -> memref<1x1x!tpu.dma_semaphore, #tpu.memory_space<semaphore_mem>>
    %291 = tpu.memref_squeeze %290 : memref<1x1x!tpu.dma_semaphore, #tpu.memory_space<semaphore_mem>> -> memref<!tpu.dma_semaphore, #tpu.memory_space<semaphore_mem>>
    tpu.wait_dma2 semaphore(%291 : memref<!tpu.dma_semaphore, #tpu.memory_space<semaphore_mem>>) src(%287 : memref<1x128xf32, #tpu.memory_space<any>>) dst(%289 : memref<1x128xf32, #tpu.memory_space<vmem>>)
    %c2_i32_325 = arith.constant 2 : i32
    %c2_i32_326 = arith.constant 2 : i32
    %c0_i32_327 = arith.constant 0 : i32
    %c0_i32_328 = arith.constant 0 : i32
    %c0_i32_329 = arith.constant 0 : i32
    %292 = tpu.memref_slice %arg3[%c0_i32_328, %c0_i32_329] : memref<1000x128xf32, #tpu.memory_space<any>> -> memref<1x128xf32, #tpu.memory_space<any>>
    %c0_i32_330 = arith.constant 0 : i32
    %c0_i32_331 = arith.constant 0 : i32
    %293 = tpu.memref_slice %arg7[%c2_i32_325, %c0_i32_330, %c0_i32_331] : memref<8x4x128xf32, #tpu.memory_space<vmem>> -> memref<1x1x128xf32, #tpu.memory_space<vmem>>
    %294 = tpu.memref_squeeze %293 : memref<1x1x128xf32, #tpu.memory_space<vmem>> -> memref<1x128xf32, #tpu.memory_space<vmem>>
    %295 = tpu.memref_slice %arg8[%c2_i32_326, %c0_i32_327] : memref<8x4x!tpu.dma_semaphore, #tpu.memory_space<semaphore_mem>> -> memref<1x1x!tpu.dma_semaphore, #tpu.memory_space<semaphore_mem>>
    %296 = tpu.memref_squeeze %295 : memref<1x1x!tpu.dma_semaphore, #tpu.memory_space<semaphore_mem>> -> memref<!tpu.dma_semaphore, #tpu.memory_space<semaphore_mem>>
    tpu.wait_dma2 semaphore(%296 : memref<!tpu.dma_semaphore, #tpu.memory_space<semaphore_mem>>) src(%292 : memref<1x128xf32, #tpu.memory_space<any>>) dst(%294 : memref<1x128xf32, #tpu.memory_space<vmem>>)
    %c3_i32_332 = arith.constant 3 : i32
    %c3_i32_333 = arith.constant 3 : i32
    %c0_i32_334 = arith.constant 0 : i32
    %c0_i32_335 = arith.constant 0 : i32
    %c0_i32_336 = arith.constant 0 : i32
    %297 = tpu.memref_slice %arg3[%c0_i32_335, %c0_i32_336] : memref<1000x128xf32, #tpu.memory_space<any>> -> memref<1x128xf32, #tpu.memory_space<any>>
    %c0_i32_337 = arith.constant 0 : i32
    %c0_i32_338 = arith.constant 0 : i32
    %298 = tpu.memref_slice %arg7[%c3_i32_332, %c0_i32_337, %c0_i32_338] : memref<8x4x128xf32, #tpu.memory_space<vmem>> -> memref<1x1x128xf32, #tpu.memory_space<vmem>>
    %299 = tpu.memref_squeeze %298 : memref<1x1x128xf32, #tpu.memory_space<vmem>> -> memref<1x128xf32, #tpu.memory_space<vmem>>
    %300 = tpu.memref_slice %arg8[%c3_i32_333, %c0_i32_334] : memref<8x4x!tpu.dma_semaphore, #tpu.memory_space<semaphore_mem>> -> memref<1x1x!tpu.dma_semaphore, #tpu.memory_space<semaphore_mem>>
    %301 = tpu.memref_squeeze %300 : memref<1x1x!tpu.dma_semaphore, #tpu.memory_space<semaphore_mem>> -> memref<!tpu.dma_semaphore, #tpu.memory_space<semaphore_mem>>
    tpu.wait_dma2 semaphore(%301 : memref<!tpu.dma_semaphore, #tpu.memory_space<semaphore_mem>>) src(%297 : memref<1x128xf32, #tpu.memory_space<any>>) dst(%299 : memref<1x128xf32, #tpu.memory_space<vmem>>)
    %c4_i32_339 = arith.constant 4 : i32
    %c4_i32_340 = arith.constant 4 : i32
    %c0_i32_341 = arith.constant 0 : i32
    %c0_i32_342 = arith.constant 0 : i32
    %c0_i32_343 = arith.constant 0 : i32
    %302 = tpu.memref_slice %arg3[%c0_i32_342, %c0_i32_343] : memref<1000x128xf32, #tpu.memory_space<any>> -> memref<1x128xf32, #tpu.memory_space<any>>
    %c0_i32_344 = arith.constant 0 : i32
    %c0_i32_345 = arith.constant 0 : i32
    %303 = tpu.memref_slice %arg7[%c4_i32_339, %c0_i32_344, %c0_i32_345] : memref<8x4x128xf32, #tpu.memory_space<vmem>> -> memref<1x1x128xf32, #tpu.memory_space<vmem>>
    %304 = tpu.memref_squeeze %303 : memref<1x1x128xf32, #tpu.memory_space<vmem>> -> memref<1x128xf32, #tpu.memory_space<vmem>>
    %305 = tpu.memref_slice %arg8[%c4_i32_340, %c0_i32_341] : memref<8x4x!tpu.dma_semaphore, #tpu.memory_space<semaphore_mem>> -> memref<1x1x!tpu.dma_semaphore, #tpu.memory_space<semaphore_mem>>
    %306 = tpu.memref_squeeze %305 : memref<1x1x!tpu.dma_semaphore, #tpu.memory_space<semaphore_mem>> -> memref<!tpu.dma_semaphore, #tpu.memory_space<semaphore_mem>>
    tpu.wait_dma2 semaphore(%306 : memref<!tpu.dma_semaphore, #tpu.memory_space<semaphore_mem>>) src(%302 : memref<1x128xf32, #tpu.memory_space<any>>) dst(%304 : memref<1x128xf32, #tpu.memory_space<vmem>>)
    %c5_i32_346 = arith.constant 5 : i32
    %c5_i32_347 = arith.constant 5 : i32
    %c0_i32_348 = arith.constant 0 : i32
    %c0_i32_349 = arith.constant 0 : i32
    %c0_i32_350 = arith.constant 0 : i32
    %307 = tpu.memref_slice %arg3[%c0_i32_349, %c0_i32_350] : memref<1000x128xf32, #tpu.memory_space<any>> -> memref<1x128xf32, #tpu.memory_space<any>>
    %c0_i32_351 = arith.constant 0 : i32
    %c0_i32_352 = arith.constant 0 : i32
    %308 = tpu.memref_slice %arg7[%c5_i32_346, %c0_i32_351, %c0_i32_352] : memref<8x4x128xf32, #tpu.memory_space<vmem>> -> memref<1x1x128xf32, #tpu.memory_space<vmem>>
    %309 = tpu.memref_squeeze %308 : memref<1x1x128xf32, #tpu.memory_space<vmem>> -> memref<1x128xf32, #tpu.memory_space<vmem>>
    %310 = tpu.memref_slice %arg8[%c5_i32_347, %c0_i32_348] : memref<8x4x!tpu.dma_semaphore, #tpu.memory_space<semaphore_mem>> -> memref<1x1x!tpu.dma_semaphore, #tpu.memory_space<semaphore_mem>>
    %311 = tpu.memref_squeeze %310 : memref<1x1x!tpu.dma_semaphore, #tpu.memory_space<semaphore_mem>> -> memref<!tpu.dma_semaphore, #tpu.memory_space<semaphore_mem>>
    tpu.wait_dma2 semaphore(%311 : memref<!tpu.dma_semaphore, #tpu.memory_space<semaphore_mem>>) src(%307 : memref<1x128xf32, #tpu.memory_space<any>>) dst(%309 : memref<1x128xf32, #tpu.memory_space<vmem>>)
    %c6_i32_353 = arith.constant 6 : i32
    %c6_i32_354 = arith.constant 6 : i32
    %c0_i32_355 = arith.constant 0 : i32
    %c0_i32_356 = arith.constant 0 : i32
    %c0_i32_357 = arith.constant 0 : i32
    %312 = tpu.memref_slice %arg3[%c0_i32_356, %c0_i32_357] : memref<1000x128xf32, #tpu.memory_space<any>> -> memref<1x128xf32, #tpu.memory_space<any>>
    %c0_i32_358 = arith.constant 0 : i32
    %c0_i32_359 = arith.constant 0 : i32
    %313 = tpu.memref_slice %arg7[%c6_i32_353, %c0_i32_358, %c0_i32_359] : memref<8x4x128xf32, #tpu.memory_space<vmem>> -> memref<1x1x128xf32, #tpu.memory_space<vmem>>
    %314 = tpu.memref_squeeze %313 : memref<1x1x128xf32, #tpu.memory_space<vmem>> -> memref<1x128xf32, #tpu.memory_space<vmem>>
    %315 = tpu.memref_slice %arg8[%c6_i32_354, %c0_i32_355] : memref<8x4x!tpu.dma_semaphore, #tpu.memory_space<semaphore_mem>> -> memref<1x1x!tpu.dma_semaphore, #tpu.memory_space<semaphore_mem>>
    %316 = tpu.memref_squeeze %315 : memref<1x1x!tpu.dma_semaphore, #tpu.memory_space<semaphore_mem>> -> memref<!tpu.dma_semaphore, #tpu.memory_space<semaphore_mem>>
    tpu.wait_dma2 semaphore(%316 : memref<!tpu.dma_semaphore, #tpu.memory_space<semaphore_mem>>) src(%312 : memref<1x128xf32, #tpu.memory_space<any>>) dst(%314 : memref<1x128xf32, #tpu.memory_space<vmem>>)
    %c7_i32_360 = arith.constant 7 : i32
    %c7_i32_361 = arith.constant 7 : i32
    %c0_i32_362 = arith.constant 0 : i32
    %c0_i32_363 = arith.constant 0 : i32
    %c0_i32_364 = arith.constant 0 : i32
    %317 = tpu.memref_slice %arg3[%c0_i32_363, %c0_i32_364] : memref<1000x128xf32, #tpu.memory_space<any>> -> memref<1x128xf32, #tpu.memory_space<any>>
    %c0_i32_365 = arith.constant 0 : i32
    %c0_i32_366 = arith.constant 0 : i32
    %318 = tpu.memref_slice %arg7[%c7_i32_360, %c0_i32_365, %c0_i32_366] : memref<8x4x128xf32, #tpu.memory_space<vmem>> -> memref<1x1x128xf32, #tpu.memory_space<vmem>>
    %319 = tpu.memref_squeeze %318 : memref<1x1x128xf32, #tpu.memory_space<vmem>> -> memref<1x128xf32, #tpu.memory_space<vmem>>
    %320 = tpu.memref_slice %arg8[%c7_i32_361, %c0_i32_362] : memref<8x4x!tpu.dma_semaphore, #tpu.memory_space<semaphore_mem>> -> memref<1x1x!tpu.dma_semaphore, #tpu.memory_space<semaphore_mem>>
    %321 = tpu.memref_squeeze %320 : memref<1x1x!tpu.dma_semaphore, #tpu.memory_space<semaphore_mem>> -> memref<!tpu.dma_semaphore, #tpu.memory_space<semaphore_mem>>
    tpu.wait_dma2 semaphore(%321 : memref<!tpu.dma_semaphore, #tpu.memory_space<semaphore_mem>>) src(%317 : memref<1x128xf32, #tpu.memory_space<any>>) dst(%319 : memref<1x128xf32, #tpu.memory_space<vmem>>)
    %c0_i32_367 = arith.constant 0 : i32
    %c0_i32_368 = arith.constant 0 : i32
    %c1_i32_369 = arith.constant 1 : i32
    %c0_i32_370 = arith.constant 0 : i32
    %c0_i32_371 = arith.constant 0 : i32
    %322 = tpu.memref_slice %arg3[%c0_i32_370, %c0_i32_371] : memref<1000x128xf32, #tpu.memory_space<any>> -> memref<1x128xf32, #tpu.memory_space<any>>
    %c1_i32_372 = arith.constant 1 : i32
    %c0_i32_373 = arith.constant 0 : i32
    %323 = tpu.memref_slice %arg7[%c0_i32_367, %c1_i32_372, %c0_i32_373] : memref<8x4x128xf32, #tpu.memory_space<vmem>> -> memref<1x1x128xf32, #tpu.memory_space<vmem>>
    %324 = tpu.memref_squeeze %323 : memref<1x1x128xf32, #tpu.memory_space<vmem>> -> memref<1x128xf32, #tpu.memory_space<vmem>>
    %325 = tpu.memref_slice %arg8[%c0_i32_368, %c1_i32_369] : memref<8x4x!tpu.dma_semaphore, #tpu.memory_space<semaphore_mem>> -> memref<1x1x!tpu.dma_semaphore, #tpu.memory_space<semaphore_mem>>
    %326 = tpu.memref_squeeze %325 : memref<1x1x!tpu.dma_semaphore, #tpu.memory_space<semaphore_mem>> -> memref<!tpu.dma_semaphore, #tpu.memory_space<semaphore_mem>>
    tpu.wait_dma2 semaphore(%326 : memref<!tpu.dma_semaphore, #tpu.memory_space<semaphore_mem>>) src(%322 : memref<1x128xf32, #tpu.memory_space<any>>) dst(%324 : memref<1x128xf32, #tpu.memory_space<vmem>>)
    %c1_i32_374 = arith.constant 1 : i32
    %c1_i32_375 = arith.constant 1 : i32
    %c1_i32_376 = arith.constant 1 : i32
    %c0_i32_377 = arith.constant 0 : i32
    %c0_i32_378 = arith.constant 0 : i32
    %327 = tpu.memref_slice %arg3[%c0_i32_377, %c0_i32_378] : memref<1000x128xf32, #tpu.memory_space<any>> -> memref<1x128xf32, #tpu.memory_space<any>>
    %c1_i32_379 = arith.constant 1 : i32
    %c0_i32_380 = arith.constant 0 : i32
    %328 = tpu.memref_slice %arg7[%c1_i32_374, %c1_i32_379, %c0_i32_380] : memref<8x4x128xf32, #tpu.memory_space<vmem>> -> memref<1x1x128xf32, #tpu.memory_space<vmem>>
    %329 = tpu.memref_squeeze %328 : memref<1x1x128xf32, #tpu.memory_space<vmem>> -> memref<1x128xf32, #tpu.memory_space<vmem>>
    %330 = tpu.memref_slice %arg8[%c1_i32_375, %c1_i32_376] : memref<8x4x!tpu.dma_semaphore, #tpu.memory_space<semaphore_mem>> -> memref<1x1x!tpu.dma_semaphore, #tpu.memory_space<semaphore_mem>>
    %331 = tpu.memref_squeeze %330 : memref<1x1x!tpu.dma_semaphore, #tpu.memory_space<semaphore_mem>> -> memref<!tpu.dma_semaphore, #tpu.memory_space<semaphore_mem>>
    tpu.wait_dma2 semaphore(%331 : memref<!tpu.dma_semaphore, #tpu.memory_space<semaphore_mem>>) src(%327 : memref<1x128xf32, #tpu.memory_space<any>>) dst(%329 : memref<1x128xf32, #tpu.memory_space<vmem>>)
    %c2_i32_381 = arith.constant 2 : i32
    %c2_i32_382 = arith.constant 2 : i32
    %c1_i32_383 = arith.constant 1 : i32
    %c0_i32_384 = arith.constant 0 : i32
    %c0_i32_385 = arith.constant 0 : i32
    %332 = tpu.memref_slice %arg3[%c0_i32_384, %c0_i32_385] : memref<1000x128xf32, #tpu.memory_space<any>> -> memref<1x128xf32, #tpu.memory_space<any>>
    %c1_i32_386 = arith.constant 1 : i32
    %c0_i32_387 = arith.constant 0 : i32
    %333 = tpu.memref_slice %arg7[%c2_i32_381, %c1_i32_386, %c0_i32_387] : memref<8x4x128xf32, #tpu.memory_space<vmem>> -> memref<1x1x128xf32, #tpu.memory_space<vmem>>
    %334 = tpu.memref_squeeze %333 : memref<1x1x128xf32, #tpu.memory_space<vmem>> -> memref<1x128xf32, #tpu.memory_space<vmem>>
    %335 = tpu.memref_slice %arg8[%c2_i32_382, %c1_i32_383] : memref<8x4x!tpu.dma_semaphore, #tpu.memory_space<semaphore_mem>> -> memref<1x1x!tpu.dma_semaphore, #tpu.memory_space<semaphore_mem>>
    %336 = tpu.memref_squeeze %335 : memref<1x1x!tpu.dma_semaphore, #tpu.memory_space<semaphore_mem>> -> memref<!tpu.dma_semaphore, #tpu.memory_space<semaphore_mem>>
    tpu.wait_dma2 semaphore(%336 : memref<!tpu.dma_semaphore, #tpu.memory_space<semaphore_mem>>) src(%332 : memref<1x128xf32, #tpu.memory_space<any>>) dst(%334 : memref<1x128xf32, #tpu.memory_space<vmem>>)
    %c3_i32_388 = arith.constant 3 : i32
    %c3_i32_389 = arith.constant 3 : i32
    %c1_i32_390 = arith.constant 1 : i32
    %c0_i32_391 = arith.constant 0 : i32
    %c0_i32_392 = arith.constant 0 : i32
    %337 = tpu.memref_slice %arg3[%c0_i32_391, %c0_i32_392] : memref<1000x128xf32, #tpu.memory_space<any>> -> memref<1x128xf32, #tpu.memory_space<any>>
    %c1_i32_393 = arith.constant 1 : i32
    %c0_i32_394 = arith.constant 0 : i32
    %338 = tpu.memref_slice %arg7[%c3_i32_388, %c1_i32_393, %c0_i32_394] : memref<8x4x128xf32, #tpu.memory_space<vmem>> -> memref<1x1x128xf32, #tpu.memory_space<vmem>>
    %339 = tpu.memref_squeeze %338 : memref<1x1x128xf32, #tpu.memory_space<vmem>> -> memref<1x128xf32, #tpu.memory_space<vmem>>
    %340 = tpu.memref_slice %arg8[%c3_i32_389, %c1_i32_390] : memref<8x4x!tpu.dma_semaphore, #tpu.memory_space<semaphore_mem>> -> memref<1x1x!tpu.dma_semaphore, #tpu.memory_space<semaphore_mem>>
    %341 = tpu.memref_squeeze %340 : memref<1x1x!tpu.dma_semaphore, #tpu.memory_space<semaphore_mem>> -> memref<!tpu.dma_semaphore, #tpu.memory_space<semaphore_mem>>
    tpu.wait_dma2 semaphore(%341 : memref<!tpu.dma_semaphore, #tpu.memory_space<semaphore_mem>>) src(%337 : memref<1x128xf32, #tpu.memory_space<any>>) dst(%339 : memref<1x128xf32, #tpu.memory_space<vmem>>)
    %c4_i32_395 = arith.constant 4 : i32
    %c4_i32_396 = arith.constant 4 : i32
    %c1_i32_397 = arith.constant 1 : i32
    %c0_i32_398 = arith.constant 0 : i32
    %c0_i32_399 = arith.constant 0 : i32
    %342 = tpu.memref_slice %arg3[%c0_i32_398, %c0_i32_399] : memref<1000x128xf32, #tpu.memory_space<any>> -> memref<1x128xf32, #tpu.memory_space<any>>
    %c1_i32_400 = arith.constant 1 : i32
    %c0_i32_401 = arith.constant 0 : i32
    %343 = tpu.memref_slice %arg7[%c4_i32_395, %c1_i32_400, %c0_i32_401] : memref<8x4x128xf32, #tpu.memory_space<vmem>> -> memref<1x1x128xf32, #tpu.memory_space<vmem>>
    %344 = tpu.memref_squeeze %343 : memref<1x1x128xf32, #tpu.memory_space<vmem>> -> memref<1x128xf32, #tpu.memory_space<vmem>>
    %345 = tpu.memref_slice %arg8[%c4_i32_396, %c1_i32_397] : memref<8x4x!tpu.dma_semaphore, #tpu.memory_space<semaphore_mem>> -> memref<1x1x!tpu.dma_semaphore, #tpu.memory_space<semaphore_mem>>
    %346 = tpu.memref_squeeze %345 : memref<1x1x!tpu.dma_semaphore, #tpu.memory_space<semaphore_mem>> -> memref<!tpu.dma_semaphore, #tpu.memory_space<semaphore_mem>>
    tpu.wait_dma2 semaphore(%346 : memref<!tpu.dma_semaphore, #tpu.memory_space<semaphore_mem>>) src(%342 : memref<1x128xf32, #tpu.memory_space<any>>) dst(%344 : memref<1x128xf32, #tpu.memory_space<vmem>>)
    %c5_i32_402 = arith.constant 5 : i32
    %c5_i32_403 = arith.constant 5 : i32
    %c1_i32_404 = arith.constant 1 : i32
    %c0_i32_405 = arith.constant 0 : i32
    %c0_i32_406 = arith.constant 0 : i32
    %347 = tpu.memref_slice %arg3[%c0_i32_405, %c0_i32_406] : memref<1000x128xf32, #tpu.memory_space<any>> -> memref<1x128xf32, #tpu.memory_space<any>>
    %c1_i32_407 = arith.constant 1 : i32
    %c0_i32_408 = arith.constant 0 : i32
    %348 = tpu.memref_slice %arg7[%c5_i32_402, %c1_i32_407, %c0_i32_408] : memref<8x4x128xf32, #tpu.memory_space<vmem>> -> memref<1x1x128xf32, #tpu.memory_space<vmem>>
    %349 = tpu.memref_squeeze %348 : memref<1x1x128xf32, #tpu.memory_space<vmem>> -> memref<1x128xf32, #tpu.memory_space<vmem>>
    %350 = tpu.memref_slice %arg8[%c5_i32_403, %c1_i32_404] : memref<8x4x!tpu.dma_semaphore, #tpu.memory_space<semaphore_mem>> -> memref<1x1x!tpu.dma_semaphore, #tpu.memory_space<semaphore_mem>>
    %351 = tpu.memref_squeeze %350 : memref<1x1x!tpu.dma_semaphore, #tpu.memory_space<semaphore_mem>> -> memref<!tpu.dma_semaphore, #tpu.memory_space<semaphore_mem>>
    tpu.wait_dma2 semaphore(%351 : memref<!tpu.dma_semaphore, #tpu.memory_space<semaphore_mem>>) src(%347 : memref<1x128xf32, #tpu.memory_space<any>>) dst(%349 : memref<1x128xf32, #tpu.memory_space<vmem>>)
    %c6_i32_409 = arith.constant 6 : i32
    %c6_i32_410 = arith.constant 6 : i32
    %c1_i32_411 = arith.constant 1 : i32
    %c0_i32_412 = arith.constant 0 : i32
    %c0_i32_413 = arith.constant 0 : i32
    %352 = tpu.memref_slice %arg3[%c0_i32_412, %c0_i32_413] : memref<1000x128xf32, #tpu.memory_space<any>> -> memref<1x128xf32, #tpu.memory_space<any>>
    %c1_i32_414 = arith.constant 1 : i32
    %c0_i32_415 = arith.constant 0 : i32
    %353 = tpu.memref_slice %arg7[%c6_i32_409, %c1_i32_414, %c0_i32_415] : memref<8x4x128xf32, #tpu.memory_space<vmem>> -> memref<1x1x128xf32, #tpu.memory_space<vmem>>
    %354 = tpu.memref_squeeze %353 : memref<1x1x128xf32, #tpu.memory_space<vmem>> -> memref<1x128xf32, #tpu.memory_space<vmem>>
    %355 = tpu.memref_slice %arg8[%c6_i32_410, %c1_i32_411] : memref<8x4x!tpu.dma_semaphore, #tpu.memory_space<semaphore_mem>> -> memref<1x1x!tpu.dma_semaphore, #tpu.memory_space<semaphore_mem>>
    %356 = tpu.memref_squeeze %355 : memref<1x1x!tpu.dma_semaphore, #tpu.memory_space<semaphore_mem>> -> memref<!tpu.dma_semaphore, #tpu.memory_space<semaphore_mem>>
    tpu.wait_dma2 semaphore(%356 : memref<!tpu.dma_semaphore, #tpu.memory_space<semaphore_mem>>) src(%352 : memref<1x128xf32, #tpu.memory_space<any>>) dst(%354 : memref<1x128xf32, #tpu.memory_space<vmem>>)
    %c7_i32_416 = arith.constant 7 : i32
    %c7_i32_417 = arith.constant 7 : i32
    %c1_i32_418 = arith.constant 1 : i32
    %c0_i32_419 = arith.constant 0 : i32
    %c0_i32_420 = arith.constant 0 : i32
    %357 = tpu.memref_slice %arg3[%c0_i32_419, %c0_i32_420] : memref<1000x128xf32, #tpu.memory_space<any>> -> memref<1x128xf32, #tpu.memory_space<any>>
    %c1_i32_421 = arith.constant 1 : i32
    %c0_i32_422 = arith.constant 0 : i32
    %358 = tpu.memref_slice %arg7[%c7_i32_416, %c1_i32_421, %c0_i32_422] : memref<8x4x128xf32, #tpu.memory_space<vmem>> -> memref<1x1x128xf32, #tpu.memory_space<vmem>>
    %359 = tpu.memref_squeeze %358 : memref<1x1x128xf32, #tpu.memory_space<vmem>> -> memref<1x128xf32, #tpu.memory_space<vmem>>
    %360 = tpu.memref_slice %arg8[%c7_i32_417, %c1_i32_418] : memref<8x4x!tpu.dma_semaphore, #tpu.memory_space<semaphore_mem>> -> memref<1x1x!tpu.dma_semaphore, #tpu.memory_space<semaphore_mem>>
    %361 = tpu.memref_squeeze %360 : memref<1x1x!tpu.dma_semaphore, #tpu.memory_space<semaphore_mem>> -> memref<!tpu.dma_semaphore, #tpu.memory_space<semaphore_mem>>
    tpu.wait_dma2 semaphore(%361 : memref<!tpu.dma_semaphore, #tpu.memory_space<semaphore_mem>>) src(%357 : memref<1x128xf32, #tpu.memory_space<any>>) dst(%359 : memref<1x128xf32, #tpu.memory_space<vmem>>)
    %c0_i32_423 = arith.constant 0 : i32
    %c0_i32_424 = arith.constant 0 : i32
    %c2_i32_425 = arith.constant 2 : i32
    %c0_i32_426 = arith.constant 0 : i32
    %c0_i32_427 = arith.constant 0 : i32
    %362 = tpu.memref_slice %arg3[%c0_i32_426, %c0_i32_427] : memref<1000x128xf32, #tpu.memory_space<any>> -> memref<1x128xf32, #tpu.memory_space<any>>
    %c2_i32_428 = arith.constant 2 : i32
    %c0_i32_429 = arith.constant 0 : i32
    %363 = tpu.memref_slice %arg7[%c0_i32_423, %c2_i32_428, %c0_i32_429] : memref<8x4x128xf32, #tpu.memory_space<vmem>> -> memref<1x1x128xf32, #tpu.memory_space<vmem>>
    %364 = tpu.memref_squeeze %363 : memref<1x1x128xf32, #tpu.memory_space<vmem>> -> memref<1x128xf32, #tpu.memory_space<vmem>>
    %365 = tpu.memref_slice %arg8[%c0_i32_424, %c2_i32_425] : memref<8x4x!tpu.dma_semaphore, #tpu.memory_space<semaphore_mem>> -> memref<1x1x!tpu.dma_semaphore, #tpu.memory_space<semaphore_mem>>
    %366 = tpu.memref_squeeze %365 : memref<1x1x!tpu.dma_semaphore, #tpu.memory_space<semaphore_mem>> -> memref<!tpu.dma_semaphore, #tpu.memory_space<semaphore_mem>>
    tpu.wait_dma2 semaphore(%366 : memref<!tpu.dma_semaphore, #tpu.memory_space<semaphore_mem>>) src(%362 : memref<1x128xf32, #tpu.memory_space<any>>) dst(%364 : memref<1x128xf32, #tpu.memory_space<vmem>>)
    %c1_i32_430 = arith.constant 1 : i32
    %c1_i32_431 = arith.constant 1 : i32
    %c2_i32_432 = arith.constant 2 : i32
    %c0_i32_433 = arith.constant 0 : i32
    %c0_i32_434 = arith.constant 0 : i32
    %367 = tpu.memref_slice %arg3[%c0_i32_433, %c0_i32_434] : memref<1000x128xf32, #tpu.memory_space<any>> -> memref<1x128xf32, #tpu.memory_space<any>>
    %c2_i32_435 = arith.constant 2 : i32
    %c0_i32_436 = arith.constant 0 : i32
    %368 = tpu.memref_slice %arg7[%c1_i32_430, %c2_i32_435, %c0_i32_436] : memref<8x4x128xf32, #tpu.memory_space<vmem>> -> memref<1x1x128xf32, #tpu.memory_space<vmem>>
    %369 = tpu.memref_squeeze %368 : memref<1x1x128xf32, #tpu.memory_space<vmem>> -> memref<1x128xf32, #tpu.memory_space<vmem>>
    %370 = tpu.memref_slice %arg8[%c1_i32_431, %c2_i32_432] : memref<8x4x!tpu.dma_semaphore, #tpu.memory_space<semaphore_mem>> -> memref<1x1x!tpu.dma_semaphore, #tpu.memory_space<semaphore_mem>>
    %371 = tpu.memref_squeeze %370 : memref<1x1x!tpu.dma_semaphore, #tpu.memory_space<semaphore_mem>> -> memref<!tpu.dma_semaphore, #tpu.memory_space<semaphore_mem>>
    tpu.wait_dma2 semaphore(%371 : memref<!tpu.dma_semaphore, #tpu.memory_space<semaphore_mem>>) src(%367 : memref<1x128xf32, #tpu.memory_space<any>>) dst(%369 : memref<1x128xf32, #tpu.memory_space<vmem>>)
    %c2_i32_437 = arith.constant 2 : i32
    %c2_i32_438 = arith.constant 2 : i32
    %c2_i32_439 = arith.constant 2 : i32
    %c0_i32_440 = arith.constant 0 : i32
    %c0_i32_441 = arith.constant 0 : i32
    %372 = tpu.memref_slice %arg3[%c0_i32_440, %c0_i32_441] : memref<1000x128xf32, #tpu.memory_space<any>> -> memref<1x128xf32, #tpu.memory_space<any>>
    %c2_i32_442 = arith.constant 2 : i32
    %c0_i32_443 = arith.constant 0 : i32
    %373 = tpu.memref_slice %arg7[%c2_i32_437, %c2_i32_442, %c0_i32_443] : memref<8x4x128xf32, #tpu.memory_space<vmem>> -> memref<1x1x128xf32, #tpu.memory_space<vmem>>
    %374 = tpu.memref_squeeze %373 : memref<1x1x128xf32, #tpu.memory_space<vmem>> -> memref<1x128xf32, #tpu.memory_space<vmem>>
    %375 = tpu.memref_slice %arg8[%c2_i32_438, %c2_i32_439] : memref<8x4x!tpu.dma_semaphore, #tpu.memory_space<semaphore_mem>> -> memref<1x1x!tpu.dma_semaphore, #tpu.memory_space<semaphore_mem>>
    %376 = tpu.memref_squeeze %375 : memref<1x1x!tpu.dma_semaphore, #tpu.memory_space<semaphore_mem>> -> memref<!tpu.dma_semaphore, #tpu.memory_space<semaphore_mem>>
    tpu.wait_dma2 semaphore(%376 : memref<!tpu.dma_semaphore, #tpu.memory_space<semaphore_mem>>) src(%372 : memref<1x128xf32, #tpu.memory_space<any>>) dst(%374 : memref<1x128xf32, #tpu.memory_space<vmem>>)
    %c3_i32_444 = arith.constant 3 : i32
    %c3_i32_445 = arith.constant 3 : i32
    %c2_i32_446 = arith.constant 2 : i32
    %c0_i32_447 = arith.constant 0 : i32
    %c0_i32_448 = arith.constant 0 : i32
    %377 = tpu.memref_slice %arg3[%c0_i32_447, %c0_i32_448] : memref<1000x128xf32, #tpu.memory_space<any>> -> memref<1x128xf32, #tpu.memory_space<any>>
    %c2_i32_449 = arith.constant 2 : i32
    %c0_i32_450 = arith.constant 0 : i32
    %378 = tpu.memref_slice %arg7[%c3_i32_444, %c2_i32_449, %c0_i32_450] : memref<8x4x128xf32, #tpu.memory_space<vmem>> -> memref<1x1x128xf32, #tpu.memory_space<vmem>>
    %379 = tpu.memref_squeeze %378 : memref<1x1x128xf32, #tpu.memory_space<vmem>> -> memref<1x128xf32, #tpu.memory_space<vmem>>
    %380 = tpu.memref_slice %arg8[%c3_i32_445, %c2_i32_446] : memref<8x4x!tpu.dma_semaphore, #tpu.memory_space<semaphore_mem>> -> memref<1x1x!tpu.dma_semaphore, #tpu.memory_space<semaphore_mem>>
    %381 = tpu.memref_squeeze %380 : memref<1x1x!tpu.dma_semaphore, #tpu.memory_space<semaphore_mem>> -> memref<!tpu.dma_semaphore, #tpu.memory_space<semaphore_mem>>
    tpu.wait_dma2 semaphore(%381 : memref<!tpu.dma_semaphore, #tpu.memory_space<semaphore_mem>>) src(%377 : memref<1x128xf32, #tpu.memory_space<any>>) dst(%379 : memref<1x128xf32, #tpu.memory_space<vmem>>)
    %c4_i32_451 = arith.constant 4 : i32
    %c4_i32_452 = arith.constant 4 : i32
    %c2_i32_453 = arith.constant 2 : i32
    %c0_i32_454 = arith.constant 0 : i32
    %c0_i32_455 = arith.constant 0 : i32
    %382 = tpu.memref_slice %arg3[%c0_i32_454, %c0_i32_455] : memref<1000x128xf32, #tpu.memory_space<any>> -> memref<1x128xf32, #tpu.memory_space<any>>
    %c2_i32_456 = arith.constant 2 : i32
    %c0_i32_457 = arith.constant 0 : i32
    %383 = tpu.memref_slice %arg7[%c4_i32_451, %c2_i32_456, %c0_i32_457] : memref<8x4x128xf32, #tpu.memory_space<vmem>> -> memref<1x1x128xf32, #tpu.memory_space<vmem>>
    %384 = tpu.memref_squeeze %383 : memref<1x1x128xf32, #tpu.memory_space<vmem>> -> memref<1x128xf32, #tpu.memory_space<vmem>>
    %385 = tpu.memref_slice %arg8[%c4_i32_452, %c2_i32_453] : memref<8x4x!tpu.dma_semaphore, #tpu.memory_space<semaphore_mem>> -> memref<1x1x!tpu.dma_semaphore, #tpu.memory_space<semaphore_mem>>
    %386 = tpu.memref_squeeze %385 : memref<1x1x!tpu.dma_semaphore, #tpu.memory_space<semaphore_mem>> -> memref<!tpu.dma_semaphore, #tpu.memory_space<semaphore_mem>>
    tpu.wait_dma2 semaphore(%386 : memref<!tpu.dma_semaphore, #tpu.memory_space<semaphore_mem>>) src(%382 : memref<1x128xf32, #tpu.memory_space<any>>) dst(%384 : memref<1x128xf32, #tpu.memory_space<vmem>>)
    %c5_i32_458 = arith.constant 5 : i32
    %c5_i32_459 = arith.constant 5 : i32
    %c2_i32_460 = arith.constant 2 : i32
    %c0_i32_461 = arith.constant 0 : i32
    %c0_i32_462 = arith.constant 0 : i32
    %387 = tpu.memref_slice %arg3[%c0_i32_461, %c0_i32_462] : memref<1000x128xf32, #tpu.memory_space<any>> -> memref<1x128xf32, #tpu.memory_space<any>>
    %c2_i32_463 = arith.constant 2 : i32
    %c0_i32_464 = arith.constant 0 : i32
    %388 = tpu.memref_slice %arg7[%c5_i32_458, %c2_i32_463, %c0_i32_464] : memref<8x4x128xf32, #tpu.memory_space<vmem>> -> memref<1x1x128xf32, #tpu.memory_space<vmem>>
    %389 = tpu.memref_squeeze %388 : memref<1x1x128xf32, #tpu.memory_space<vmem>> -> memref<1x128xf32, #tpu.memory_space<vmem>>
    %390 = tpu.memref_slice %arg8[%c5_i32_459, %c2_i32_460] : memref<8x4x!tpu.dma_semaphore, #tpu.memory_space<semaphore_mem>> -> memref<1x1x!tpu.dma_semaphore, #tpu.memory_space<semaphore_mem>>
    %391 = tpu.memref_squeeze %390 : memref<1x1x!tpu.dma_semaphore, #tpu.memory_space<semaphore_mem>> -> memref<!tpu.dma_semaphore, #tpu.memory_space<semaphore_mem>>
    tpu.wait_dma2 semaphore(%391 : memref<!tpu.dma_semaphore, #tpu.memory_space<semaphore_mem>>) src(%387 : memref<1x128xf32, #tpu.memory_space<any>>) dst(%389 : memref<1x128xf32, #tpu.memory_space<vmem>>)
    %c6_i32_465 = arith.constant 6 : i32
    %c6_i32_466 = arith.constant 6 : i32
    %c2_i32_467 = arith.constant 2 : i32
    %c0_i32_468 = arith.constant 0 : i32
    %c0_i32_469 = arith.constant 0 : i32
    %392 = tpu.memref_slice %arg3[%c0_i32_468, %c0_i32_469] : memref<1000x128xf32, #tpu.memory_space<any>> -> memref<1x128xf32, #tpu.memory_space<any>>
    %c2_i32_470 = arith.constant 2 : i32
    %c0_i32_471 = arith.constant 0 : i32
    %393 = tpu.memref_slice %arg7[%c6_i32_465, %c2_i32_470, %c0_i32_471] : memref<8x4x128xf32, #tpu.memory_space<vmem>> -> memref<1x1x128xf32, #tpu.memory_space<vmem>>
    %394 = tpu.memref_squeeze %393 : memref<1x1x128xf32, #tpu.memory_space<vmem>> -> memref<1x128xf32, #tpu.memory_space<vmem>>
    %395 = tpu.memref_slice %arg8[%c6_i32_466, %c2_i32_467] : memref<8x4x!tpu.dma_semaphore, #tpu.memory_space<semaphore_mem>> -> memref<1x1x!tpu.dma_semaphore, #tpu.memory_space<semaphore_mem>>
    %396 = tpu.memref_squeeze %395 : memref<1x1x!tpu.dma_semaphore, #tpu.memory_space<semaphore_mem>> -> memref<!tpu.dma_semaphore, #tpu.memory_space<semaphore_mem>>
    tpu.wait_dma2 semaphore(%396 : memref<!tpu.dma_semaphore, #tpu.memory_space<semaphore_mem>>) src(%392 : memref<1x128xf32, #tpu.memory_space<any>>) dst(%394 : memref<1x128xf32, #tpu.memory_space<vmem>>)
    %c7_i32_472 = arith.constant 7 : i32
    %c7_i32_473 = arith.constant 7 : i32
    %c2_i32_474 = arith.constant 2 : i32
    %c0_i32_475 = arith.constant 0 : i32
    %c0_i32_476 = arith.constant 0 : i32
    %397 = tpu.memref_slice %arg3[%c0_i32_475, %c0_i32_476] : memref<1000x128xf32, #tpu.memory_space<any>> -> memref<1x128xf32, #tpu.memory_space<any>>
    %c2_i32_477 = arith.constant 2 : i32
    %c0_i32_478 = arith.constant 0 : i32
    %398 = tpu.memref_slice %arg7[%c7_i32_472, %c2_i32_477, %c0_i32_478] : memref<8x4x128xf32, #tpu.memory_space<vmem>> -> memref<1x1x128xf32, #tpu.memory_space<vmem>>
    %399 = tpu.memref_squeeze %398 : memref<1x1x128xf32, #tpu.memory_space<vmem>> -> memref<1x128xf32, #tpu.memory_space<vmem>>
    %400 = tpu.memref_slice %arg8[%c7_i32_473, %c2_i32_474] : memref<8x4x!tpu.dma_semaphore, #tpu.memory_space<semaphore_mem>> -> memref<1x1x!tpu.dma_semaphore, #tpu.memory_space<semaphore_mem>>
    %401 = tpu.memref_squeeze %400 : memref<1x1x!tpu.dma_semaphore, #tpu.memory_space<semaphore_mem>> -> memref<!tpu.dma_semaphore, #tpu.memory_space<semaphore_mem>>
    tpu.wait_dma2 semaphore(%401 : memref<!tpu.dma_semaphore, #tpu.memory_space<semaphore_mem>>) src(%397 : memref<1x128xf32, #tpu.memory_space<any>>) dst(%399 : memref<1x128xf32, #tpu.memory_space<vmem>>)
    %c0_i32_479 = arith.constant 0 : i32
    %c0_i32_480 = arith.constant 0 : i32
    %c3_i32_481 = arith.constant 3 : i32
    %c0_i32_482 = arith.constant 0 : i32
    %c0_i32_483 = arith.constant 0 : i32
    %402 = tpu.memref_slice %arg3[%c0_i32_482, %c0_i32_483] : memref<1000x128xf32, #tpu.memory_space<any>> -> memref<1x128xf32, #tpu.memory_space<any>>
    %c3_i32_484 = arith.constant 3 : i32
    %c0_i32_485 = arith.constant 0 : i32
    %403 = tpu.memref_slice %arg7[%c0_i32_479, %c3_i32_484, %c0_i32_485] : memref<8x4x128xf32, #tpu.memory_space<vmem>> -> memref<1x1x128xf32, #tpu.memory_space<vmem>>
    %404 = tpu.memref_squeeze %403 : memref<1x1x128xf32, #tpu.memory_space<vmem>> -> memref<1x128xf32, #tpu.memory_space<vmem>>
    %405 = tpu.memref_slice %arg8[%c0_i32_480, %c3_i32_481] : memref<8x4x!tpu.dma_semaphore, #tpu.memory_space<semaphore_mem>> -> memref<1x1x!tpu.dma_semaphore, #tpu.memory_space<semaphore_mem>>
    %406 = tpu.memref_squeeze %405 : memref<1x1x!tpu.dma_semaphore, #tpu.memory_space<semaphore_mem>> -> memref<!tpu.dma_semaphore, #tpu.memory_space<semaphore_mem>>
    tpu.wait_dma2 semaphore(%406 : memref<!tpu.dma_semaphore, #tpu.memory_space<semaphore_mem>>) src(%402 : memref<1x128xf32, #tpu.memory_space<any>>) dst(%404 : memref<1x128xf32, #tpu.memory_space<vmem>>)
    %c1_i32_486 = arith.constant 1 : i32
    %c1_i32_487 = arith.constant 1 : i32
    %c3_i32_488 = arith.constant 3 : i32
    %c0_i32_489 = arith.constant 0 : i32
    %c0_i32_490 = arith.constant 0 : i32
    %407 = tpu.memref_slice %arg3[%c0_i32_489, %c0_i32_490] : memref<1000x128xf32, #tpu.memory_space<any>> -> memref<1x128xf32, #tpu.memory_space<any>>
    %c3_i32_491 = arith.constant 3 : i32
    %c0_i32_492 = arith.constant 0 : i32
    %408 = tpu.memref_slice %arg7[%c1_i32_486, %c3_i32_491, %c0_i32_492] : memref<8x4x128xf32, #tpu.memory_space<vmem>> -> memref<1x1x128xf32, #tpu.memory_space<vmem>>
    %409 = tpu.memref_squeeze %408 : memref<1x1x128xf32, #tpu.memory_space<vmem>> -> memref<1x128xf32, #tpu.memory_space<vmem>>
    %410 = tpu.memref_slice %arg8[%c1_i32_487, %c3_i32_488] : memref<8x4x!tpu.dma_semaphore, #tpu.memory_space<semaphore_mem>> -> memref<1x1x!tpu.dma_semaphore, #tpu.memory_space<semaphore_mem>>
    %411 = tpu.memref_squeeze %410 : memref<1x1x!tpu.dma_semaphore, #tpu.memory_space<semaphore_mem>> -> memref<!tpu.dma_semaphore, #tpu.memory_space<semaphore_mem>>
    tpu.wait_dma2 semaphore(%411 : memref<!tpu.dma_semaphore, #tpu.memory_space<semaphore_mem>>) src(%407 : memref<1x128xf32, #tpu.memory_space<any>>) dst(%409 : memref<1x128xf32, #tpu.memory_space<vmem>>)
    %c2_i32_493 = arith.constant 2 : i32
    %c2_i32_494 = arith.constant 2 : i32
    %c3_i32_495 = arith.constant 3 : i32
    %c0_i32_496 = arith.constant 0 : i32
    %c0_i32_497 = arith.constant 0 : i32
    %412 = tpu.memref_slice %arg3[%c0_i32_496, %c0_i32_497] : memref<1000x128xf32, #tpu.memory_space<any>> -> memref<1x128xf32, #tpu.memory_space<any>>
    %c3_i32_498 = arith.constant 3 : i32
    %c0_i32_499 = arith.constant 0 : i32
    %413 = tpu.memref_slice %arg7[%c2_i32_493, %c3_i32_498, %c0_i32_499] : memref<8x4x128xf32, #tpu.memory_space<vmem>> -> memref<1x1x128xf32, #tpu.memory_space<vmem>>
    %414 = tpu.memref_squeeze %413 : memref<1x1x128xf32, #tpu.memory_space<vmem>> -> memref<1x128xf32, #tpu.memory_space<vmem>>
    %415 = tpu.memref_slice %arg8[%c2_i32_494, %c3_i32_495] : memref<8x4x!tpu.dma_semaphore, #tpu.memory_space<semaphore_mem>> -> memref<1x1x!tpu.dma_semaphore, #tpu.memory_space<semaphore_mem>>
    %416 = tpu.memref_squeeze %415 : memref<1x1x!tpu.dma_semaphore, #tpu.memory_space<semaphore_mem>> -> memref<!tpu.dma_semaphore, #tpu.memory_space<semaphore_mem>>
    tpu.wait_dma2 semaphore(%416 : memref<!tpu.dma_semaphore, #tpu.memory_space<semaphore_mem>>) src(%412 : memref<1x128xf32, #tpu.memory_space<any>>) dst(%414 : memref<1x128xf32, #tpu.memory_space<vmem>>)
    %c3_i32_500 = arith.constant 3 : i32
    %c3_i32_501 = arith.constant 3 : i32
    %c3_i32_502 = arith.constant 3 : i32
    %c0_i32_503 = arith.constant 0 : i32
    %c0_i32_504 = arith.constant 0 : i32
    %417 = tpu.memref_slice %arg3[%c0_i32_503, %c0_i32_504] : memref<1000x128xf32, #tpu.memory_space<any>> -> memref<1x128xf32, #tpu.memory_space<any>>
    %c3_i32_505 = arith.constant 3 : i32
    %c0_i32_506 = arith.constant 0 : i32
    %418 = tpu.memref_slice %arg7[%c3_i32_500, %c3_i32_505, %c0_i32_506] : memref<8x4x128xf32, #tpu.memory_space<vmem>> -> memref<1x1x128xf32, #tpu.memory_space<vmem>>
    %419 = tpu.memref_squeeze %418 : memref<1x1x128xf32, #tpu.memory_space<vmem>> -> memref<1x128xf32, #tpu.memory_space<vmem>>
    %420 = tpu.memref_slice %arg8[%c3_i32_501, %c3_i32_502] : memref<8x4x!tpu.dma_semaphore, #tpu.memory_space<semaphore_mem>> -> memref<1x1x!tpu.dma_semaphore, #tpu.memory_space<semaphore_mem>>
    %421 = tpu.memref_squeeze %420 : memref<1x1x!tpu.dma_semaphore, #tpu.memory_space<semaphore_mem>> -> memref<!tpu.dma_semaphore, #tpu.memory_space<semaphore_mem>>
    tpu.wait_dma2 semaphore(%421 : memref<!tpu.dma_semaphore, #tpu.memory_space<semaphore_mem>>) src(%417 : memref<1x128xf32, #tpu.memory_space<any>>) dst(%419 : memref<1x128xf32, #tpu.memory_space<vmem>>)
    %c4_i32_507 = arith.constant 4 : i32
    %c4_i32_508 = arith.constant 4 : i32
    %c3_i32_509 = arith.constant 3 : i32
    %c0_i32_510 = arith.constant 0 : i32
    %c0_i32_511 = arith.constant 0 : i32
    %422 = tpu.memref_slice %arg3[%c0_i32_510, %c0_i32_511] : memref<1000x128xf32, #tpu.memory_space<any>> -> memref<1x128xf32, #tpu.memory_space<any>>
    %c3_i32_512 = arith.constant 3 : i32
    %c0_i32_513 = arith.constant 0 : i32
    %423 = tpu.memref_slice %arg7[%c4_i32_507, %c3_i32_512, %c0_i32_513] : memref<8x4x128xf32, #tpu.memory_space<vmem>> -> memref<1x1x128xf32, #tpu.memory_space<vmem>>
    %424 = tpu.memref_squeeze %423 : memref<1x1x128xf32, #tpu.memory_space<vmem>> -> memref<1x128xf32, #tpu.memory_space<vmem>>
    %425 = tpu.memref_slice %arg8[%c4_i32_508, %c3_i32_509] : memref<8x4x!tpu.dma_semaphore, #tpu.memory_space<semaphore_mem>> -> memref<1x1x!tpu.dma_semaphore, #tpu.memory_space<semaphore_mem>>
    %426 = tpu.memref_squeeze %425 : memref<1x1x!tpu.dma_semaphore, #tpu.memory_space<semaphore_mem>> -> memref<!tpu.dma_semaphore, #tpu.memory_space<semaphore_mem>>
    tpu.wait_dma2 semaphore(%426 : memref<!tpu.dma_semaphore, #tpu.memory_space<semaphore_mem>>) src(%422 : memref<1x128xf32, #tpu.memory_space<any>>) dst(%424 : memref<1x128xf32, #tpu.memory_space<vmem>>)
    %c5_i32_514 = arith.constant 5 : i32
    %c5_i32_515 = arith.constant 5 : i32
    %c3_i32_516 = arith.constant 3 : i32
    %c0_i32_517 = arith.constant 0 : i32
    %c0_i32_518 = arith.constant 0 : i32
    %427 = tpu.memref_slice %arg3[%c0_i32_517, %c0_i32_518] : memref<1000x128xf32, #tpu.memory_space<any>> -> memref<1x128xf32, #tpu.memory_space<any>>
    %c3_i32_519 = arith.constant 3 : i32
    %c0_i32_520 = arith.constant 0 : i32
    %428 = tpu.memref_slice %arg7[%c5_i32_514, %c3_i32_519, %c0_i32_520] : memref<8x4x128xf32, #tpu.memory_space<vmem>> -> memref<1x1x128xf32, #tpu.memory_space<vmem>>
    %429 = tpu.memref_squeeze %428 : memref<1x1x128xf32, #tpu.memory_space<vmem>> -> memref<1x128xf32, #tpu.memory_space<vmem>>
    %430 = tpu.memref_slice %arg8[%c5_i32_515, %c3_i32_516] : memref<8x4x!tpu.dma_semaphore, #tpu.memory_space<semaphore_mem>> -> memref<1x1x!tpu.dma_semaphore, #tpu.memory_space<semaphore_mem>>
    %431 = tpu.memref_squeeze %430 : memref<1x1x!tpu.dma_semaphore, #tpu.memory_space<semaphore_mem>> -> memref<!tpu.dma_semaphore, #tpu.memory_space<semaphore_mem>>
    tpu.wait_dma2 semaphore(%431 : memref<!tpu.dma_semaphore, #tpu.memory_space<semaphore_mem>>) src(%427 : memref<1x128xf32, #tpu.memory_space<any>>) dst(%429 : memref<1x128xf32, #tpu.memory_space<vmem>>)
    %c6_i32_521 = arith.constant 6 : i32
    %c6_i32_522 = arith.constant 6 : i32
    %c3_i32_523 = arith.constant 3 : i32
    %c0_i32_524 = arith.constant 0 : i32
    %c0_i32_525 = arith.constant 0 : i32
    %432 = tpu.memref_slice %arg3[%c0_i32_524, %c0_i32_525] : memref<1000x128xf32, #tpu.memory_space<any>> -> memref<1x128xf32, #tpu.memory_space<any>>
    %c3_i32_526 = arith.constant 3 : i32
    %c0_i32_527 = arith.constant 0 : i32
    %433 = tpu.memref_slice %arg7[%c6_i32_521, %c3_i32_526, %c0_i32_527] : memref<8x4x128xf32, #tpu.memory_space<vmem>> -> memref<1x1x128xf32, #tpu.memory_space<vmem>>
    %434 = tpu.memref_squeeze %433 : memref<1x1x128xf32, #tpu.memory_space<vmem>> -> memref<1x128xf32, #tpu.memory_space<vmem>>
    %435 = tpu.memref_slice %arg8[%c6_i32_522, %c3_i32_523] : memref<8x4x!tpu.dma_semaphore, #tpu.memory_space<semaphore_mem>> -> memref<1x1x!tpu.dma_semaphore, #tpu.memory_space<semaphore_mem>>
    %436 = tpu.memref_squeeze %435 : memref<1x1x!tpu.dma_semaphore, #tpu.memory_space<semaphore_mem>> -> memref<!tpu.dma_semaphore, #tpu.memory_space<semaphore_mem>>
    tpu.wait_dma2 semaphore(%436 : memref<!tpu.dma_semaphore, #tpu.memory_space<semaphore_mem>>) src(%432 : memref<1x128xf32, #tpu.memory_space<any>>) dst(%434 : memref<1x128xf32, #tpu.memory_space<vmem>>)
    %c7_i32_528 = arith.constant 7 : i32
    %c7_i32_529 = arith.constant 7 : i32
    %c3_i32_530 = arith.constant 3 : i32
    %c0_i32_531 = arith.constant 0 : i32
    %c0_i32_532 = arith.constant 0 : i32
    %437 = tpu.memref_slice %arg3[%c0_i32_531, %c0_i32_532] : memref<1000x128xf32, #tpu.memory_space<any>> -> memref<1x128xf32, #tpu.memory_space<any>>
    %c3_i32_533 = arith.constant 3 : i32
    %c0_i32_534 = arith.constant 0 : i32
    %438 = tpu.memref_slice %arg7[%c7_i32_528, %c3_i32_533, %c0_i32_534] : memref<8x4x128xf32, #tpu.memory_space<vmem>> -> memref<1x1x128xf32, #tpu.memory_space<vmem>>
    %439 = tpu.memref_squeeze %438 : memref<1x1x128xf32, #tpu.memory_space<vmem>> -> memref<1x128xf32, #tpu.memory_space<vmem>>
    %440 = tpu.memref_slice %arg8[%c7_i32_529, %c3_i32_530] : memref<8x4x!tpu.dma_semaphore, #tpu.memory_space<semaphore_mem>> -> memref<1x1x!tpu.dma_semaphore, #tpu.memory_space<semaphore_mem>>
    %441 = tpu.memref_squeeze %440 : memref<1x1x!tpu.dma_semaphore, #tpu.memory_space<semaphore_mem>> -> memref<!tpu.dma_semaphore, #tpu.memory_space<semaphore_mem>>
    tpu.wait_dma2 semaphore(%441 : memref<!tpu.dma_semaphore, #tpu.memory_space<semaphore_mem>>) src(%437 : memref<1x128xf32, #tpu.memory_space<any>>) dst(%439 : memref<1x128xf32, #tpu.memory_space<vmem>>)
    %cst_535 = arith.constant 0.000000e+00 : f32
    %442 = vector.broadcast %cst_535 : f32 to vector<4x32xf32>
    %cst_536 = arith.constant 0.000000e+00 : f32
    %443 = vector.broadcast %cst_536 : f32 to vector<4x32xf32>
    %c0_i32_537 = arith.constant 0 : i32
    %444 = arith.index_cast %c0_i32_537 : i32 to index
    %c0_538 = arith.constant 0 : index
    %c0_539 = arith.constant 0 : index
    %445 = vector.load %arg7[%444, %c0_538, %c0_539] : memref<8x4x128xf32, #tpu.memory_space<vmem>>, vector<1x4x128xf32>
    %446 = vector.shape_cast %445 : vector<1x4x128xf32> to vector<4x128xf32>
    %cst_540 = arith.constant dense<0.000000e+00> : vector<4x128xf32>
    %447 = tpu.matmul %442, %256, %cst_540 {dimension_numbers = #tpu.dot_dimension_numbers<[1], [0], [0], [1], [0, 0, 1, 1], [], []>} : vector<4x32xf32>, vector<32x128xf32>, vector<4x128xf32> -> vector<4x128xf32>
    %448 = arith.addf %446, %447 : vector<4x128xf32>
    %cst_541 = arith.constant 5.000000e-01 : f32
    %449 = vector.broadcast %cst_541 : f32 to vector<4x128xf32>
    %450 = arith.mulf %449, %448 : vector<4x128xf32>
    %451 = arith.select %262, %448, %450 : vector<4x128xi1>, vector<4x128xf32>
    %452 = math.tanh %451 : vector<4x128xf32>
    %cst_542 = arith.constant 5.000000e-01 : f32
    %453 = vector.broadcast %cst_542 : f32 to vector<4x128xf32>
    %454 = arith.mulf %453, %452 : vector<4x128xf32>
    %cst_543 = arith.constant 5.000000e-01 : f32
    %455 = vector.broadcast %cst_543 : f32 to vector<4x128xf32>
    %456 = arith.addf %454, %455 : vector<4x128xf32>
    %457 = arith.select %262, %452, %456 : vector<4x128xi1>, vector<4x128xf32>
    %458 = vector.extract_strided_slice %457 {offsets = [0, 0], sizes = [4, 32], strides = [1, 1]} : vector<4x128xf32> to vector<4x32xf32>
    %459 = vector.extract_strided_slice %457 {offsets = [0, 32], sizes = [4, 32], strides = [1, 1]} : vector<4x128xf32> to vector<4x32xf32>
    %460 = vector.extract_strided_slice %457 {offsets = [0, 64], sizes = [4, 32], strides = [1, 1]} : vector<4x128xf32> to vector<4x32xf32>
    %461 = vector.extract_strided_slice %457 {offsets = [0, 96], sizes = [4, 32], strides = [1, 1]} : vector<4x128xf32> to vector<4x32xf32>
    %462 = arith.mulf %459, %443 : vector<4x32xf32>
    %463 = arith.mulf %458, %460 : vector<4x32xf32>
    %464 = arith.addf %462, %463 : vector<4x32xf32>
    %465 = math.tanh %464 : vector<4x32xf32>
    %466 = arith.mulf %461, %465 : vector<4x32xf32>
    %c1_i32_544 = arith.constant 1 : i32
    %467 = arith.index_cast %c1_i32_544 : i32 to index
    %c0_545 = arith.constant 0 : index
    %c0_546 = arith.constant 0 : index
    %468 = vector.load %arg7[%467, %c0_545, %c0_546] : memref<8x4x128xf32, #tpu.memory_space<vmem>>, vector<1x4x128xf32>
    %469 = vector.shape_cast %468 : vector<1x4x128xf32> to vector<4x128xf32>
    %cst_547 = arith.constant dense<0.000000e+00> : vector<4x128xf32>
    %470 = tpu.matmul %466, %256, %cst_547 {dimension_numbers = #tpu.dot_dimension_numbers<[1], [0], [0], [1], [0, 0, 1, 1], [], []>} : vector<4x32xf32>, vector<32x128xf32>, vector<4x128xf32> -> vector<4x128xf32>
    %471 = arith.addf %469, %470 : vector<4x128xf32>
    %cst_548 = arith.constant 5.000000e-01 : f32
    %472 = vector.broadcast %cst_548 : f32 to vector<4x128xf32>
    %473 = arith.mulf %472, %471 : vector<4x128xf32>
    %474 = arith.select %262, %471, %473 : vector<4x128xi1>, vector<4x128xf32>
    %475 = math.tanh %474 : vector<4x128xf32>
    %cst_549 = arith.constant 5.000000e-01 : f32
    %476 = vector.broadcast %cst_549 : f32 to vector<4x128xf32>
    %477 = arith.mulf %476, %475 : vector<4x128xf32>
    %cst_550 = arith.constant 5.000000e-01 : f32
    %478 = vector.broadcast %cst_550 : f32 to vector<4x128xf32>
    %479 = arith.addf %477, %478 : vector<4x128xf32>
    %480 = arith.select %262, %475, %479 : vector<4x128xi1>, vector<4x128xf32>
    %481 = vector.extract_strided_slice %480 {offsets = [0, 0], sizes = [4, 32], strides = [1, 1]} : vector<4x128xf32> to vector<4x32xf32>
    %482 = vector.extract_strided_slice %480 {offsets = [0, 32], sizes = [4, 32], strides = [1, 1]} : vector<4x128xf32> to vector<4x32xf32>
    %483 = vector.extract_strided_slice %480 {offsets = [0, 64], sizes = [4, 32], strides = [1, 1]} : vector<4x128xf32> to vector<4x32xf32>
    %484 = vector.extract_strided_slice %480 {offsets = [0, 96], sizes = [4, 32], strides = [1, 1]} : vector<4x128xf32> to vector<4x32xf32>
    %485 = arith.mulf %482, %464 : vector<4x32xf32>
    %486 = arith.mulf %481, %483 : vector<4x32xf32>
    %487 = arith.addf %485, %486 : vector<4x32xf32>
    %488 = math.tanh %487 : vector<4x32xf32>
    %489 = arith.mulf %484, %488 : vector<4x32xf32>
    %c2_i32_551 = arith.constant 2 : i32
    %490 = arith.index_cast %c2_i32_551 : i32 to index
    %c0_552 = arith.constant 0 : index
    %c0_553 = arith.constant 0 : index
    %491 = vector.load %arg7[%490, %c0_552, %c0_553] : memref<8x4x128xf32, #tpu.memory_space<vmem>>, vector<1x4x128xf32>
    %492 = vector.shape_cast %491 : vector<1x4x128xf32> to vector<4x128xf32>
    %cst_554 = arith.constant dense<0.000000e+00> : vector<4x128xf32>
    %493 = tpu.matmul %489, %256, %cst_554 {dimension_numbers = #tpu.dot_dimension_numbers<[1], [0], [0], [1], [0, 0, 1, 1], [], []>} : vector<4x32xf32>, vector<32x128xf32>, vector<4x128xf32> -> vector<4x128xf32>
    %494 = arith.addf %492, %493 : vector<4x128xf32>
    %cst_555 = arith.constant 5.000000e-01 : f32
    %495 = vector.broadcast %cst_555 : f32 to vector<4x128xf32>
    %496 = arith.mulf %495, %494 : vector<4x128xf32>
    %497 = arith.select %262, %494, %496 : vector<4x128xi1>, vector<4x128xf32>
    %498 = math.tanh %497 : vector<4x128xf32>
    %cst_556 = arith.constant 5.000000e-01 : f32
    %499 = vector.broadcast %cst_556 : f32 to vector<4x128xf32>
    %500 = arith.mulf %499, %498 : vector<4x128xf32>
    %cst_557 = arith.constant 5.000000e-01 : f32
    %501 = vector.broadcast %cst_557 : f32 to vector<4x128xf32>
    %502 = arith.addf %500, %501 : vector<4x128xf32>
    %503 = arith.select %262, %498, %502 : vector<4x128xi1>, vector<4x128xf32>
    %504 = vector.extract_strided_slice %503 {offsets = [0, 0], sizes = [4, 32], strides = [1, 1]} : vector<4x128xf32> to vector<4x32xf32>
    %505 = vector.extract_strided_slice %503 {offsets = [0, 32], sizes = [4, 32], strides = [1, 1]} : vector<4x128xf32> to vector<4x32xf32>
    %506 = vector.extract_strided_slice %503 {offsets = [0, 64], sizes = [4, 32], strides = [1, 1]} : vector<4x128xf32> to vector<4x32xf32>
    %507 = vector.extract_strided_slice %503 {offsets = [0, 96], sizes = [4, 32], strides = [1, 1]} : vector<4x128xf32> to vector<4x32xf32>
    %508 = arith.mulf %505, %487 : vector<4x32xf32>
    %509 = arith.mulf %504, %506 : vector<4x32xf32>
    %510 = arith.addf %508, %509 : vector<4x32xf32>
    %511 = math.tanh %510 : vector<4x32xf32>
    %512 = arith.mulf %507, %511 : vector<4x32xf32>
    %c3_i32_558 = arith.constant 3 : i32
    %513 = arith.index_cast %c3_i32_558 : i32 to index
    %c0_559 = arith.constant 0 : index
    %c0_560 = arith.constant 0 : index
    %514 = vector.load %arg7[%513, %c0_559, %c0_560] : memref<8x4x128xf32, #tpu.memory_space<vmem>>, vector<1x4x128xf32>
    %515 = vector.shape_cast %514 : vector<1x4x128xf32> to vector<4x128xf32>
    %cst_561 = arith.constant dense<0.000000e+00> : vector<4x128xf32>
    %516 = tpu.matmul %512, %256, %cst_561 {dimension_numbers = #tpu.dot_dimension_numbers<[1], [0], [0], [1], [0, 0, 1, 1], [], []>} : vector<4x32xf32>, vector<32x128xf32>, vector<4x128xf32> -> vector<4x128xf32>
    %517 = arith.addf %515, %516 : vector<4x128xf32>
    %cst_562 = arith.constant 5.000000e-01 : f32
    %518 = vector.broadcast %cst_562 : f32 to vector<4x128xf32>
    %519 = arith.mulf %518, %517 : vector<4x128xf32>
    %520 = arith.select %262, %517, %519 : vector<4x128xi1>, vector<4x128xf32>
    %521 = math.tanh %520 : vector<4x128xf32>
    %cst_563 = arith.constant 5.000000e-01 : f32
    %522 = vector.broadcast %cst_563 : f32 to vector<4x128xf32>
    %523 = arith.mulf %522, %521 : vector<4x128xf32>
    %cst_564 = arith.constant 5.000000e-01 : f32
    %524 = vector.broadcast %cst_564 : f32 to vector<4x128xf32>
    %525 = arith.addf %523, %524 : vector<4x128xf32>
    %526 = arith.select %262, %521, %525 : vector<4x128xi1>, vector<4x128xf32>
    %527 = vector.extract_strided_slice %526 {offsets = [0, 0], sizes = [4, 32], strides = [1, 1]} : vector<4x128xf32> to vector<4x32xf32>
    %528 = vector.extract_strided_slice %526 {offsets = [0, 32], sizes = [4, 32], strides = [1, 1]} : vector<4x128xf32> to vector<4x32xf32>
    %529 = vector.extract_strided_slice %526 {offsets = [0, 64], sizes = [4, 32], strides = [1, 1]} : vector<4x128xf32> to vector<4x32xf32>
    %530 = vector.extract_strided_slice %526 {offsets = [0, 96], sizes = [4, 32], strides = [1, 1]} : vector<4x128xf32> to vector<4x32xf32>
    %531 = arith.mulf %528, %510 : vector<4x32xf32>
    %532 = arith.mulf %527, %529 : vector<4x32xf32>
    %533 = arith.addf %531, %532 : vector<4x32xf32>
    %534 = math.tanh %533 : vector<4x32xf32>
    %535 = arith.mulf %530, %534 : vector<4x32xf32>
    %c4_i32_565 = arith.constant 4 : i32
    %536 = arith.index_cast %c4_i32_565 : i32 to index
    %c0_566 = arith.constant 0 : index
    %c0_567 = arith.constant 0 : index
    %537 = vector.load %arg7[%536, %c0_566, %c0_567] : memref<8x4x128xf32, #tpu.memory_space<vmem>>, vector<1x4x128xf32>
    %538 = vector.shape_cast %537 : vector<1x4x128xf32> to vector<4x128xf32>
    %cst_568 = arith.constant dense<0.000000e+00> : vector<4x128xf32>
    %539 = tpu.matmul %535, %256, %cst_568 {dimension_numbers = #tpu.dot_dimension_numbers<[1], [0], [0], [1], [0, 0, 1, 1], [], []>} : vector<4x32xf32>, vector<32x128xf32>, vector<4x128xf32> -> vector<4x128xf32>
    %540 = arith.addf %538, %539 : vector<4x128xf32>
    %cst_569 = arith.constant 5.000000e-01 : f32
    %541 = vector.broadcast %cst_569 : f32 to vector<4x128xf32>
    %542 = arith.mulf %541, %540 : vector<4x128xf32>
    %543 = arith.select %262, %540, %542 : vector<4x128xi1>, vector<4x128xf32>
    %544 = math.tanh %543 : vector<4x128xf32>
    %cst_570 = arith.constant 5.000000e-01 : f32
    %545 = vector.broadcast %cst_570 : f32 to vector<4x128xf32>
    %546 = arith.mulf %545, %544 : vector<4x128xf32>
    %cst_571 = arith.constant 5.000000e-01 : f32
    %547 = vector.broadcast %cst_571 : f32 to vector<4x128xf32>
    %548 = arith.addf %546, %547 : vector<4x128xf32>
    %549 = arith.select %262, %544, %548 : vector<4x128xi1>, vector<4x128xf32>
    %550 = vector.extract_strided_slice %549 {offsets = [0, 0], sizes = [4, 32], strides = [1, 1]} : vector<4x128xf32> to vector<4x32xf32>
    %551 = vector.extract_strided_slice %549 {offsets = [0, 32], sizes = [4, 32], strides = [1, 1]} : vector<4x128xf32> to vector<4x32xf32>
    %552 = vector.extract_strided_slice %549 {offsets = [0, 64], sizes = [4, 32], strides = [1, 1]} : vector<4x128xf32> to vector<4x32xf32>
    %553 = vector.extract_strided_slice %549 {offsets = [0, 96], sizes = [4, 32], strides = [1, 1]} : vector<4x128xf32> to vector<4x32xf32>
    %554 = arith.mulf %551, %533 : vector<4x32xf32>
    %555 = arith.mulf %550, %552 : vector<4x32xf32>
    %556 = arith.addf %554, %555 : vector<4x32xf32>
    %557 = math.tanh %556 : vector<4x32xf32>
    %558 = arith.mulf %553, %557 : vector<4x32xf32>
    %c5_i32_572 = arith.constant 5 : i32
    %559 = arith.index_cast %c5_i32_572 : i32 to index
    %c0_573 = arith.constant 0 : index
    %c0_574 = arith.constant 0 : index
    %560 = vector.load %arg7[%559, %c0_573, %c0_574] : memref<8x4x128xf32, #tpu.memory_space<vmem>>, vector<1x4x128xf32>
    %561 = vector.shape_cast %560 : vector<1x4x128xf32> to vector<4x128xf32>
    %cst_575 = arith.constant dense<0.000000e+00> : vector<4x128xf32>
    %562 = tpu.matmul %558, %256, %cst_575 {dimension_numbers = #tpu.dot_dimension_numbers<[1], [0], [0], [1], [0, 0, 1, 1], [], []>} : vector<4x32xf32>, vector<32x128xf32>, vector<4x128xf32> -> vector<4x128xf32>
    %563 = arith.addf %561, %562 : vector<4x128xf32>
    %cst_576 = arith.constant 5.000000e-01 : f32
    %564 = vector.broadcast %cst_576 : f32 to vector<4x128xf32>
    %565 = arith.mulf %564, %563 : vector<4x128xf32>
    %566 = arith.select %262, %563, %565 : vector<4x128xi1>, vector<4x128xf32>
    %567 = math.tanh %566 : vector<4x128xf32>
    %cst_577 = arith.constant 5.000000e-01 : f32
    %568 = vector.broadcast %cst_577 : f32 to vector<4x128xf32>
    %569 = arith.mulf %568, %567 : vector<4x128xf32>
    %cst_578 = arith.constant 5.000000e-01 : f32
    %570 = vector.broadcast %cst_578 : f32 to vector<4x128xf32>
    %571 = arith.addf %569, %570 : vector<4x128xf32>
    %572 = arith.select %262, %567, %571 : vector<4x128xi1>, vector<4x128xf32>
    %573 = vector.extract_strided_slice %572 {offsets = [0, 0], sizes = [4, 32], strides = [1, 1]} : vector<4x128xf32> to vector<4x32xf32>
    %574 = vector.extract_strided_slice %572 {offsets = [0, 32], sizes = [4, 32], strides = [1, 1]} : vector<4x128xf32> to vector<4x32xf32>
    %575 = vector.extract_strided_slice %572 {offsets = [0, 64], sizes = [4, 32], strides = [1, 1]} : vector<4x128xf32> to vector<4x32xf32>
    %576 = vector.extract_strided_slice %572 {offsets = [0, 96], sizes = [4, 32], strides = [1, 1]} : vector<4x128xf32> to vector<4x32xf32>
    %577 = arith.mulf %574, %556 : vector<4x32xf32>
    %578 = arith.mulf %573, %575 : vector<4x32xf32>
    %579 = arith.addf %577, %578 : vector<4x32xf32>
    %580 = math.tanh %579 : vector<4x32xf32>
    %581 = arith.mulf %576, %580 : vector<4x32xf32>
    %c6_i32_579 = arith.constant 6 : i32
    %582 = arith.index_cast %c6_i32_579 : i32 to index
    %c0_580 = arith.constant 0 : index
    %c0_581 = arith.constant 0 : index
    %583 = vector.load %arg7[%582, %c0_580, %c0_581] : memref<8x4x128xf32, #tpu.memory_space<vmem>>, vector<1x4x128xf32>
    %584 = vector.shape_cast %583 : vector<1x4x128xf32> to vector<4x128xf32>
    %cst_582 = arith.constant dense<0.000000e+00> : vector<4x128xf32>
    %585 = tpu.matmul %581, %256, %cst_582 {dimension_numbers = #tpu.dot_dimension_numbers<[1], [0], [0], [1], [0, 0, 1, 1], [], []>} : vector<4x32xf32>, vector<32x128xf32>, vector<4x128xf32> -> vector<4x128xf32>
    %586 = arith.addf %584, %585 : vector<4x128xf32>
    %cst_583 = arith.constant 5.000000e-01 : f32
    %587 = vector.broadcast %cst_583 : f32 to vector<4x128xf32>
    %588 = arith.mulf %587, %586 : vector<4x128xf32>
    %589 = arith.select %262, %586, %588 : vector<4x128xi1>, vector<4x128xf32>
    %590 = math.tanh %589 : vector<4x128xf32>
    %cst_584 = arith.constant 5.000000e-01 : f32
    %591 = vector.broadcast %cst_584 : f32 to vector<4x128xf32>
    %592 = arith.mulf %591, %590 : vector<4x128xf32>
    %cst_585 = arith.constant 5.000000e-01 : f32
    %593 = vector.broadcast %cst_585 : f32 to vector<4x128xf32>
    %594 = arith.addf %592, %593 : vector<4x128xf32>
    %595 = arith.select %262, %590, %594 : vector<4x128xi1>, vector<4x128xf32>
    %596 = vector.extract_strided_slice %595 {offsets = [0, 0], sizes = [4, 32], strides = [1, 1]} : vector<4x128xf32> to vector<4x32xf32>
    %597 = vector.extract_strided_slice %595 {offsets = [0, 32], sizes = [4, 32], strides = [1, 1]} : vector<4x128xf32> to vector<4x32xf32>
    %598 = vector.extract_strided_slice %595 {offsets = [0, 64], sizes = [4, 32], strides = [1, 1]} : vector<4x128xf32> to vector<4x32xf32>
    %599 = vector.extract_strided_slice %595 {offsets = [0, 96], sizes = [4, 32], strides = [1, 1]} : vector<4x128xf32> to vector<4x32xf32>
    %600 = arith.mulf %597, %579 : vector<4x32xf32>
    %601 = arith.mulf %596, %598 : vector<4x32xf32>
    %602 = arith.addf %600, %601 : vector<4x32xf32>
    %603 = math.tanh %602 : vector<4x32xf32>
    %604 = arith.mulf %599, %603 : vector<4x32xf32>
    %c7_i32_586 = arith.constant 7 : i32
    %605 = arith.index_cast %c7_i32_586 : i32 to index
    %c0_587 = arith.constant 0 : index
    %c0_588 = arith.constant 0 : index
    %606 = vector.load %arg7[%605, %c0_587, %c0_588] : memref<8x4x128xf32, #tpu.memory_space<vmem>>, vector<1x4x128xf32>
    %607 = vector.shape_cast %606 : vector<1x4x128xf32> to vector<4x128xf32>
    %cst_589 = arith.constant dense<0.000000e+00> : vector<4x128xf32>
    %608 = tpu.matmul %604, %256, %cst_589 {dimension_numbers = #tpu.dot_dimension_numbers<[1], [0], [0], [1], [0, 0, 1, 1], [], []>} : vector<4x32xf32>, vector<32x128xf32>, vector<4x128xf32> -> vector<4x128xf32>
    %609 = arith.addf %607, %608 : vector<4x128xf32>
    %cst_590 = arith.constant 5.000000e-01 : f32
    %610 = vector.broadcast %cst_590 : f32 to vector<4x128xf32>
    %611 = arith.mulf %610, %609 : vector<4x128xf32>
    %612 = arith.select %262, %609, %611 : vector<4x128xi1>, vector<4x128xf32>
    %613 = math.tanh %612 : vector<4x128xf32>
    %cst_591 = arith.constant 5.000000e-01 : f32
    %614 = vector.broadcast %cst_591 : f32 to vector<4x128xf32>
    %615 = arith.mulf %614, %613 : vector<4x128xf32>
    %cst_592 = arith.constant 5.000000e-01 : f32
    %616 = vector.broadcast %cst_592 : f32 to vector<4x128xf32>
    %617 = arith.addf %615, %616 : vector<4x128xf32>
    %618 = arith.select %262, %613, %617 : vector<4x128xi1>, vector<4x128xf32>
    %619 = vector.extract_strided_slice %618 {offsets = [0, 0], sizes = [4, 32], strides = [1, 1]} : vector<4x128xf32> to vector<4x32xf32>
    %620 = vector.extract_strided_slice %618 {offsets = [0, 32], sizes = [4, 32], strides = [1, 1]} : vector<4x128xf32> to vector<4x32xf32>
    %621 = vector.extract_strided_slice %618 {offsets = [0, 64], sizes = [4, 32], strides = [1, 1]} : vector<4x128xf32> to vector<4x32xf32>
    %622 = vector.extract_strided_slice %618 {offsets = [0, 96], sizes = [4, 32], strides = [1, 1]} : vector<4x128xf32> to vector<4x32xf32>
    %623 = arith.mulf %620, %602 : vector<4x32xf32>
    %624 = arith.mulf %619, %621 : vector<4x32xf32>
    %625 = arith.addf %623, %624 : vector<4x32xf32>
    %626 = math.tanh %625 : vector<4x32xf32>
    %627 = arith.mulf %622, %626 : vector<4x32xf32>
    %c8_i32 = arith.constant 8 : i32
    %c0_593 = arith.constant 0 : index
    %c0_594 = arith.constant 0 : index
    %628 = vector.load %arg5[%c0_593, %c0_594] : memref<144x32xf32, #tpu.memory_space<vmem>>, vector<8x32xf32>
    %c8 = arith.constant 8 : index
    %c0_595 = arith.constant 0 : index
    %629 = vector.load %arg5[%c8, %c0_595] : memref<144x32xf32, #tpu.memory_space<vmem>>, vector<32x32xf32>
    %c40 = arith.constant 40 : index
    %c0_596 = arith.constant 0 : index
    %630 = vector.load %arg5[%c40, %c0_596] : memref<144x32xf32, #tpu.memory_space<vmem>>, vector<32x32xf32>
    %c72 = arith.constant 72 : index
    %c0_597 = arith.constant 0 : index
    %631 = vector.load %arg5[%c72, %c0_597] : memref<144x32xf32, #tpu.memory_space<vmem>>, vector<32x32xf32>
    %c104 = arith.constant 104 : index
    %c0_598 = arith.constant 0 : index
    %632 = vector.load %arg5[%c104, %c0_598] : memref<144x32xf32, #tpu.memory_space<vmem>>, vector<32x32xf32>
    %c136 = arith.constant 136 : index
    %c0_599 = arith.constant 0 : index
    %633 = vector.load %arg5[%c136, %c0_599] : memref<144x32xf32, #tpu.memory_space<vmem>>, vector<1x32xf32>
    %c137 = arith.constant 137 : index
    %c0_600 = arith.constant 0 : index
    %634 = vector.load %arg5[%c137, %c0_600] : memref<144x32xf32, #tpu.memory_space<vmem>>, vector<1x32xf32>
    %c138 = arith.constant 138 : index
    %c0_601 = arith.constant 0 : index
    %635 = vector.load %arg5[%c138, %c0_601] : memref<144x32xf32, #tpu.memory_space<vmem>>, vector<1x32xf32>
    %636 = vector.extract_strided_slice %627 {offsets = [0, 0], sizes = [2, 32], strides = [1, 1]} : vector<4x32xf32> to vector<2x32xf32>
    %637 = vector.extract_strided_slice %627 {offsets = [2, 0], sizes = [2, 32], strides = [1, 1]} : vector<4x32xf32> to vector<2x32xf32>
    %cst_602 = arith.constant dense<0.000000e+00> : vector<2x32xf32>
    %638 = tpu.matmul %281, %628, %cst_602 {dimension_numbers = #tpu.dot_dimension_numbers<[1], [0], [0], [1], [0, 0, 1, 1], [], []>} : vector<2x8xf32>, vector<8x32xf32>, vector<2x32xf32> -> vector<2x32xf32>
    %cst_603 = arith.constant dense<0.000000e+00> : vector<2x32xf32>
    %639 = tpu.matmul %636, %629, %cst_603 {dimension_numbers = #tpu.dot_dimension_numbers<[1], [0], [0], [1], [0, 0, 1, 1], [], []>} : vector<2x32xf32>, vector<32x32xf32>, vector<2x32xf32> -> vector<2x32xf32>
    %640 = arith.addf %638, %639 : vector<2x32xf32>
    %cst_604 = arith.constant dense<0.000000e+00> : vector<2x32xf32>
    %641 = tpu.matmul %637, %630, %cst_604 {dimension_numbers = #tpu.dot_dimension_numbers<[1], [0], [0], [1], [0, 0, 1, 1], [], []>} : vector<2x32xf32>, vector<32x32xf32>, vector<2x32xf32> -> vector<2x32xf32>
    %642 = arith.addf %640, %641 : vector<2x32xf32>
    %643 = vector.broadcast %633 : vector<1x32xf32> to vector<2x32xf32>
    %644 = arith.addf %642, %643 : vector<2x32xf32>
    %cst_605 = arith.constant 0.000000e+00 : f32
    %645 = vector.broadcast %cst_605 : f32 to vector<2x32xf32>
    %646 = arith.maximumf %644, %645 : vector<2x32xf32>
    %cst_606 = arith.constant dense<0.000000e+00> : vector<2x32xf32>
    %647 = tpu.matmul %646, %631, %cst_606 {dimension_numbers = #tpu.dot_dimension_numbers<[1], [0], [0], [1], [0, 0, 1, 1], [], []>} : vector<2x32xf32>, vector<32x32xf32>, vector<2x32xf32> -> vector<2x32xf32>
    %648 = vector.broadcast %634 : vector<1x32xf32> to vector<2x32xf32>
    %649 = arith.addf %647, %648 : vector<2x32xf32>
    %cst_607 = arith.constant 0.000000e+00 : f32
    %650 = vector.broadcast %cst_607 : f32 to vector<2x32xf32>
    %651 = arith.maximumf %649, %650 : vector<2x32xf32>
    %cst_608 = arith.constant dense<0.000000e+00> : vector<2x32xf32>
    %652 = tpu.matmul %651, %632, %cst_608 {dimension_numbers = #tpu.dot_dimension_numbers<[1], [0], [0], [1], [0, 0, 1, 1], [], []>} : vector<2x32xf32>, vector<32x32xf32>, vector<2x32xf32> -> vector<2x32xf32>
    %653 = vector.broadcast %635 : vector<1x32xf32> to vector<2x32xf32>
    %654 = arith.addf %652, %653 : vector<2x32xf32>
    %655 = vector.extract_strided_slice %654 {offsets = [0, 0], sizes = [2, 2], strides = [1, 1]} : vector<2x32xf32> to vector<2x2xf32>
    %c0_609 = arith.constant 0 : index
    %c0_610 = arith.constant 0 : index
    %656 = vector.load %arg6[%c0_609, %c0_610] : memref<2x2xf32, #tpu.memory_space<vmem>>, vector<2x2xf32>
    tpu.vector_store %arg6[%c0_609, %c0_610], %655 {strides = array<i32>} : memref<2x2xf32, #tpu.memory_space<vmem>>, vector<2x2xf32>,
    return
  }
}

</mosaic_0001>

<bundles_post_ra>
// kernel: rnnq_forward.1
= control target key start
LH: loop header
LB: loop body
LE: loop exit
PB: predicated region body
PF: predicated region fallthrough
CT: control target
= control target key end

     0   :  { %11 = vsyncpa [#allocation6], 0  ;;  %s4906_s0 = inlined_call_operand.vmem [shape: s32[2], index: 0, kind: input, shape index: {}]   ;;  %s4907_s1 = inlined_call_operand.vmem [shape: s32[2,8], index: 1, kind: input, shape index: {}]   ;;  %s4908_s2 = inlined_call_operand.vmem [shape: s32[2,8], index: 2, kind: input, shape index: {}]   ;;  %s4909_s3 = inlined_call_operand.hbm [shape: f32[1000,128], index: 3, kind: input, shape index: {}]   ;;  %s4910_s4 = inlined_call_operand.vmem [shape: f32[32,128], index: 4, kind: input, shape index: {}]   ;;  %s4911_s5 = inlined_call_operand.vmem [shape: f32[144,32], index: 5, kind: input, shape index: {}]   ;;  %s4912_s6 = inlined_call_operand.hbm [shape: f32[2,2], index: 6, kind: output, shape index: {}]  }
   0x1   :  { %12 = vsyncpa [#allocation8], 0  ;;  %s30_s23 = sshll.u32 %s4907_s1, 4  ;;  %s31_s23 = int_to_ptr.vmem [resolvable:$true] %s30_s23 }
   0x2   :  { %13 = vsyncpa [#allocation5], 0  ;;  %s20_s26 = sshll.u32 %s4906_s0, 4  ;;  %s2972_s27 = scalar_lea.vmem %s31_s23, 32  ;;  %s21_s26 = int_to_ptr.vmem [resolvable:$true] %s20_s26 }
   0x3   :  { %p2973_p0 = scmp.ne.s32.totalorder %s31_s23, %s2972_s27  ;;  %p2977_p1 = scmp.lt.s32.totalorder %s31_s23, %s31_s23 }
   0x4   :  { %p2978_p2 = scmp.lt.s32.totalorder %s2972_s27, %s2972_s27 }
   0x6   :  { %p2979_p3 = por %p2978_p2, %p2977_p1 }
   0x8   :  { %p2980_p4 = pnand %p2979_p3, %p2973_p0 }
   0xa   :  { %2983 = shalt.err (!%p2980_p4)
}
   0xb   :  { %s3868_s28 = smov [#allocation7]   ;;  %s2984_s29 = scalar_lea.vmem %s21_s26, 16 }
   0xc   :  { %33 = dma.vmem_to_smem %s31_s23, 32, %s3868_s28, [#allocation8]  }
   0xd   :  { %p2985_p5 = scmp.ne.s32.totalorder %s21_s26, %s2984_s29  ;;  %p2989_p6 = scmp.lt.s32.totalorder %s21_s26, %s21_s26 }
   0xe   :  { %p2990_p7 = scmp.lt.s32.totalorder %s2984_s29, %s2984_s29 }
  0x10   :  { %p2991_p8 = por %p2990_p7, %p2989_p6 }
  0x12   :  { %p2992_p9 = pnand %p2991_p8, %p2985_p5 }
  0x14   :  { %2995 = shalt.err (!%p2992_p9)
}
  0x15   :  { %s3869_s1 = smov [#allocation4]   ;;  %s40_s7 = sshll.u32 %s4908_s2, 4  ;;  %s41_s7 = int_to_ptr.vmem [resolvable:$true] %s40_s7 }
  0x16   :  { %23 = dma.vmem_to_smem %s21_s26, 16, %s3869_s1, [#allocation6]  }
  0x17   :  { %s2996_s8 = scalar_lea.vmem %s41_s7, 32  ;;  %p3001_p11 = scmp.lt.s32.totalorder %s41_s7, %s41_s7 }
  0x18   :  { %p2997_p10 = scmp.ne.s32.totalorder %s41_s7, %s2996_s8  ;;  %p3002_p12 = scmp.lt.s32.totalorder %s2996_s8, %s2996_s8 }
  0x1a   :  { %p3003_p13 = por %p3002_p12, %p3001_p11 }
  0x1c   :  { %p3004_p0 = pnand %p3003_p13, %p2997_p10 }
  0x1e   :  { %3007 = shalt.err (!%p3004_p0)
}
  0x1f   :  { %s3870_s9 = smov [#allocation9]  }
  0x20   :  { %43 = dma.vmem_to_smem %s41_s7, 32, %s3870_s9, [#allocation8]  }
  0x21   :  { %3798 = dma.done.wait [#allocation6], 16  }
  0x22   :  { %3799 = vsyncadd [#allocation6], 4294967280 }
  0x23   :  { %3800 = dma.done.wait [#allocation8], 64  }
  0x24   :  { %3801 = vsyncadd [#allocation8], 4294967232 }
  0x25   :  { %57 = sfence }
  0x26   :  { %s58_s10 = sld [smem:[#allocation7]]  ;;  %s3871_s11 = smov [#allocation2]  }
  0x27   :  { %s72_s12 = sshll.u32 %s3871_s11, 4  ;;  %s76_s13 = sld [smem:[#allocation9]]  ;;  %s3953_s12 = int_to_ptr.vmem [resolvable:$true] %s72_s12 }
  0x28   :  { %s3872_s2 = smov [#allocation2 + $0x2]   ;;  %s3955_s15 = sld [smem:[#allocation7 + $0x1]] }
  0x29   :  { %s92_s14 = sshll.u32 %s3872_s2, 4  ;;  %s3873_s16 = smov [#allocation2 + $0x4]   ;;  %s3957_s14 = int_to_ptr.vmem [resolvable:$true] %s92_s14 }
  0x2a   :  { %s3959_s17 = sshll.u32 %s3873_s16, 4  ;;  %s3961_s18 = sld [smem:[#allocation9 + $0x1]]  ;;  %s113_s17 = int_to_ptr.vmem [resolvable:$true] %s3959_s17 }
  0x2b   :  { %s3970_s27 = scalar_lea.hbm %s4909_s3, 16000 }
  0x2c   :  { %p59_p1 = scmp.gt.s32.totalorder %s58_s10, 0  ;;  %p2294_p2 = scmp.lt.s32.totalorder %s58_s10, 999 }
  0x2d   :  { %p77_p3 = scmp.gt.s32.totalorder %s76_s13, 0  ;;  %p2300_p4 = scmp.lt.s32.totalorder %s76_s13, 999 }
  0x2e   :  { %s4925_s10 = smov (!%p59_p1, %s58_s10), 0  ;;  %p97_p5 = scmp.gt.s32.totalorder %s3955_s15, 0 }
  0x2f   :  { %s4927_s13 = smov (!%p77_p3, %s76_s13), 0  ;;  %s4929_s10 = smov (!%p2294_p2, %s4925_s10), 999 }
  0x30   :  { %s4931_s13 = smov (!%p2300_p4, %s4927_s13), 999  ;;  %s2299_s19 = sshll.u32 %s4929_s10, 4 }
  0x31   :  { %s64_s22 = scalar_lea.hbm %s4909_s3, %s2299_s19  ;;  %s2305_s23 = sshll.u32 %s4931_s13, 4 }
  0x32   :  { %s3008_s24 = scalar_lea.hbm %s64_s22, 16  ;;  %p3011_p7 = scmp.lt.u32.totalorder %s64_s22, %s4909_s3 }
  0x33   :  { %p3009_p6 = scmp.ne.s32.totalorder %s64_s22, %s3008_s24  ;;  %p3012_p8 = scmp.lt.u32.totalorder %s3970_s27, %s3008_s24 }
  0x34   :  { %p3014_p10 = scmp.lt.u32.totalorder %s3008_s24, %s64_s22 }
  0x35   :  { %p3013_p9 = por %p3012_p8, %p3011_p7 }
  0x37   :  { %p3015_p11 = por %p3014_p10, %p3013_p9 }
  0x39   :  { %p3016_p12 = pnand %p3015_p11, %p3009_p6 }
  0x3b   :  { %3019 = shalt.err (!%p3016_p12)  }
  0x3c   :  { %s3020_s1 = scalar_lea.vmem %s3953_s12, 16  ;;  %s3979_s0 = scalar_lea.vmem %s3953_s12, 512 }
  0x3d   :  { %p3021_p13 = scmp.ne.s32.totalorder %s3953_s12, %s3020_s1  ;;  %p3025_p0 = scmp.lt.s32.totalorder %s3953_s12, %s3953_s12 }
  0x3e   :  { %p3026_p1 = scmp.lt.s32.totalorder %s3979_s0, %s3020_s1 }
  0x40   :  { %p3027_p2 = por %p3026_p1, %p3025_p0 }
  0x42   :  { %p3028_p3 = pnand %p3027_p2, %p3021_p13 }
  0x44   :  { %3031 = shalt.err (!%p3028_p3)  }
  0x45   :  { %75 = dma.hbm_to_vmem [thread:$0]  %s64_s22, 16, %s3953_s12, [#allocation3] }
  0x46   :  { %s82_s8 = scalar_lea.hbm %s4909_s3, %s2305_s23  ;;  %p2307_p4 = scmp.lt.s32.totalorder %s3955_s15, 999 }
  0x47   :  { %s3032_s9 = scalar_lea.hbm %s82_s8, 16  ;;  %p3035_p7 = scmp.lt.u32.totalorder %s82_s8, %s4909_s3 }
  0x48   :  { %p3033_p6 = scmp.ne.s32.totalorder %s82_s8, %s3032_s9  ;;  %p3036_p8 = scmp.lt.u32.totalorder %s3970_s27, %s3032_s9 }
  0x49   :  { %p3038_p10 = scmp.lt.u32.totalorder %s3032_s9, %s82_s8 }
  0x4a   :  { %p3037_p9 = por %p3036_p8, %p3035_p7 }
  0x4c   :  { %p3039_p11 = por %p3038_p10, %p3037_p9 }
  0x4e   :  { %p3040_p12 = pnand %p3039_p11, %p3033_p6 }
  0x50   :  { %3043 = shalt.err (!%p3040_p12)  }
  0x51   :  { %s3044_s13 = scalar_lea.vmem %s3957_s14, 16  ;;  %p3049_p0 = scmp.lt.s32.totalorder %s3957_s14, %s3953_s12 }
  0x52   :  { %p3045_p13 = scmp.ne.s32.totalorder %s3957_s14, %s3044_s13  ;;  %p3050_p1 = scmp.lt.s32.totalorder %s3979_s0, %s3044_s13 }
  0x54   :  { %p3051_p2 = por %p3050_p1, %p3049_p0 }
  0x56   :  { %p3052_p3 = pnand %p3051_p2, %p3045_p13 }
  0x58   :  { %3055 = shalt.err (!%p3052_p3)  }
  0x59   :  { %95 = dma.hbm_to_vmem [thread:$0]  %s82_s8, 16, %s3957_s14, [#allocation3 + $0x2] }
  0x5a   :  { %s98_s2 = scalar_select %p97_p5, %s3955_s15, 0 }
  0x5b   :  { %p117_p6 = scmp.gt.s32.totalorder %s3961_s18, 0  ;;  %p2314_p7 = scmp.lt.s32.totalorder %s3961_s18, 999 }
  0x5c   :  { %s4933_s2 = smov (!%p2307_p4, %s98_s2), 999 }
  0x5d   :  { %s118_s16 = scalar_select %p117_p6, %s3961_s18, 0 }
  0x5e   :  { %s2312_s19 = sshll.u32 %s4933_s2, 4 }
  0x5f   :  { %s102_s22 = scalar_lea.hbm %s4909_s3, %s2312_s19 }
  0x60   :  { %s3056_s23 = scalar_lea.hbm %s102_s22, 16  ;;  %p3059_p9 = scmp.lt.u32.totalorder %s102_s22, %s4909_s3 }
  0x61   :  { %p3057_p8 = scmp.ne.s32.totalorder %s102_s22, %s3056_s23  ;;  %p3060_p10 = scmp.lt.u32.totalorder %s3970_s27, %s3056_s23 }
  0x62   :  { %p3062_p5 = scmp.lt.u32.totalorder %s3056_s23, %s102_s22 }
  0x63   :  { %p3061_p11 = por %p3060_p10, %p3059_p9 }
  0x65   :  { %p3063_p12 = por %p3062_p5, %p3061_p11 }
  0x67   :  { %p3064_p13 = pnand %p3063_p12, %p3057_p8 }
  0x69   :  { %3067 = shalt.err (!%p3064_p13)  }
  0x6a   :  { %s3068_s14 = scalar_lea.vmem %s113_s17, 16  ;;  %p3073_p0 = scmp.lt.s32.totalorder %s113_s17, %s3953_s12 }
  0x6b   :  { %p3069_p4 = scmp.ne.s32.totalorder %s113_s17, %s3068_s14  ;;  %p3074_p1 = scmp.lt.s32.totalorder %s3979_s0, %s3068_s14 }
  0x6d   :  { %p3075_p2 = por %p3074_p1, %p3073_p0 }
  0x6f   :  { %p3076_p3 = pnand %p3075_p2, %p3069_p4 }
  0x71   :  { %3079 = shalt.err (!%p3076_p3)  }
  0x72   :  { %115 = dma.hbm_to_vmem [thread:$0]  %s102_s22, 16, %s113_s17, [#allocation3 + $0x4] }
  0x73   :  { %s4935_s16 = smov (!%p2314_p7, %s118_s16), 999  ;;  %s3874_s15 = smov [#allocation2 + $0x6]  }
  0x74   :  { %s132_s26 = sshll.u32 %s3874_s15, 4  ;;  %s4019_s28 = sld [smem:[#allocation7 + $0x2]]  ;;  %s133_s26 = int_to_ptr.vmem [resolvable:$true] %s132_s26 }
  0x75   :  { %s2319_s29 = sshll.u32 %s4935_s16, 4 }
  0x76   :  { %s122_s7 = scalar_lea.hbm %s4909_s3, %s2319_s29 }
  0x77   :  { %s3080_s8 = scalar_lea.hbm %s122_s7, 16  ;;  %p3083_p8 = scmp.lt.u32.totalorder %s122_s7, %s4909_s3 }
  0x78   :  { %p3081_p6 = scmp.ne.s32.totalorder %s122_s7, %s3080_s8  ;;  %p3084_p9 = scmp.lt.u32.totalorder %s3970_s27, %s3080_s8 }
  0x79   :  { %p3086_p11 = scmp.lt.u32.totalorder %s3080_s8, %s122_s7 }
  0x7a   :  { %p3085_p10 = por %p3084_p9, %p3083_p8 }
  0x7c   :  { %p3087_p7 = por %p3086_p11, %p3085_p10 }
  0x7e   :  { %p3088_p5 = pnand %p3087_p7, %p3081_p6 }
  0x80   :  { %3091 = shalt.err (!%p3088_p5)  }
  0x81   :  { %s3092_s17 = scalar_lea.vmem %s133_s26, 16  ;;  %p3097_p13 = scmp.lt.s32.totalorder %s133_s26, %s3953_s12 }
  0x82   :  { %p3093_p12 = scmp.ne.s32.totalorder %s133_s26, %s3092_s17  ;;  %p3098_p4 = scmp.lt.s32.totalorder %s3979_s0, %s3092_s17 }
  0x84   :  { %p3099_p0 = por %p3098_p4, %p3097_p13 }
  0x86   :  { %p3100_p1 = pnand %p3099_p0, %p3093_p12 }
  0x88   :  { %3103 = shalt.err (!%p3100_p1)  }
  0x89   :  { %135 = dma.hbm_to_vmem [thread:$0]  %s122_s7, 16, %s133_s26, [#allocation3 + $0x6] }
  0x8a   :  { %s3875_s18 = smov [#allocation2 + $0x8]   ;;  %s4030_s13 = sld [smem:[#allocation9 + $0x2]] }
  0x8b   :  { %s152_s11 = sshll.u32 %s3875_s18, 4  ;;  %p137_p2 = scmp.gt.s32.totalorder %s4019_s28, 0  ;;  %s4032_s11 = int_to_ptr.vmem [resolvable:$true] %s152_s11 }
  0x8c   :  { %p2321_p3 = scmp.lt.s32.totalorder %s4019_s28, 999  ;;  %s3876_s2 = smov [#allocation2 + $0xa]  }
  0x8d   :  { %s172_s16 = sshll.u32 %s3876_s2, 4  ;;  %s4036_s19 = sld [smem:[#allocation7 + $0x3]]  ;;  %s4039_s16 = int_to_ptr.vmem [resolvable:$true] %s172_s16 }
  0x8e   :  { %s4937_s28 = smov (!%p137_p2, %s4019_s28), 0  ;;  %s3877_s21 = smov [#allocation2 + $0xc]  }
  0x8f   :  { %s4939_s28 = smov (!%p2321_p3, %s4937_s28), 999  ;;  %s192_s22 = sshll.u32 %s3877_s21, 4  ;;  %s4066_s22 = int_to_ptr.vmem [resolvable:$true] %s192_s22 }
  0x90   :  { %p157_p6 = scmp.gt.s32.totalorder %s4030_s13, 0  ;;  %s2326_s20 = sshll.u32 %s4939_s28, 4 }
  0x91   :  { %s142_s25 = scalar_lea.hbm %s4909_s3, %s2326_s20 }
  0x92   :  { %s3104_s14 = scalar_lea.hbm %s142_s25, 16  ;;  %p3107_p11 = scmp.lt.u32.totalorder %s142_s25, %s4909_s3 }
  0x93   :  { %p177_p9 = scmp.gt.s32.totalorder %s4036_s19, 0  ;;  %p3105_p10 = scmp.ne.s32.totalorder %s142_s25, %s3104_s14 }
  0x94   :  { %p3108_p7 = scmp.lt.u32.totalorder %s3970_s27, %s3104_s14  ;;  %p3110_p12 = scmp.lt.u32.totalorder %s3104_s14, %s142_s25 }
  0x96   :  { %p3109_p5 = por %p3108_p7, %p3107_p11 }
  0x98   :  { %p3111_p13 = por %p3110_p12, %p3109_p5 }
  0x9a   :  { %p3112_p4 = pnand %p3111_p13, %p3105_p10 }
  0x9c   :  { %3115 = shalt.err (!%p3112_p4)  }
  0x9d   :  { %s3116_s28 = scalar_lea.vmem %s4032_s11, 16  ;;  %p3121_p1 = scmp.lt.s32.totalorder %s4032_s11, %s3953_s12 }
  0x9e   :  { %p3117_p0 = scmp.ne.s32.totalorder %s4032_s11, %s3116_s28  ;;  %p3122_p2 = scmp.lt.s32.totalorder %s3979_s0, %s3116_s28 }
  0xa0   :  { %p3123_p3 = por %p3122_p2, %p3121_p1 }
  0xa2   :  { %p3124_p8 = pnand %p3123_p3, %p3117_p0 }
  0xa4   :  { %3127 = shalt.err (!%p3124_p8)  }
  0xa5   :  { %155 = dma.hbm_to_vmem [thread:$0]  %s142_s25, 16, %s4032_s11, [#allocation3 + $0x8] }
  0xa6   :  { %s158_s29 = scalar_select %p157_p6, %s4030_s13, 0 }
  0xa7   :  { %s178_s1 = scalar_select %p177_p9, %s4036_s19, 0 }
  0xa8   :  { %p4913_p10 = scmp.lt.s32.totalorder %s4030_s13, 999  ;;  %p2335_p11 = scmp.lt.s32.totalorder %s4036_s19, 999 }
  0xa9   :  { %s4068_s7 = sld [smem:[#allocation9 + $0x3]] }
  0xaa   :  { %s4941_s29 = smov (!%p4913_p10, %s158_s29), 999 }
  0xab   :  { %s2333_s30 = sshll.u32 %s4941_s29, 4 }
  0xac   :  { %s162_s10 = scalar_lea.hbm %s4909_s3, %s2333_s30 }
  0xad   :  { %s3128_s17 = scalar_lea.hbm %s162_s10, 16  ;;  %p3131_p6 = scmp.lt.u32.totalorder %s162_s10, %s4909_s3 }
  0xae   :  { %p3129_p8 = scmp.ne.s32.totalorder %s162_s10, %s3128_s17  ;;  %p3132_p7 = scmp.lt.u32.totalorder %s3970_s27, %s3128_s17 }
  0xaf   :  { %p3134_p5 = scmp.lt.u32.totalorder %s3128_s17, %s162_s10 }
  0xb0   :  { %p3133_p9 = por %p3132_p7, %p3131_p6 }
  0xb2   :  { %p3135_p12 = por %p3134_p5, %p3133_p9 }
  0xb4   :  { %p3136_p13 = pnand %p3135_p12, %p3129_p8 }
  0xb6   :  { %3139 = shalt.err (!%p3136_p13)  }
  0xb7   :  { %s3140_s13 = scalar_lea.vmem %s4039_s16, 16  ;;  %p3145_p0 = scmp.lt.s32.totalorder %s4039_s16, %s3953_s12 }
  0xb8   :  { %p3141_p4 = scmp.ne.s32.totalorder %s4039_s16, %s3140_s13  ;;  %p3146_p1 = scmp.lt.s32.totalorder %s3979_s0, %s3140_s13 }
  0xba   :  { %p3147_p2 = por %p3146_p1, %p3145_p0 }
  0xbc   :  { %p3148_p3 = pnand %p3147_p2, %p3141_p4 }
  0xbe   :  { %3151 = shalt.err (!%p3148_p3)  }
  0xbf   :  { %175 = dma.hbm_to_vmem [thread:$0]  %s162_s10, 16, %s4039_s16, [#allocation3 + $0xa] }
  0xc0   :  { %s4943_s1 = smov (!%p2335_p11, %s178_s1), 999  ;;  %s3878_s2 = smov [#allocation2 + $0xe]  }
  0xc1   :  { %s212_s20 = sshll.u32 %s3878_s2, 4  ;;  %s4085_s21 = sld [smem:[#allocation7 + $0x4]]  ;;  %s4087_s20 = int_to_ptr.vmem [resolvable:$true] %s212_s20 }
  0xc2   :  { %s2340_s23 = sshll.u32 %s4943_s1, 4  ;;  %p197_p10 = scmp.gt.s32.totalorder %s4068_s7, 0 }
  0xc3   :  { %s182_s14 = scalar_lea.hbm %s4909_s3, %s2340_s23 }
  0xc4   :  { %s3152_s15 = scalar_lea.hbm %s182_s14, 16  ;;  %p3155_p6 = scmp.lt.u32.totalorder %s182_s14, %s4909_s3 }
  0xc5   :  { %p3153_p8 = scmp.ne.s32.totalorder %s182_s14, %s3152_s15  ;;  %p3156_p7 = scmp.lt.u32.totalorder %s3970_s27, %s3152_s15 }
  0xc6   :  { %p3158_p9 = scmp.lt.u32.totalorder %s3152_s15, %s182_s14 }
  0xc7   :  { %p3157_p11 = por %p3156_p7, %p3155_p6 }
  0xc9   :  { %p3159_p5 = por %p3158_p9, %p3157_p11 }
  0xcb   :  { %p3160_p12 = pnand %p3159_p5, %p3153_p8 }
  0xcd   :  { %3163 = shalt.err (!%p3160_p12)  }
  0xce   :  { %s3164_s16 = scalar_lea.vmem %s4066_s22, 16  ;;  %p3169_p4 = scmp.lt.s32.totalorder %s4066_s22, %s3953_s12 }
  0xcf   :  { %p3165_p13 = scmp.ne.s32.totalorder %s4066_s22, %s3164_s16  ;;  %p3170_p0 = scmp.lt.s32.totalorder %s3979_s0, %s3164_s16 }
  0xd1   :  { %p3171_p1 = por %p3170_p0, %p3169_p4 }
  0xd3   :  { %p3172_p2 = pnand %p3171_p1, %p3165_p13 }
  0xd5   :  { %3175 = shalt.err (!%p3172_p2)  }
  0xd6   :  { %195 = dma.hbm_to_vmem [thread:$0]  %s182_s14, 16, %s4066_s22, [#allocation3 + $0xc] }
  0xd7   :  { %s198_s19 = scalar_select %p197_p10, %s4068_s7, 0 }
  0xd8   :  { %p2342_p3 = scmp.lt.s32.totalorder %s4068_s7, 999  ;;  %p217_p8 = scmp.gt.s32.totalorder %s4085_s21, 0 }
  0xd9   :  { %p2349_p6 = scmp.lt.s32.totalorder %s4085_s21, 999  ;;  %s3879_s30 = smov [#allocation2 + $0x10]  }
  0xda   :  { %s4945_s19 = smov (!%p2342_p3, %s198_s19), 999  ;;  %s232_s8 = sshll.u32 %s3879_s30, 4  ;;  %s4113_s8 = int_to_ptr.vmem [resolvable:$true] %s232_s8 }
  0xdb   :  { %s218_s29 = scalar_select %p217_p8, %s4085_s21, 0 }
  0xdc   :  { %s2347_s1 = sshll.u32 %s4945_s19, 4 }
  0xdd   :  { %s202_s17 = scalar_lea.hbm %s4909_s3, %s2347_s1 }
  0xde   :  { %s3176_s18 = scalar_lea.hbm %s202_s17, 16  ;;  %p3179_p10 = scmp.lt.u32.totalorder %s202_s17, %s4909_s3 }
  0xdf   :  { %p3177_p7 = scmp.ne.s32.totalorder %s202_s17, %s3176_s18  ;;  %p3180_p11 = scmp.lt.u32.totalorder %s3970_s27, %s3176_s18 }
  0xe0   :  { %p3182_p5 = scmp.lt.u32.totalorder %s3176_s18, %s202_s17 }
  0xe1   :  { %p3181_p9 = por %p3180_p11, %p3179_p10 }
  0xe3   :  { %p3183_p12 = por %p3182_p5, %p3181_p9 }
  0xe5   :  { %p3184_p13 = pnand %p3183_p12, %p3177_p7 }
  0xe7   :  { %3187 = shalt.err (!%p3184_p13)  }
  0xe8   :  { %s3188_s7 = scalar_lea.vmem %s4087_s20, 16  ;;  %p3193_p0 = scmp.lt.s32.totalorder %s4087_s20, %s3953_s12 }
  0xe9   :  { %p3189_p4 = scmp.ne.s32.totalorder %s4087_s20, %s3188_s7  ;;  %p3194_p1 = scmp.lt.s32.totalorder %s3979_s0, %s3188_s7 }
  0xeb   :  { %p3195_p2 = por %p3194_p1, %p3193_p0 }
  0xed   :  { %p3196_p3 = pnand %p3195_p2, %p3189_p4 }
  0xef   :  { %3199 = shalt.err (!%p3196_p3)  }
  0xf0   :  { %215 = dma.hbm_to_vmem [thread:$0]  %s202_s17, 16, %s4087_s20, [#allocation3 + $0xe] }
  0xf1   :  { %s4947_s29 = smov (!%p2349_p6, %s218_s29), 999  ;;  %s4127_s13 = sld [smem:[#allocation9 + $0x4]] }
  0xf2   :  { %s2354_s2 = sshll.u32 %s4947_s29, 4  ;;  %s3880_s23 = smov [#allocation2 + $0x12]  }
  0xf3   :  { %s252_s24 = sshll.u32 %s3880_s23, 4  ;;  %s222_s15 = scalar_lea.hbm %s4909_s3, %s2354_s2  ;;  %s4132_s24 = int_to_ptr.vmem [resolvable:$true] %s252_s24 }
  0xf4   :  { %s3200_s26 = scalar_lea.hbm %s222_s15, 16  ;;  %p3203_p7 = scmp.lt.u32.totalorder %s222_s15, %s4909_s3 }
  0xf5   :  { %p3201_p8 = scmp.ne.s32.totalorder %s222_s15, %s3200_s26  ;;  %p3204_p10 = scmp.lt.u32.totalorder %s3970_s27, %s3200_s26 }
  0xf6   :  { %p3206_p6 = scmp.lt.u32.totalorder %s3200_s26, %s222_s15 }
  0xf7   :  { %p3205_p11 = por %p3204_p10, %p3203_p7 }
  0xf9   :  { %p3207_p9 = por %p3206_p6, %p3205_p11 }
  0xfb   :  { %p3208_p5 = pnand %p3207_p9, %p3201_p8 }
  0xfd   :  { %3211 = shalt.err (!%p3208_p5)  }
  0xfe   :  { %s3212_s20 = scalar_lea.vmem %s4113_s8, 16  ;;  %p3217_p13 = scmp.lt.s32.totalorder %s4113_s8, %s3953_s12 }
  0xff   :  { %p3213_p12 = scmp.ne.s32.totalorder %s4113_s8, %s3212_s20  ;;  %p3218_p4 = scmp.lt.s32.totalorder %s3979_s0, %s3212_s20 }
 0x101   :  { %p3219_p0 = por %p3218_p4, %p3217_p13 }
 0x103   :  { %p3220_p1 = pnand %p3219_p0, %p3213_p12 }
 0x105   :  { %3223 = shalt.err (!%p3220_p1)  }
 0x106   :  { %235 = dma.hbm_to_vmem [thread:$0]  %s222_s15, 16, %s4113_s8, [#allocation3 + $0x10] }
 0x107   :  { %s4144_s21 = sld [smem:[#allocation7 + $0x5]]  ;;  %s3881_s19 = smov [#allocation2 + $0x14]  }
 0x108   :  { %s272_s29 = sshll.u32 %s3881_s19, 4  ;;  %s4146_s1 = sld [smem:[#allocation9 + $0x5]]  ;;  %s4150_s29 = int_to_ptr.vmem [resolvable:$true] %s272_s29 }
 0x109   :  { %p237_p2 = scmp.gt.s32.totalorder %s4127_s13, 0  ;;  %p2356_p3 = scmp.lt.s32.totalorder %s4127_s13, 999 }
 0x10a   :  { %s3882_s30 = smov [#allocation2 + $0x16]   ;;  %s4155_s8 = sld [smem:[#allocation7 + $0x6]] }
 0x10b   :  { %s4949_s13 = smov (!%p237_p2, %s4127_s13), 0  ;;  %s4153_s9 = sshll.u32 %s3882_s30, 4  ;;  %s4185_s9 = int_to_ptr.vmem [resolvable:$true] %s4153_s9 }
 0x10c   :  { %s4951_s13 = smov (!%p2356_p3, %s4949_s13), 999 }
 0x10d   :  { %p257_p8 = scmp.gt.s32.totalorder %s4144_s21, 0  ;;  %s2361_s10 = sshll.u32 %s4951_s13, 4 }
 0x10e   :  { %p277_p10 = scmp.gt.s32.totalorder %s4146_s1, 0  ;;  %s242_s11 = scalar_lea.hbm %s4909_s3, %s2361_s10 }
 0x10f   :  { %s3224_s22 = scalar_lea.hbm %s242_s11, 16  ;;  %p3227_p9 = scmp.lt.u32.totalorder %s242_s11, %s4909_s3 }
 0x110   :  { %p3225_p6 = scmp.ne.s32.totalorder %s242_s11, %s3224_s22  ;;  %p3228_p5 = scmp.lt.u32.totalorder %s3970_s27, %s3224_s22 }
 0x111   :  { %p3230_p13 = scmp.lt.u32.totalorder %s3224_s22, %s242_s11 }
 0x112   :  { %p3229_p12 = por %p3228_p5, %p3227_p9 }
 0x114   :  { %p3231_p4 = por %p3230_p13, %p3229_p12 }
 0x116   :  { %p3232_p0 = pnand %p3231_p4, %p3225_p6 }
 0x118   :  { %3235 = shalt.err (!%p3232_p0)  }
 0x119   :  { %s3236_s13 = scalar_lea.vmem %s4132_s24, 16  ;;  %p3241_p2 = scmp.lt.s32.totalorder %s4132_s24, %s3953_s12 }
 0x11a   :  { %p3237_p1 = scmp.ne.s32.totalorder %s4132_s24, %s3236_s13  ;;  %p3242_p3 = scmp.lt.s32.totalorder %s3979_s0, %s3236_s13 }
 0x11c   :  { %p3243_p11 = por %p3242_p3, %p3241_p2 }
 0x11e   :  { %p3244_p7 = pnand %p3243_p11, %p3237_p1 }
 0x120   :  { %3247 = shalt.err (!%p3244_p7)  }
 0x121   :  { %255 = dma.hbm_to_vmem [thread:$0]  %s242_s11, 16, %s4132_s24, [#allocation3 + $0x12] }
 0x122   :  { %s258_s23 = scalar_select %p257_p8, %s4144_s21, 0 }
 0x123   :  { %s278_s25 = scalar_select %p277_p10, %s4146_s1, 0 }
 0x124   :  { %p4914_p6 = scmp.lt.s32.totalorder %s4144_s21, 999  ;;  %p4915_p9 = scmp.lt.s32.totalorder %s4146_s1, 999 }
 0x126   :  { %s4953_s23 = smov (!%p4914_p6, %s258_s23), 999  ;;  %s4955_s25 = smov (!%p4915_p9, %s278_s25), 999 }
 0x127   :  { %s2368_s14 = sshll.u32 %s4953_s23, 4  ;;  %s2375_s16 = sshll.u32 %s4955_s25, 4 }
 0x128   :  { %s262_s28 = scalar_lea.hbm %s4909_s3, %s2368_s14 }
 0x129   :  { %s3248_s20 = scalar_lea.hbm %s262_s28, 16  ;;  %p3251_p8 = scmp.lt.u32.totalorder %s262_s28, %s4909_s3 }
 0x12a   :  { %p3249_p7 = scmp.ne.s32.totalorder %s262_s28, %s3248_s20  ;;  %p3252_p11 = scmp.lt.u32.totalorder %s3970_s27, %s3248_s20 }
 0x12b   :  { %p3254_p5 = scmp.lt.u32.totalorder %s3248_s20, %s262_s28 }
 0x12c   :  { %p3253_p10 = por %p3252_p11, %p3251_p8 }
 0x12e   :  { %p3255_p12 = por %p3254_p5, %p3253_p10 }
 0x130   :  { %p3256_p13 = pnand %p3255_p12, %p3249_p7 }
 0x132   :  { %3259 = shalt.err (!%p3256_p13)  }
 0x133   :  { %s3260_s21 = scalar_lea.vmem %s4150_s29, 16  ;;  %p3265_p0 = scmp.lt.s32.totalorder %s4150_s29, %s3953_s12 }
 0x134   :  { %p3261_p4 = scmp.ne.s32.totalorder %s4150_s29, %s3260_s21  ;;  %p3266_p1 = scmp.lt.s32.totalorder %s3979_s0, %s3260_s21 }
 0x136   :  { %p3267_p2 = por %p3266_p1, %p3265_p0 }
 0x138   :  { %p3268_p3 = pnand %p3267_p2, %p3261_p4 }
 0x13a   :  { %3271 = shalt.err (!%p3268_p3)  }
 0x13b   :  { %275 = dma.hbm_to_vmem [thread:$0]  %s262_s28, 16, %s4150_s29, [#allocation3 + $0x14] }
 0x13c   :  { %s282_s10 = scalar_lea.hbm %s4909_s3, %s2375_s16  ;;  %p297_p6 = scmp.gt.s32.totalorder %s4155_s8, 0 }
 0x13d   :  { %s3272_s17 = scalar_lea.hbm %s282_s10, 16  ;;  %p3275_p7 = scmp.lt.u32.totalorder %s282_s10, %s4909_s3 }
 0x13e   :  { %p3273_p9 = scmp.ne.s32.totalorder %s282_s10, %s3272_s17  ;;  %p3276_p8 = scmp.lt.u32.totalorder %s3970_s27, %s3272_s17 }
 0x13f   :  { %p3278_p10 = scmp.lt.u32.totalorder %s3272_s17, %s282_s10 }
 0x140   :  { %p3277_p11 = por %p3276_p8, %p3275_p7 }
 0x142   :  { %p3279_p5 = por %p3278_p10, %p3277_p11 }
 0x144   :  { %p3280_p12 = pnand %p3279_p5, %p3273_p9 }
 0x146   :  { %3283 = shalt.err (!%p3280_p12)  }
 0x147   :  { %s3284_s29 = scalar_lea.vmem %s4185_s9, 16  ;;  %p3289_p4 = scmp.lt.s32.totalorder %s4185_s9, %s3953_s12 }
 0x148   :  { %p3285_p13 = scmp.ne.s32.totalorder %s4185_s9, %s3284_s29  ;;  %p3290_p0 = scmp.lt.s32.totalorder %s3979_s0, %s3284_s29 }
 0x14a   :  { %p3291_p1 = por %p3290_p0, %p3289_p4 }
 0x14c   :  { %p3292_p2 = pnand %p3291_p1, %p3285_p13 }
 0x14e   :  { %3295 = shalt.err (!%p3292_p2)  }
 0x14f   :  { %295 = dma.hbm_to_vmem [thread:$0]  %s282_s10, 16, %s4185_s9, [#allocation3 + $0x16] }
 0x150   :  { %s298_s22 = scalar_select %p297_p6, %s4155_s8, 0 }
 0x151   :  { %p2377_p3 = scmp.lt.s32.totalorder %s4155_s8, 999  ;;  %s3883_s7 = smov [#allocation2 + $0x18]  }
 0x152   :  { %s312_s2 = sshll.u32 %s3883_s7, 4  ;;  %s4218_s13 = sld [smem:[#allocation9 + $0x6]]  ;;  %s313_s2 = int_to_ptr.vmem [resolvable:$true] %s312_s2 }
 0x153   :  { %s4957_s22 = smov (!%p2377_p3, %s298_s22), 999  ;;  %s3884_s25 = smov [#allocation2 + $0x1a]  }
 0x154   :  { %s2382_s23 = sshll.u32 %s4957_s22, 4  ;;  %s332_s14 = sshll.u32 %s3884_s25, 4  ;;  %s4223_s14 = int_to_ptr.vmem [resolvable:$true] %s332_s14 }
 0x155   :  { %s302_s28 = scalar_lea.hbm %s4909_s3, %s2382_s23 }
 0x156   :  { %s3296_s9 = scalar_lea.hbm %s302_s28, 16  ;;  %p3299_p6 = scmp.lt.u32.totalorder %s302_s28, %s4909_s3 }
 0x157   :  { %p3297_p9 = scmp.ne.s32.totalorder %s302_s28, %s3296_s9  ;;  %p3300_p7 = scmp.lt.u32.totalorder %s3970_s27, %s3296_s9 }
 0x158   :  { %p3302_p11 = scmp.lt.u32.totalorder %s3296_s9, %s302_s28 }
 0x159   :  { %p3301_p8 = por %p3300_p7, %p3299_p6 }
 0x15b   :  { %p3303_p10 = por %p3302_p11, %p3301_p8 }
 0x15d   :  { %p3304_p5 = pnand %p3303_p10, %p3297_p9 }
 0x15f   :  { %3307 = shalt.err (!%p3304_p5)  }
 0x160   :  { %s3308_s8 = scalar_lea.vmem %s313_s2, 16  ;;  %p3313_p13 = scmp.lt.s32.totalorder %s313_s2, %s3953_s12 }
 0x161   :  { %p3309_p12 = scmp.ne.s32.totalorder %s313_s2, %s3308_s8  ;;  %p3314_p4 = scmp.lt.s32.totalorder %s3979_s0, %s3308_s8 }
 0x163   :  { %p3315_p0 = por %p3314_p4, %p3313_p13 }
 0x165   :  { %p3316_p1 = pnand %p3315_p0, %p3309_p12 }
 0x167   :  { %3319 = shalt.err (!%p3316_p1)  }
 0x168   :  { %315 = dma.hbm_to_vmem [thread:$0]  %s302_s28, 16, %s313_s2, [#allocation3 + $0x18]  ;;  %v700_v0 = vlaneseq  ;;  %v4248_v2 = vld [vmem:[%s4910_s4] sm:$0xff]  ;;  %v4253_v3 = vld [vmem:[%s4910_s4 + $0x8] sm:$0xff]  ;;  %v4258_v4 = vld [vmem:[%s4910_s4 + $0x10] sm:$0xff] }
 0x169   :  { %p317_p2 = scmp.gt.s32.totalorder %s4218_s13, 0  ;;  %p2384_p3 = scmp.lt.s32.totalorder %s4218_s13, 999  ;;  %v4267_v5 = vld [vmem:[%s4910_s4 + $0x18] sm:$0xff] }
 0x16a   :  { %s4233_s19 = sld [smem:[#allocation7 + $0x7]]  ;;  %s3885_s24 = smov [#allocation2 + $0x1c]   ;;  %v4239_v1 = vand.u32 127, %v700_v0 }
 0x16b   :  { %s4959_s13 = smov (!%p317_p2, %s4218_s13), 0  ;;  %s352_s21 = sshll.u32 %s3885_s24, 4  ;;  %s4241_s21 = int_to_ptr.vmem [resolvable:$true] %s352_s21 }
 0x16c   :  { %s4236_s1 = sld [smem:[#allocation9 + $0x7]]  ;;  %s4961_s13 = smov (!%p2384_p3, %s4959_s13), 999  ;;  %vm702_vm0 = vcmp.ge.s32.totalorder %v4239_v1, 64  ;;  %vm703_vm1 = vcmp.lt.s32.totalorder %v4239_v1, 96 }
 0x16d   :  { %s2389_s30 = sshll.u32 %s4961_s13, 4  ;;  %s3886_s10 = smov [#allocation2 + $0x1e]   ;;  %vm4269_vm2 = vmand %vm702_vm0, %vm703_vm1 }
 0x16e   :  { %s372_s17 = sshll.u32 %s3886_s10, 4  ;;  %s322_s13 = scalar_lea.hbm %s4909_s3, %s2389_s30  ;;  %s4289_s17 = int_to_ptr.vmem [resolvable:$true] %s372_s17 }
 0x16f   :  { %s3320_s28 = scalar_lea.hbm %s322_s13, 16  ;;  %p3323_p7 = scmp.lt.u32.totalorder %s322_s13, %s4909_s3 }
 0x170   :  { %p337_p9 = scmp.gt.s32.totalorder %s4233_s19, 0  ;;  %p3321_p6 = scmp.ne.s32.totalorder %s322_s13, %s3320_s28 }
 0x171   :  { %p3324_p8 = scmp.lt.u32.totalorder %s3970_s27, %s3320_s28  ;;  %p3326_p10 = scmp.lt.u32.totalorder %s3320_s28, %s322_s13 }
 0x173   :  { %p3325_p11 = por %p3324_p8, %p3323_p7 }
 0x175   :  { %p3327_p5 = por %p3326_p10, %p3325_p11 }
 0x177   :  { %p3328_p12 = pnand %p3327_p5, %p3321_p6 }
 0x179   :  { %3331 = shalt.err (!%p3328_p12)  }
 0x17a   :  { %s3332_s4 = scalar_lea.vmem %s4223_s14, 16  ;;  %p3337_p4 = scmp.lt.s32.totalorder %s4223_s14, %s3953_s12 }
 0x17b   :  { %p3333_p13 = scmp.ne.s32.totalorder %s4223_s14, %s3332_s4  ;;  %p3338_p0 = scmp.lt.s32.totalorder %s3979_s0, %s3332_s4 }
 0x17d   :  { %p3339_p1 = por %p3338_p0, %p3337_p4 }
 0x17f   :  { %p3340_p2 = pnand %p3339_p1, %p3333_p13 }
 0x181   :  { %3343 = shalt.err (!%p3340_p2)  }
 0x182   :  { %335 = dma.hbm_to_vmem [thread:$0]  %s322_s13, 16, %s4223_s14, [#allocation3 + $0x1a] }
 0x183   :  { %s338_s20 = scalar_select %p337_p9, %s4233_s19, 0 }
 0x184   :  { %p2391_p3 = scmp.lt.s32.totalorder %s4233_s19, 999  ;;  %p357_p6 = scmp.gt.s32.totalorder %s4236_s1, 0 }
 0x185   :  { %p2398_p7 = scmp.lt.s32.totalorder %s4236_s1, 999  ;;  %s4292_s30 = sld [smem:[#allocation7 + $0x80]] }
 0x186   :  { %s4963_s20 = smov (!%p2391_p3, %s338_s20), 999 }
 0x187   :  { %s358_s8 = scalar_select %p357_p6, %s4236_s1, 0 }
 0x188   :  { %s2396_s24 = sshll.u32 %s4963_s20, 4 }
 0x189   :  { %s342_s11 = scalar_lea.hbm %s4909_s3, %s2396_s24 }
 0x18a   :  { %s3344_s29 = scalar_lea.hbm %s342_s11, 16  ;;  %p3347_p9 = scmp.lt.u32.totalorder %s342_s11, %s4909_s3 }
 0x18b   :  { %p3345_p8 = scmp.ne.s32.totalorder %s342_s11, %s3344_s29  ;;  %p3348_p11 = scmp.lt.u32.totalorder %s3970_s27, %s3344_s29 }
 0x18c   :  { %p3350_p5 = scmp.lt.u32.totalorder %s3344_s29, %s342_s11 }
 0x18d   :  { %p3349_p10 = por %p3348_p11, %p3347_p9 }
 0x18f   :  { %p3351_p12 = por %p3350_p5, %p3349_p10 }
 0x191   :  { %p3352_p13 = pnand %p3351_p12, %p3345_p8 }
 0x193   :  { %3355 = shalt.err (!%p3352_p13)  }
 0x194   :  { %s3356_s19 = scalar_lea.vmem %s4241_s21, 16  ;;  %p3361_p0 = scmp.lt.s32.totalorder %s4241_s21, %s3953_s12 }
 0x195   :  { %p3357_p4 = scmp.ne.s32.totalorder %s4241_s21, %s3356_s19  ;;  %p3362_p1 = scmp.lt.s32.totalorder %s3979_s0, %s3356_s19 }
 0x197   :  { %p3363_p2 = por %p3362_p1, %p3361_p0 }
 0x199   :  { %p3364_p3 = pnand %p3363_p2, %p3357_p4 }
 0x19b   :  { %3367 = shalt.err (!%p3364_p3)  }
 0x19c   :  { %355 = dma.hbm_to_vmem [thread:$0]  %s342_s11, 16, %s4241_s21, [#allocation3 + $0x1c] }
 0x19d   :  { %s4965_s8 = smov (!%p2398_p7, %s358_s8), 999  ;;  %s3887_s7 = smov [#allocation2 + $0x1]  }
 0x19e   :  { %s392_s2 = sshll.u32 %s3887_s7, 4  ;;  %s4309_s23 = sld [smem:[#allocation9 + $0x80]]  ;;  %s4311_s2 = int_to_ptr.vmem [resolvable:$true] %s392_s2 }
 0x19f   :  { %s2403_s25 = sshll.u32 %s4965_s8, 4  ;;  %p377_p6 = scmp.gt.s32.totalorder %s4292_s30, 0 }
 0x1a0   :  { %s362_s26 = scalar_lea.hbm %s4909_s3, %s2403_s25 }
 0x1a1   :  { %s3368_s28 = scalar_lea.hbm %s362_s26, 16  ;;  %p3371_p9 = scmp.lt.u32.totalorder %s362_s26, %s4909_s3 }
 0x1a2   :  { %p3369_p8 = scmp.ne.s32.totalorder %s362_s26, %s3368_s28  ;;  %p3372_p11 = scmp.lt.u32.totalorder %s3970_s27, %s3368_s28 }
 0x1a3   :  { %p3374_p10 = scmp.lt.u32.totalorder %s3368_s28, %s362_s26 }
 0x1a4   :  { %p3373_p7 = por %p3372_p11, %p3371_p9 }
 0x1a6   :  { %p3375_p5 = por %p3374_p10, %p3373_p7 }
 0x1a8   :  { %p3376_p12 = pnand %p3375_p5, %p3369_p8 }
 0x1aa   :  { %3379 = shalt.err (!%p3376_p12)  }
 0x1ab   :  { %s3380_s21 = scalar_lea.vmem %s4289_s17, 16  ;;  %p3385_p4 = scmp.lt.s32.totalorder %s4289_s17, %s3953_s12 }
 0x1ac   :  { %p3381_p13 = scmp.ne.s32.totalorder %s4289_s17, %s3380_s21  ;;  %p3386_p0 = scmp.lt.s32.totalorder %s3979_s0, %s3380_s21 }
 0x1ae   :  { %p3387_p1 = por %p3386_p0, %p3385_p4 }
 0x1b0   :  { %p3388_p2 = pnand %p3387_p1, %p3381_p13 }
 0x1b2   :  { %3391 = shalt.err (!%p3388_p2)  }
 0x1b3   :  { %375 = dma.hbm_to_vmem [thread:$0]  %s362_s26, 16, %s4289_s17, [#allocation3 + $0x1e] }
 0x1b4   :  { %s378_s1 = scalar_select %p377_p6, %s4292_s30, 0 }
 0x1b5   :  { %p2405_p3 = scmp.lt.s32.totalorder %s4292_s30, 999  ;;  %p397_p8 = scmp.gt.s32.totalorder %s4309_s23, 0 }
 0x1b6   :  { %p2412_p9 = scmp.lt.s32.totalorder %s4309_s23, 999  ;;  %s3888_s8 = smov [#allocation2 + $0x3]  }
 0x1b7   :  { %s4967_s1 = smov (!%p2405_p3, %s378_s1), 999  ;;  %s412_s24 = sshll.u32 %s3888_s8, 4  ;;  %s4337_s24 = int_to_ptr.vmem [resolvable:$true] %s412_s24 }
 0x1b8   :  { %s398_s4 = scalar_select %p397_p8, %s4309_s23, 0 }
 0x1b9   :  { %s2410_s20 = sshll.u32 %s4967_s1, 4 }
 0x1ba   :  { %s382_s11 = scalar_lea.hbm %s4909_s3, %s2410_s20 }
 0x1bb   :  { %s3392_s29 = scalar_lea.hbm %s382_s11, 16  ;;  %p3395_p6 = scmp.lt.u32.totalorder %s382_s11, %s4909_s3 }
 0x1bc   :  { %p3393_p11 = scmp.ne.s32.totalorder %s382_s11, %s3392_s29  ;;  %p3396_p7 = scmp.lt.u32.totalorder %s3970_s27, %s3392_s29 }
 0x1bd   :  { %p3398_p5 = scmp.lt.u32.totalorder %s3392_s29, %s382_s11 }
 0x1be   :  { %p3397_p10 = por %p3396_p7, %p3395_p6 }
 0x1c0   :  { %p3399_p12 = por %p3398_p5, %p3397_p10 }
 0x1c2   :  { %p3400_p13 = pnand %p3399_p12, %p3393_p11 }
 0x1c4   :  { %3403 = shalt.err (!%p3400_p13)  }
 0x1c5   :  { %s3404_s30 = scalar_lea.vmem %s4311_s2, 16  ;;  %p3409_p0 = scmp.lt.s32.totalorder %s4311_s2, %s3953_s12 }
 0x1c6   :  { %p3405_p4 = scmp.ne.s32.totalorder %s4311_s2, %s3404_s30  ;;  %p3410_p1 = scmp.lt.s32.totalorder %s3979_s0, %s3404_s30 }
 0x1c8   :  { %p3411_p2 = por %p3410_p1, %p3409_p0 }
 0x1ca   :  { %p3412_p3 = pnand %p3411_p2, %p3405_p4 }
 0x1cc   :  { %3415 = shalt.err (!%p3412_p3)  }
 0x1cd   :  { %395 = dma.hbm_to_vmem [thread:$0]  %s382_s11, 16, %s4311_s2, [#allocation3 + $0x1] }
 0x1ce   :  { %s4969_s4 = smov (!%p2412_p9, %s398_s4), 999  ;;  %s4351_s14 = sld [smem:[#allocation7 + $0x81]] }
 0x1cf   :  { %s2417_s19 = sshll.u32 %s4969_s4, 4  ;;  %s3889_s7 = smov [#allocation2 + $0x5]  }
 0x1d0   :  { %s432_s25 = sshll.u32 %s3889_s7, 4  ;;  %s402_s26 = scalar_lea.hbm %s4909_s3, %s2417_s19  ;;  %s4356_s25 = int_to_ptr.vmem [resolvable:$true] %s432_s25 }
 0x1d1   :  { %s3416_s28 = scalar_lea.hbm %s402_s26, 16  ;;  %p3419_p11 = scmp.lt.u32.totalorder %s402_s26, %s4909_s3 }
 0x1d2   :  { %p3417_p8 = scmp.ne.s32.totalorder %s402_s26, %s3416_s28  ;;  %p3420_p6 = scmp.lt.u32.totalorder %s3970_s27, %s3416_s28 }
 0x1d3   :  { %p3422_p9 = scmp.lt.u32.totalorder %s3416_s28, %s402_s26 }
 0x1d4   :  { %p3421_p7 = por %p3420_p6, %p3419_p11 }
 0x1d6   :  { %p3423_p10 = por %p3422_p9, %p3421_p7 }
 0x1d8   :  { %p3424_p5 = pnand %p3423_p10, %p3417_p8 }
 0x1da   :  { %3427 = shalt.err (!%p3424_p5)  }
 0x1db   :  { %s3428_s2 = scalar_lea.vmem %s4337_s24, 16  ;;  %p3433_p13 = scmp.lt.s32.totalorder %s4337_s24, %s3953_s12 }
 0x1dc   :  { %p3429_p12 = scmp.ne.s32.totalorder %s4337_s24, %s3428_s2  ;;  %p3434_p4 = scmp.lt.s32.totalorder %s3979_s0, %s3428_s2 }
 0x1de   :  { %p3435_p0 = por %p3434_p4, %p3433_p13 }
 0x1e0   :  { %p3436_p1 = pnand %p3435_p0, %p3429_p12 }
 0x1e2   :  { %3439 = shalt.err (!%p3436_p1)  }
 0x1e3   :  { %415 = dma.hbm_to_vmem [thread:$0]  %s402_s26, 16, %s4337_s24, [#allocation3 + $0x3] }
 0x1e4   :  { %s4368_s23 = sld [smem:[#allocation9 + $0x81]]  ;;  %s3890_s21 = smov [#allocation2 + $0x7]  }
 0x1e5   :  { %s452_s1 = sshll.u32 %s3890_s21, 4  ;;  %s4370_s4 = sld [smem:[#allocation7 + $0x82]]  ;;  %s4374_s1 = int_to_ptr.vmem [resolvable:$true] %s452_s1 }
 0x1e6   :  { %p417_p2 = scmp.gt.s32.totalorder %s4351_s14, 0  ;;  %p2419_p3 = scmp.lt.s32.totalorder %s4351_s14, 999 }
 0x1e7   :  { %s3891_s20 = smov [#allocation2 + $0x9]   ;;  %s4379_s24 = sld [smem:[#allocation9 + $0x82]] }
 0x1e8   :  { %s4971_s14 = smov (!%p417_p2, %s4351_s14), 0  ;;  %s4377_s8 = sshll.u32 %s3891_s20, 4  ;;  %s4409_s8 = int_to_ptr.vmem [resolvable:$true] %s4377_s8 }
 0x1e9   :  { %s4973_s14 = smov (!%p2419_p3, %s4971_s14), 999 }
 0x1ea   :  { %p437_p8 = scmp.gt.s32.totalorder %s4368_s23, 0  ;;  %s2424_s10 = sshll.u32 %s4973_s14, 4 }
 0x1eb   :  { %p457_p6 = scmp.gt.s32.totalorder %s4370_s4, 0  ;;  %s422_s29 = scalar_lea.hbm %s4909_s3, %s2424_s10 }
 0x1ec   :  { %s3440_s22 = scalar_lea.hbm %s422_s29, 16  ;;  %p3443_p10 = scmp.lt.u32.totalorder %s422_s29, %s4909_s3 }
 0x1ed   :  { %p3441_p9 = scmp.ne.s32.totalorder %s422_s29, %s3440_s22  ;;  %p3444_p5 = scmp.lt.u32.totalorder %s3970_s27, %s3440_s22 }
 0x1ee   :  { %p3446_p13 = scmp.lt.u32.totalorder %s3440_s22, %s422_s29 }
 0x1ef   :  { %p3445_p12 = por %p3444_p5, %p3443_p10 }
 0x1f1   :  { %p3447_p4 = por %p3446_p13, %p3445_p12 }
 0x1f3   :  { %p3448_p0 = pnand %p3447_p4, %p3441_p9 }
 0x1f5   :  { %3451 = shalt.err (!%p3448_p0)  }
 0x1f6   :  { %s3452_s14 = scalar_lea.vmem %s4356_s25, 16  ;;  %p3457_p2 = scmp.lt.s32.totalorder %s4356_s25, %s3953_s12 }
 0x1f7   :  { %p3453_p1 = scmp.ne.s32.totalorder %s4356_s25, %s3452_s14  ;;  %p3458_p3 = scmp.lt.s32.totalorder %s3979_s0, %s3452_s14 }
 0x1f9   :  { %p3459_p7 = por %p3458_p3, %p3457_p2 }
 0x1fb   :  { %p3460_p11 = pnand %p3459_p7, %p3453_p1 }
 0x1fd   :  { %3463 = shalt.err (!%p3460_p11)  }
 0x1fe   :  { %435 = dma.hbm_to_vmem [thread:$0]  %s422_s29, 16, %s4356_s25, [#allocation3 + $0x5] }
 0x1ff   :  { %s438_s19 = scalar_select %p437_p8, %s4368_s23, 0 }
 0x200   :  { %s458_s7 = scalar_select %p457_p6, %s4370_s4, 0 }
 0x201   :  { %p4918_p9 = scmp.lt.s32.totalorder %s4368_s23, 999  ;;  %p4919_p10 = scmp.lt.s32.totalorder %s4370_s4, 999 }
 0x203   :  { %s4975_s19 = smov (!%p4918_p9, %s438_s19), 999  ;;  %s4977_s7 = smov (!%p4919_p10, %s458_s7), 999 }
 0x204   :  { %s2431_s13 = sshll.u32 %s4975_s19, 4  ;;  %s2438_s9 = sshll.u32 %s4977_s7, 4 }
 0x205   :  { %s442_s28 = scalar_lea.hbm %s4909_s3, %s2431_s13 }
 0x206   :  { %s3464_s16 = scalar_lea.hbm %s442_s28, 16  ;;  %p3467_p8 = scmp.lt.u32.totalorder %s442_s28, %s4909_s3 }
 0x207   :  { %p3465_p11 = scmp.ne.s32.totalorder %s442_s28, %s3464_s16  ;;  %p3468_p7 = scmp.lt.u32.totalorder %s3970_s27, %s3464_s16 }
 0x208   :  { %p3470_p5 = scmp.lt.u32.totalorder %s3464_s16, %s442_s28 }
 0x209   :  { %p3469_p6 = por %p3468_p7, %p3467_p8 }
 0x20b   :  { %p3471_p12 = por %p3470_p5, %p3469_p6 }
 0x20d   :  { %p3472_p13 = pnand %p3471_p12, %p3465_p11 }
 0x20f   :  { %3475 = shalt.err (!%p3472_p13)  }
 0x210   :  { %s3476_s23 = scalar_lea.vmem %s4374_s1, 16  ;;  %p3481_p0 = scmp.lt.s32.totalorder %s4374_s1, %s3953_s12 }
 0x211   :  { %p3477_p4 = scmp.ne.s32.totalorder %s4374_s1, %s3476_s23  ;;  %p3482_p1 = scmp.lt.s32.totalorder %s3979_s0, %s3476_s23 }
 0x213   :  { %p3483_p2 = por %p3482_p1, %p3481_p0 }
 0x215   :  { %p3484_p3 = pnand %p3483_p2, %p3477_p4 }
 0x217   :  { %3487 = shalt.err (!%p3484_p3)  }
 0x218   :  { %455 = dma.hbm_to_vmem [thread:$0]  %s442_s28, 16, %s4374_s1, [#allocation3 + $0x7] }
 0x219   :  { %s462_s20 = scalar_lea.hbm %s4909_s3, %s2438_s9  ;;  %p477_p9 = scmp.gt.s32.totalorder %s4379_s24, 0 }
 0x21a   :  { %s3488_s10 = scalar_lea.hbm %s462_s20, 16  ;;  %p3491_p11 = scmp.lt.u32.totalorder %s462_s20, %s4909_s3 }
 0x21b   :  { %p3489_p10 = scmp.ne.s32.totalorder %s462_s20, %s3488_s10  ;;  %p3492_p8 = scmp.lt.u32.totalorder %s3970_s27, %s3488_s10 }
 0x21c   :  { %p3494_p6 = scmp.lt.u32.totalorder %s3488_s10, %s462_s20 }
 0x21d   :  { %p3493_p7 = por %p3492_p8, %p3491_p11 }
 0x21f   :  { %p3495_p5 = por %p3494_p6, %p3493_p7 }
 0x221   :  { %p3496_p12 = pnand %p3495_p5, %p3489_p10 }
 0x223   :  { %3499 = shalt.err (!%p3496_p12)  }
 0x224   :  { %s3500_s1 = scalar_lea.vmem %s4409_s8, 16  ;;  %p3505_p4 = scmp.lt.s32.totalorder %s4409_s8, %s3953_s12 }
 0x225   :  { %p3501_p13 = scmp.ne.s32.totalorder %s4409_s8, %s3500_s1  ;;  %p3506_p0 = scmp.lt.s32.totalorder %s3979_s0, %s3500_s1 }
 0x227   :  { %p3507_p1 = por %p3506_p0, %p3505_p4 }
 0x229   :  { %p3508_p2 = pnand %p3507_p1, %p3501_p13 }
 0x22b   :  { %3511 = shalt.err (!%p3508_p2)  }
 0x22c   :  { %475 = dma.hbm_to_vmem [thread:$0]  %s462_s20, 16, %s4409_s8, [#allocation3 + $0x9] }
 0x22d   :  { %s478_s29 = scalar_select %p477_p9, %s4379_s24, 0 }
 0x22e   :  { %p2440_p3 = scmp.lt.s32.totalorder %s4379_s24, 999  ;;  %s3892_s22 = smov [#allocation2 + $0xb]  }
 0x22f   :  { %s492_s17 = sshll.u32 %s3892_s22, 4  ;;  %s4442_s30 = sld [smem:[#allocation7 + $0x83]]  ;;  %s493_s17 = int_to_ptr.vmem [resolvable:$true] %s492_s17 }
 0x230   :  { %s4979_s29 = smov (!%p2440_p3, %s478_s29), 999  ;;  %s3893_s19 = smov [#allocation2 + $0xd]  }
 0x231   :  { %s2445_s14 = sshll.u32 %s4979_s29, 4  ;;  %s512_s7 = sshll.u32 %s3893_s19, 4  ;;  %s4447_s7 = int_to_ptr.vmem [resolvable:$true] %s512_s7 }
 0x232   :  { %s482_s26 = scalar_lea.hbm %s4909_s3, %s2445_s14 }
 0x233   :  { %s3512_s8 = scalar_lea.hbm %s482_s26, 16  ;;  %p3515_p9 = scmp.lt.u32.totalorder %s482_s26, %s4909_s3 }
 0x234   :  { %p3513_p10 = scmp.ne.s32.totalorder %s482_s26, %s3512_s8  ;;  %p3516_p11 = scmp.lt.u32.totalorder %s3970_s27, %s3512_s8 }
 0x235   :  { %p3518_p7 = scmp.lt.u32.totalorder %s3512_s8, %s482_s26 }
 0x236   :  { %p3517_p8 = por %p3516_p11, %p3515_p9 }
 0x238   :  { %p3519_p6 = por %p3518_p7, %p3517_p8 }
 0x23a   :  { %p3520_p5 = pnand %p3519_p6, %p3513_p10 }
 0x23c   :  { %3523 = shalt.err (!%p3520_p5)  }
 0x23d   :  { %s3524_s24 = scalar_lea.vmem %s493_s17, 16  ;;  %p3529_p13 = scmp.lt.s32.totalorder %s493_s17, %s3953_s12 }
 0x23e   :  { %p3525_p12 = scmp.ne.s32.totalorder %s493_s17, %s3524_s24  ;;  %p3530_p4 = scmp.lt.s32.totalorder %s3979_s0, %s3524_s24 }
 0x240   :  { %p3531_p0 = por %p3530_p4, %p3529_p13 }
 0x242   :  { %p3532_p1 = pnand %p3531_p0, %p3525_p12 }
 0x244   :  { %3535 = shalt.err (!%p3532_p1)  }
 0x245   :  { %495 = dma.hbm_to_vmem [thread:$0]  %s482_s26, 16, %s493_s17, [#allocation3 + $0xb] }
 0x246   :  { %p497_p2 = scmp.gt.s32.totalorder %s4442_s30, 0  ;;  %p2447_p3 = scmp.lt.s32.totalorder %s4442_s30, 999 }
 0x247   :  { %s4457_s16 = sld [smem:[#allocation9 + $0x83]]  ;;  %s3894_s2 = smov [#allocation2 + $0xf]  }
 0x248   :  { %s4981_s30 = smov (!%p497_p2, %s4442_s30), 0  ;;  %s532_s25 = sshll.u32 %s3894_s2, 4  ;;  %s4462_s25 = int_to_ptr.vmem [resolvable:$true] %s532_s25 }
 0x249   :  { %s4460_s23 = sld [smem:[#allocation7 + $0x84]]  ;;  %s4983_s30 = smov (!%p2447_p3, %s4981_s30), 999 }
 0x24a   :  { %s2452_s21 = sshll.u32 %s4983_s30, 4  ;;  %s3895_s4 = smov [#allocation2 + $0x11]  }
 0x24b   :  { %s552_s20 = sshll.u32 %s3895_s4, 4  ;;  %s502_s11 = scalar_lea.hbm %s4909_s3, %s2452_s21  ;;  %s4484_s20 = int_to_ptr.vmem [resolvable:$true] %s552_s20 }
 0x24c   :  { %s3536_s1 = scalar_lea.hbm %s502_s11, 16  ;;  %p3539_p11 = scmp.lt.u32.totalorder %s502_s11, %s4909_s3 }
 0x24d   :  { %p517_p10 = scmp.gt.s32.totalorder %s4457_s16, 0  ;;  %p3537_p9 = scmp.ne.s32.totalorder %s502_s11, %s3536_s1 }
 0x24e   :  { %p3540_p8 = scmp.lt.u32.totalorder %s3970_s27, %s3536_s1  ;;  %p3542_p6 = scmp.lt.u32.totalorder %s3536_s1, %s502_s11 }
 0x250   :  { %p3541_p7 = por %p3540_p8, %p3539_p11 }
 0x252   :  { %p3543_p5 = por %p3542_p6, %p3541_p7 }
 0x254   :  { %p3544_p12 = pnand %p3543_p5, %p3537_p9 }
 0x256   :  { %3547 = shalt.err (!%p3544_p12)  }
 0x257   :  { %s3548_s17 = scalar_lea.vmem %s4447_s7, 16  ;;  %p3553_p4 = scmp.lt.s32.totalorder %s4447_s7, %s3953_s12 }
 0x258   :  { %p3549_p13 = scmp.ne.s32.totalorder %s4447_s7, %s3548_s17  ;;  %p3554_p0 = scmp.lt.s32.totalorder %s3979_s0, %s3548_s17 }
 0x25a   :  { %p3555_p1 = por %p3554_p0, %p3553_p4 }
 0x25c   :  { %p3556_p2 = pnand %p3555_p1, %p3549_p13 }
 0x25e   :  { %3559 = shalt.err (!%p3556_p2)  }
 0x25f   :  { %515 = dma.hbm_to_vmem [thread:$0]  %s502_s11, 16, %s4447_s7, [#allocation3 + $0xd] }
 0x260   :  { %s518_s30 = scalar_select %p517_p10, %s4457_s16, 0 }
 0x261   :  { %p2454_p3 = scmp.lt.s32.totalorder %s4457_s16, 999  ;;  %p537_p9 = scmp.gt.s32.totalorder %s4460_s23, 0 }
 0x262   :  { %p2461_p11 = scmp.lt.s32.totalorder %s4460_s23, 999  ;;  %s4487_s13 = sld [smem:[#allocation9 + $0x84]] }
 0x263   :  { %s4985_s30 = smov (!%p2454_p3, %s518_s30), 999 }
 0x264   :  { %s538_s14 = scalar_select %p537_p9, %s4460_s23, 0 }
 0x265   :  { %s2459_s19 = sshll.u32 %s4985_s30, 4 }
 0x266   :  { %s522_s8 = scalar_lea.hbm %s4909_s3, %s2459_s19 }
 0x267   :  { %s3560_s28 = scalar_lea.hbm %s522_s8, 16  ;;  %p3563_p10 = scmp.lt.u32.totalorder %s522_s8, %s4909_s3 }
 0x268   :  { %p3561_p8 = scmp.ne.s32.totalorder %s522_s8, %s3560_s28  ;;  %p3564_p7 = scmp.lt.u32.totalorder %s3970_s27, %s3560_s28 }
 0x269   :  { %p3566_p5 = scmp.lt.u32.totalorder %s3560_s28, %s522_s8 }
 0x26a   :  { %p3565_p6 = por %p3564_p7, %p3563_p10 }
 0x26c   :  { %p3567_p12 = por %p3566_p5, %p3565_p6 }
 0x26e   :  { %p3568_p13 = pnand %p3567_p12, %p3561_p8 }
 0x270   :  { %3571 = shalt.err (!%p3568_p13)  }
 0x271   :  { %s3572_s24 = scalar_lea.vmem %s4462_s25, 16  ;;  %p3577_p0 = scmp.lt.s32.totalorder %s4462_s25, %s3953_s12 }
 0x272   :  { %p3573_p4 = scmp.ne.s32.totalorder %s4462_s25, %s3572_s24  ;;  %p3578_p1 = scmp.lt.s32.totalorder %s3979_s0, %s3572_s24 }
 0x274   :  { %p3579_p2 = por %p3578_p1, %p3577_p0 }
 0x276   :  { %p3580_p3 = pnand %p3579_p2, %p3573_p4 }
 0x278   :  { %3583 = shalt.err (!%p3580_p3)  }
 0x279   :  { %535 = dma.hbm_to_vmem [thread:$0]  %s522_s8, 16, %s4462_s25, [#allocation3 + $0xf] }
 0x27a   :  { %s4987_s14 = smov (!%p2461_p11, %s538_s14), 999  ;;  %s3896_s16 = smov [#allocation2 + $0x13]  }
 0x27b   :  { %s572_s2 = sshll.u32 %s3896_s16, 4  ;;  %s4504_s21 = sld [smem:[#allocation7 + $0x85]]  ;;  %s4506_s2 = int_to_ptr.vmem [resolvable:$true] %s572_s2 }
 0x27c   :  { %s2466_s4 = sshll.u32 %s4987_s14, 4  ;;  %p557_p9 = scmp.gt.s32.totalorder %s4487_s13, 0 }
 0x27d   :  { %s542_s11 = scalar_lea.hbm %s4909_s3, %s2466_s4 }
 0x27e   :  { %s3584_s1 = scalar_lea.hbm %s542_s11, 16  ;;  %p3587_p10 = scmp.lt.u32.totalorder %s542_s11, %s4909_s3 }
 0x27f   :  { %p3585_p8 = scmp.ne.s32.totalorder %s542_s11, %s3584_s1  ;;  %p3588_p7 = scmp.lt.u32.totalorder %s3970_s27, %s3584_s1 }
 0x280   :  { %p3590_p6 = scmp.lt.u32.totalorder %s3584_s1, %s542_s11 }
 0x281   :  { %p3589_p11 = por %p3588_p7, %p3587_p10 }
 0x283   :  { %p3591_p5 = por %p3590_p6, %p3589_p11 }
 0x285   :  { %p3592_p12 = pnand %p3591_p5, %p3585_p8 }
 0x287   :  { %3595 = shalt.err (!%p3592_p12)  }
 0x288   :  { %s3596_s25 = scalar_lea.vmem %s4484_s20, 16  ;;  %p3601_p4 = scmp.lt.s32.totalorder %s4484_s20, %s3953_s12 }
 0x289   :  { %p3597_p13 = scmp.ne.s32.totalorder %s4484_s20, %s3596_s25  ;;  %p3602_p0 = scmp.lt.s32.totalorder %s3979_s0, %s3596_s25 }
 0x28b   :  { %p3603_p1 = por %p3602_p0, %p3601_p4 }
 0x28d   :  { %p3604_p2 = pnand %p3603_p1, %p3597_p13 }
 0x28f   :  { %3607 = shalt.err (!%p3604_p2)  }
 0x290   :  { %555 = dma.hbm_to_vmem [thread:$0]  %s542_s11, 16, %s4484_s20, [#allocation3 + $0x11] }
 0x291   :  { %s558_s23 = scalar_select %p557_p9, %s4487_s13, 0 }
 0x292   :  { %p2468_p3 = scmp.lt.s32.totalorder %s4487_s13, 999  ;;  %p577_p8 = scmp.gt.s32.totalorder %s4504_s21, 0 }
 0x293   :  { %p2475_p10 = scmp.lt.s32.totalorder %s4504_s21, 999  ;;  %s3897_s14 = smov [#allocation2 + $0x15]  }
 0x294   :  { %s4989_s23 = smov (!%p2468_p3, %s558_s23), 999  ;;  %s592_s19 = sshll.u32 %s3897_s14, 4  ;;  %s4532_s19 = int_to_ptr.vmem [resolvable:$true] %s592_s19 }
 0x295   :  { %s578_s17 = scalar_select %p577_p8, %s4504_s21, 0 }
 0x296   :  { %s2473_s30 = sshll.u32 %s4989_s23, 4 }
 0x297   :  { %s562_s8 = scalar_lea.hbm %s4909_s3, %s2473_s30 }
 0x298   :  { %s3608_s28 = scalar_lea.hbm %s562_s8, 16  ;;  %p3611_p9 = scmp.lt.u32.totalorder %s562_s8, %s4909_s3 }
 0x299   :  { %p3609_p7 = scmp.ne.s32.totalorder %s562_s8, %s3608_s28  ;;  %p3612_p11 = scmp.lt.u32.totalorder %s3970_s27, %s3608_s28 }
 0x29a   :  { %p3614_p5 = scmp.lt.u32.totalorder %s3608_s28, %s562_s8 }
 0x29b   :  { %p3613_p6 = por %p3612_p11, %p3611_p9 }
 0x29d   :  { %p3615_p12 = por %p3614_p5, %p3613_p6 }
 0x29f   :  { %p3616_p13 = pnand %p3615_p12, %p3609_p7 }
 0x2a1   :  { %3619 = shalt.err (!%p3616_p13)  }
 0x2a2   :  { %s3620_s13 = scalar_lea.vmem %s4506_s2, 16  ;;  %p3625_p0 = scmp.lt.s32.totalorder %s4506_s2, %s3953_s12 }
 0x2a3   :  { %p3621_p4 = scmp.ne.s32.totalorder %s4506_s2, %s3620_s13  ;;  %p3626_p1 = scmp.lt.s32.totalorder %s3979_s0, %s3620_s13 }
 0x2a5   :  { %p3627_p2 = por %p3626_p1, %p3625_p0 }
 0x2a7   :  { %p3628_p3 = pnand %p3627_p2, %p3621_p4 }
 0x2a9   :  { %3631 = shalt.err (!%p3628_p3)  }
 0x2aa   :  { %575 = dma.hbm_to_vmem [thread:$0]  %s562_s8, 16, %s4506_s2, [#allocation3 + $0x13] }
 0x2ab   :  { %s4991_s17 = smov (!%p2475_p10, %s578_s17), 999  ;;  %s4546_s7 = sld [smem:[#allocation9 + $0x85]] }
 0x2ac   :  { %s2480_s24 = sshll.u32 %s4991_s17, 4  ;;  %s3898_s16 = smov [#allocation2 + $0x17]  }
 0x2ad   :  { %s612_s4 = sshll.u32 %s3898_s16, 4  ;;  %s582_s11 = scalar_lea.hbm %s4909_s3, %s2480_s24  ;;  %s4551_s4 = int_to_ptr.vmem [resolvable:$true] %s612_s4 }
 0x2ae   :  { %s3632_s1 = scalar_lea.hbm %s582_s11, 16  ;;  %p3635_p7 = scmp.lt.u32.totalorder %s582_s11, %s4909_s3 }
 0x2af   :  { %p3633_p8 = scmp.ne.s32.totalorder %s582_s11, %s3632_s1  ;;  %p3636_p9 = scmp.lt.u32.totalorder %s3970_s27, %s3632_s1 }
 0x2b0   :  { %p3638_p10 = scmp.lt.u32.totalorder %s3632_s1, %s582_s11 }
 0x2b1   :  { %p3637_p11 = por %p3636_p9, %p3635_p7 }
 0x2b3   :  { %p3639_p6 = por %p3638_p10, %p3637_p11 }
 0x2b5   :  { %p3640_p5 = pnand %p3639_p6, %p3633_p8 }
 0x2b7   :  { %3643 = shalt.err (!%p3640_p5)  }
 0x2b8   :  { %s3644_s2 = scalar_lea.vmem %s4532_s19, 16  ;;  %p3649_p13 = scmp.lt.s32.totalorder %s4532_s19, %s3953_s12 }
 0x2b9   :  { %p3645_p12 = scmp.ne.s32.totalorder %s4532_s19, %s3644_s2  ;;  %p3650_p4 = scmp.lt.s32.totalorder %s3979_s0, %s3644_s2 }
 0x2bb   :  { %p3651_p0 = por %p3650_p4, %p3649_p13 }
 0x2bd   :  { %p3652_p1 = pnand %p3651_p0, %p3645_p12 }
 0x2bf   :  { %3655 = shalt.err (!%p3652_p1)  }
 0x2c0   :  { %595 = dma.hbm_to_vmem [thread:$0]  %s582_s11, 16, %s4532_s19, [#allocation3 + $0x15] }
 0x2c1   :  { %s4563_s21 = sld [smem:[#allocation7 + $0x86]]  ;;  %s3899_s25 = smov [#allocation2 + $0x19]  }
 0x2c2   :  { %s632_s23 = sshll.u32 %s3899_s25, 4  ;;  %s4565_s17 = sld [smem:[#allocation9 + $0x86]]  ;;  %s4569_s23 = int_to_ptr.vmem [resolvable:$true] %s632_s23 }
 0x2c3   :  { %p597_p2 = scmp.gt.s32.totalorder %s4546_s7, 0  ;;  %p2482_p3 = scmp.lt.s32.totalorder %s4546_s7, 999 }
 0x2c4   :  { %s3900_s30 = smov [#allocation2 + $0x1b]   ;;  %s4574_s19 = sld [smem:[#allocation7 + $0x87]] }
 0x2c5   :  { %s4993_s7 = smov (!%p597_p2, %s4546_s7), 0  ;;  %s4572_s14 = sshll.u32 %s3900_s30, 4  ;;  %s4604_s14 = int_to_ptr.vmem [resolvable:$true] %s4572_s14 }
 0x2c6   :  { %s4995_s7 = smov (!%p2482_p3, %s4993_s7), 999 }
 0x2c7   :  { %p617_p8 = scmp.gt.s32.totalorder %s4563_s21, 0  ;;  %s2487_s15 = sshll.u32 %s4995_s7, 4 }
 0x2c8   :  { %p637_p9 = scmp.gt.s32.totalorder %s4565_s17, 0  ;;  %s602_s28 = scalar_lea.hbm %s4909_s3, %s2487_s15 }
 0x2c9   :  { %s3656_s9 = scalar_lea.hbm %s602_s28, 16  ;;  %p3659_p6 = scmp.lt.u32.totalorder %s602_s28, %s4909_s3 }
 0x2ca   :  { %p3657_p10 = scmp.ne.s32.totalorder %s602_s28, %s3656_s9  ;;  %p3660_p5 = scmp.lt.u32.totalorder %s3970_s27, %s3656_s9 }
 0x2cb   :  { %p3662_p13 = scmp.lt.u32.totalorder %s3656_s9, %s602_s28 }
 0x2cc   :  { %p3661_p12 = por %p3660_p5, %p3659_p6 }
 0x2ce   :  { %p3663_p4 = por %p3662_p13, %p3661_p12 }
 0x2d0   :  { %p3664_p0 = pnand %p3663_p4, %p3657_p10 }
 0x2d2   :  { %3667 = shalt.err (!%p3664_p0)  }
 0x2d3   :  { %s3668_s7 = scalar_lea.vmem %s4551_s4, 16  ;;  %p3673_p2 = scmp.lt.s32.totalorder %s4551_s4, %s3953_s12 }
 0x2d4   :  { %p3669_p1 = scmp.ne.s32.totalorder %s4551_s4, %s3668_s7  ;;  %p3674_p3 = scmp.lt.s32.totalorder %s3979_s0, %s3668_s7 }
 0x2d6   :  { %p3675_p11 = por %p3674_p3, %p3673_p2 }
 0x2d8   :  { %p3676_p7 = pnand %p3675_p11, %p3669_p1 }
 0x2da   :  { %3679 = shalt.err (!%p3676_p7)  }
 0x2db   :  { %615 = dma.hbm_to_vmem [thread:$0]  %s602_s28, 16, %s4551_s4, [#allocation3 + $0x17] }
 0x2dc   :  { %s618_s24 = scalar_select %p617_p8, %s4563_s21, 0 }
 0x2dd   :  { %s638_s16 = scalar_select %p637_p9, %s4565_s17, 0 }
 0x2de   :  { %p4920_p10 = scmp.lt.s32.totalorder %s4563_s21, 999  ;;  %p4921_p6 = scmp.lt.s32.totalorder %s4565_s17, 999 }
 0x2e0   :  { %s4997_s24 = smov (!%p4920_p10, %s618_s24), 999  ;;  %s4999_s16 = smov (!%p4921_p6, %s638_s16), 999 }
 0x2e1   :  { %s2494_s10 = sshll.u32 %s4997_s24, 4  ;;  %s2501_s29 = sshll.u32 %s4999_s16, 4 }
 0x2e2   :  { %s622_s1 = scalar_lea.hbm %s4909_s3, %s2494_s10 }
 0x2e3   :  { %s3680_s22 = scalar_lea.hbm %s622_s1, 16  ;;  %p3683_p8 = scmp.lt.u32.totalorder %s622_s1, %s4909_s3 }
 0x2e4   :  { %p3681_p7 = scmp.ne.s32.totalorder %s622_s1, %s3680_s22  ;;  %p3684_p11 = scmp.lt.u32.totalorder %s3970_s27, %s3680_s22 }
 0x2e5   :  { %p3686_p5 = scmp.lt.u32.totalorder %s3680_s22, %s622_s1 }
 0x2e6   :  { %p3685_p9 = por %p3684_p11, %p3683_p8 }
 0x2e8   :  { %p3687_p12 = por %p3686_p5, %p3685_p9 }
 0x2ea   :  { %p3688_p13 = pnand %p3687_p12, %p3681_p7 }
 0x2ec   :  { %3691 = shalt.err (!%p3688_p13)  }
 0x2ed   :  { %s3692_s21 = scalar_lea.vmem %s4569_s23, 16  ;;  %p3697_p0 = scmp.lt.s32.totalorder %s4569_s23, %s3953_s12 }
 0x2ee   :  { %p3693_p4 = scmp.ne.s32.totalorder %s4569_s23, %s3692_s21  ;;  %p3698_p1 = scmp.lt.s32.totalorder %s3979_s0, %s3692_s21 }
 0x2f0   :  { %p3699_p2 = por %p3698_p1, %p3697_p0 }
 0x2f2   :  { %p3700_p3 = pnand %p3699_p2, %p3693_p4 }
 0x2f4   :  { %3703 = shalt.err (!%p3700_p3)  }
 0x2f5   :  { %635 = dma.hbm_to_vmem [thread:$0]  %s622_s1, 16, %s4569_s23, [#allocation3 + $0x19] }
 0x2f6   :  { %s642_s30 = scalar_lea.hbm %s4909_s3, %s2501_s29  ;;  %p657_p10 = scmp.gt.s32.totalorder %s4574_s19, 0 }
 0x2f7   :  { %s3704_s15 = scalar_lea.hbm %s642_s30, 16  ;;  %p3707_p7 = scmp.lt.u32.totalorder %s642_s30, %s4909_s3 }
 0x2f8   :  { %p3705_p6 = scmp.ne.s32.totalorder %s642_s30, %s3704_s15  ;;  %p3708_p8 = scmp.lt.u32.totalorder %s3970_s27, %s3704_s15 }
 0x2f9   :  { %p3710_p9 = scmp.lt.u32.totalorder %s3704_s15, %s642_s30 }
 0x2fa   :  { %p3709_p11 = por %p3708_p8, %p3707_p7 }
 0x2fc   :  { %p3711_p5 = por %p3710_p9, %p3709_p11 }
 0x2fe   :  { %p3712_p12 = pnand %p3711_p5, %p3705_p6 }
 0x300   :  { %3715 = shalt.err (!%p3712_p12)  }
 0x301   :  { %s3716_s23 = scalar_lea.vmem %s4604_s14, 16  ;;  %p3721_p4 = scmp.lt.s32.totalorder %s4604_s14, %s3953_s12 }
 0x302   :  { %p3717_p13 = scmp.ne.s32.totalorder %s4604_s14, %s3716_s23  ;;  %p3722_p0 = scmp.lt.s32.totalorder %s3979_s0, %s3716_s23 }
 0x304   :  { %p3723_p1 = por %p3722_p0, %p3721_p4 }
 0x306   :  { %p3724_p2 = pnand %p3723_p1, %p3717_p13 }
 0x308   :  { %3727 = shalt.err (!%p3724_p2)  }
 0x309   :  { %655 = dma.hbm_to_vmem [thread:$0]  %s642_s30, 16, %s4604_s14, [#allocation3 + $0x1b] }
 0x30a   :  { %s658_s28 = scalar_select %p657_p10, %s4574_s19, 0 }
 0x30b   :  { %p2503_p3 = scmp.lt.s32.totalorder %s4574_s19, 999  ;;  %s3901_s9 = smov [#allocation2 + $0x1d]  }
 0x30c   :  { %s672_s20 = sshll.u32 %s3901_s9, 4  ;;  %s4637_s13 = sld [smem:[#allocation9 + $0x87]]  ;;  %s673_s20 = int_to_ptr.vmem [resolvable:$true] %s672_s20 }
 0x30d   :  { %s5001_s28 = smov (!%p2503_p3, %s658_s28), 999  ;;  %s3902_s18 = smov [#allocation2 + $0x1f]  }
 0x30e   :  { %s2508_s7 = sshll.u32 %s5001_s28, 4  ;;  %s692_s11 = sshll.u32 %s3902_s18, 4  ;;  %s693_s11 = int_to_ptr.vmem [resolvable:$true] %s692_s11 }
 0x30f   :  { %s662_s10 = scalar_lea.hbm %s4909_s3, %s2508_s7 }
 0x310   :  { %s3728_s1 = scalar_lea.hbm %s662_s10, 16  ;;  %p3731_p10 = scmp.lt.u32.totalorder %s662_s10, %s4909_s3 }
 0x311   :  { %p3729_p6 = scmp.ne.s32.totalorder %s662_s10, %s3728_s1  ;;  %p3732_p7 = scmp.lt.u32.totalorder %s3970_s27, %s3728_s1 }
 0x312   :  { %p3734_p11 = scmp.lt.u32.totalorder %s3728_s1, %s662_s10 }
 0x313   :  { %p3733_p8 = por %p3732_p7, %p3731_p10 }
 0x315   :  { %p3735_p9 = por %p3734_p11, %p3733_p8 }
 0x317   :  { %p3736_p5 = pnand %p3735_p9, %p3729_p6 }
 0x319   :  { %3739 = shalt.err (!%p3736_p5)  }
 0x31a   :  { %s3740_s19 = scalar_lea.vmem %s673_s20, 16  ;;  %p3745_p13 = scmp.lt.s32.totalorder %s673_s20, %s3953_s12 }
 0x31b   :  { %p3741_p12 = scmp.ne.s32.totalorder %s673_s20, %s3740_s19  ;;  %p3746_p4 = scmp.lt.s32.totalorder %s3979_s0, %s3740_s19 }
 0x31d   :  { %p3747_p0 = por %p3746_p4, %p3745_p13 }
 0x31f   :  { %p3748_p1 = pnand %p3747_p0, %p3741_p12 }
 0x321   :  { %3751 = shalt.err (!%p3748_p1)  }
 0x322   :  { %675 = dma.hbm_to_vmem [thread:$0]  %s662_s10, 16, %s673_s20, [#allocation3 + $0x1d]  ;;  %v706_v7 = vshrl.u32 %v700_v0, 7 }
 0x323   :  { %p677_p2 = scmp.gt.s32.totalorder %s4637_s13, 0  ;;  %p2510_p3 = scmp.lt.s32.totalorder %s4637_s13, 999 }
 0x324   :  { %s4650_s22 = sld [smem:[#allocation4]]  ;;  %s2516_s2 = sld [smem:[#allocation4 + $0x1]]  ;;  %vm707_vm3 = vcmp.eq.s32.totalorder %v706_v7, 0  ;;  %vm713_vm4 = vcmp.eq.s32.totalorder %v706_v7, 1 }
 0x325   :  { %s5003_s13 = smov (!%p677_p2, %s4637_s13), 0 }
 0x326   :  { %s5005_s13 = smov (!%p2510_p3, %s5003_s13), 999 }
 0x327   :  { %s2515_s4 = sshll.u32 %s5005_s13, 4 }
 0x328   :  { %s682_s17 = scalar_lea.hbm %s4909_s3, %s2515_s4 }
 0x329   :  { %s3752_s30 = scalar_lea.hbm %s682_s17, 16  ;;  %p3755_p10 = scmp.lt.u32.totalorder %s682_s17, %s4909_s3 }
 0x32a   :  { %v709_v8 = vstv %s4650_s22  ;;  %v715_v9 = vstv %s2516_s2  ;;  %p3753_p6 = scmp.ne.s32.totalorder %s682_s17, %s3752_s30  ;;  %p3756_p7 = scmp.lt.u32.totalorder %s3970_s27, %s3752_s30 }
 0x32b   :  { %p3758_p11 = scmp.lt.u32.totalorder %s3752_s30, %s682_s17 }
 0x32c   :  { %p3757_p8 = por %p3756_p7, %p3755_p10 }
 0x32e   :  { %p3759_p9 = por %p3758_p11, %p3757_p8 }
 0x330   :  { %p3760_p5 = pnand %p3759_p9, %p3753_p6 }
 0x332   :  { %3763 = shalt.err (!%p3760_p5)  }
 0x333   :  { %s3764_s8 = scalar_lea.vmem %s693_s11, 16  ;;  %p3769_p13 = scmp.lt.s32.totalorder %s693_s11, %s3953_s12 }
 0x334   :  { %p3765_p12 = scmp.ne.s32.totalorder %s693_s11, %s3764_s8  ;;  %p3770_p4 = scmp.lt.s32.totalorder %s3979_s0, %s3764_s8 }
 0x336   :  { %p3771_p0 = por %p3770_p4, %p3769_p13 }
 0x338   :  { %p3772_p1 = pnand %p3771_p0, %p3765_p12 }
 0x33a   :  { %3775 = shalt.err (!%p3772_p1)  }
 0x33b   :  { %695 = dma.hbm_to_vmem [thread:$0]  %s682_s17, 16, %s693_s11, [#allocation3 + $0x1f]  ;;  %vm710_vm5 = vcmp.eq.s32.totalorder %v4239_v1, %v709_v8  ;;  %vm716_vm6 = vcmp.eq.s32.totalorder %v4239_v1, %v715_v9  ;;  %v3903_v10 = vmov 0.0  }
 0x33c   :  { %vm711_vm7 = vmand %vm707_vm3, %vm710_vm5 }
 0x33d   :  { %v4668_v11 = vsel %vm711_vm7, 1.0, %v3903_v10  ;;  %vm4671_vm8 = vmand %vm713_vm4, %vm716_vm6 }
 0x33e   :  { %v718_v13 = vsel %vm4671_vm8, 1.0, %v4668_v11 }
 0x33f   :  { %3802 = dma.done.wait [#allocation3], 16 }
 0x340   :  { %3803 = vsyncadd [#allocation3], 4294967280 }
 0x341   :  { %3804 = dma.done.wait [#allocation3 + $0x4], 16 }
 0x342   :  { %3805 = vsyncadd [#allocation3 + $0x4], 4294967280 }
 0x343   :  { %3806 = dma.done.wait [#allocation3 + $0x8], 16 }
 0x344   :  { %3807 = vsyncadd [#allocation3 + $0x8], 4294967280 }
 0x345   :  { %3808 = dma.done.wait [#allocation3 + $0xc], 16 }
 0x346   :  { %3809 = vsyncadd [#allocation3 + $0xc], 4294967280 }
 0x347   :  { %3810 = dma.done.wait [#allocation3 + $0x10], 16 }
 0x348   :  { %3811 = vsyncadd [#allocation3 + $0x10], 4294967280 }
 0x349   :  { %3812 = dma.done.wait [#allocation3 + $0x14], 16 }
 0x34a   :  { %3813 = vsyncadd [#allocation3 + $0x14], 4294967280 }
 0x34b   :  { %3814 = dma.done.wait [#allocation3 + $0x18], 16 }
 0x34c   :  { %3815 = vsyncadd [#allocation3 + $0x18], 4294967280 }
 0x34d   :  { %3816 = dma.done.wait [#allocation3 + $0x1c], 16 }
 0x34e   :  { %3817 = vsyncadd [#allocation3 + $0x1c], 4294967280 }
 0x34f   :  { %3818 = dma.done.wait [#allocation3 + $0x1], 16 }
 0x350   :  { %3819 = vsyncadd [#allocation3 + $0x1], 4294967280 }
 0x351   :  { %3820 = dma.done.wait [#allocation3 + $0x5], 16 }
 0x352   :  { %3821 = vsyncadd [#allocation3 + $0x5], 4294967280 }
 0x353   :  { %3822 = dma.done.wait [#allocation3 + $0x9], 16 }
 0x354   :  { %3823 = vsyncadd [#allocation3 + $0x9], 4294967280 }
 0x355   :  { %3824 = dma.done.wait [#allocation3 + $0xd], 16 }
 0x356   :  { %3825 = vsyncadd [#allocation3 + $0xd], 4294967280 }
 0x357   :  { %3826 = dma.done.wait [#allocation3 + $0x11], 16 }
 0x358   :  { %3827 = vsyncadd [#allocation3 + $0x11], 4294967280 }
 0x359   :  { %3828 = dma.done.wait [#allocation3 + $0x15], 16 }
 0x35a   :  { %3829 = vsyncadd [#allocation3 + $0x15], 4294967280 }
 0x35b   :  { %3830 = dma.done.wait [#allocation3 + $0x19], 16 }
 0x35c   :  { %3831 = vsyncadd [#allocation3 + $0x19], 4294967280 }
 0x35d   :  { %3832 = dma.done.wait [#allocation3 + $0x1d], 16 }
 0x35e   :  { %3833 = vsyncadd [#allocation3 + $0x1d], 4294967280 }
 0x35f   :  { %3834 = dma.done.wait [#allocation3 + $0x2], 16 }
 0x360   :  { %3835 = vsyncadd [#allocation3 + $0x2], 4294967280 }
 0x361   :  { %3836 = dma.done.wait [#allocation3 + $0x6], 16 }
 0x362   :  { %3837 = vsyncadd [#allocation3 + $0x6], 4294967280 }
 0x363   :  { %3838 = dma.done.wait [#allocation3 + $0xa], 16 }
 0x364   :  { %3839 = vsyncadd [#allocation3 + $0xa], 4294967280 }
 0x365   :  { %3840 = dma.done.wait [#allocation3 + $0xe], 16 }
 0x366   :  { %3841 = vsyncadd [#allocation3 + $0xe], 4294967280 }
 0x367   :  { %3842 = dma.done.wait [#allocation3 + $0x12], 16 }
 0x368   :  { %3843 = vsyncadd [#allocation3 + $0x12], 4294967280 }
 0x369   :  { %3844 = dma.done.wait [#allocation3 + $0x16], 16 }
 0x36a   :  { %3845 = vsyncadd [#allocation3 + $0x16], 4294967280 }
 0x36b   :  { %3846 = dma.done.wait [#allocation3 + $0x1a], 16 }
 0x36c   :  { %3847 = vsyncadd [#allocation3 + $0x1a], 4294967280 }
 0x36d   :  { %3848 = dma.done.wait [#allocation3 + $0x1e], 16 }
 0x36e   :  { %3849 = vsyncadd [#allocation3 + $0x1e], 4294967280 }
 0x36f   :  { %3850 = dma.done.wait [#allocation3 + $0x3], 16 }
 0x370   :  { %3851 = vsyncadd [#allocation3 + $0x3], 4294967280 }
 0x371   :  { %3852 = dma.done.wait [#allocation3 + $0x7], 16 }
 0x372   :  { %3853 = vsyncadd [#allocation3 + $0x7], 4294967280 }
 0x373   :  { %3854 = dma.done.wait [#allocation3 + $0xb], 16 }
 0x374   :  { %3855 = vsyncadd [#allocation3 + $0xb], 4294967280 }
 0x375   :  { %3856 = dma.done.wait [#allocation3 + $0xf], 16 }
 0x376   :  { %3857 = vsyncadd [#allocation3 + $0xf], 4294967280 }
 0x377   :  { %3858 = dma.done.wait [#allocation3 + $0x13], 16 }
 0x378   :  { %3859 = vsyncadd [#allocation3 + $0x13], 4294967280 }
 0x379   :  { %3860 = dma.done.wait [#allocation3 + $0x17], 16 }
 0x37a   :  { %3861 = vsyncadd [#allocation3 + $0x17], 4294967280 }
 0x37b   :  { %3862 = dma.done.wait [#allocation3 + $0x1b], 16 }
 0x37c   :  { %3863 = vsyncadd [#allocation3 + $0x1b], 4294967280  ;;  %v4680_v14 = vpack.c.bf16 %v4253_v3, %v4248_v2 }
 0x37d   :  { %3864 = dma.done.wait [#allocation3 + $0x1f], 16 }
 0x37e   :  { %3865 = vsyncadd [#allocation3 + $0x1f], 4294967280  ;;  %v3904_v15 = vmov 0.0|0.0   ;;  %vm3905_vm9 = vmmov 0   ;;  %v4688_v16 = vpack.c.bf16 %v4267_v5, %v4258_v4  ;;  %v784_v17 = vld [vmem:[#allocation2] sm:$0xf] }
 0x37f   :  { %2827 = vmatprep.subr.bf16.mxu0 %v3904_v15  ;;  %2698 = vmatprep.mubr.msk.f32.mxu0 %vm3905_vm9, %v3903_v10  ;;  %s3906_s3 = smov 64   ;;  %s3907_s12 = smov 32   ;;  %vm785_vm10 = vcmask 261120   ;;  %v883_v36 = vld [vmem:[#allocation2 + $0x4] sm:$0xf]  ;;  %v1585_v6 = vld [vmem:[%s4911_s5 + $0x10] sm:$0xff] }
 0x380   :  { %2829 = vmatpush3.bf16.msra.mxu0 %v4680_v14  ;;  %2833 = vmatprep.subr.bf16.mxu1 %v3904_v15  ;;  %v983_v55 = vld [vmem:[#allocation2 + $0x8] sm:$0xf]  ;;  %vm1678_vm11 = vcmask 64512   ;;  %s3908_s18 = smov [#allocation10]   ;;  %vm1989_vm12 = vcmask 9216  }
 0x381   :  { %2830 = vmatprep.subr.bf16.mxu0 %v3904_v15  ;;  %2835 = vmatpush3.bf16.msra.mxu1 %v4680_v14  ;;  %s1997_s11 = sshll.u32 %s3908_s18, 4  ;;  %s1998_s11 = int_to_ptr.vmem [resolvable:$true] %s1997_s11 }
 0x382   :  { %2836 = vmatprep.subr.bf16.mxu1 %v3904_v15  ;;  %2709 = vmatprep.mubr.msk.f32.mxu1 %vm3905_vm9, %v3903_v10  ;;  %s3776_s1 = scalar_lea.vmem %s1998_s11, 32  ;;  %p3781_p3 = scmp.lt.s32.totalorder %s1998_s11, %s1998_s11 }
 0x383   :  { %p3777_p2 = scmp.ne.s32.totalorder %s1998_s11, %s3776_s1  ;;  %p3782_p6 = scmp.lt.s32.totalorder %s3776_s1, %s3776_s1 }
 0x384   :  { %2832 = vmatpush3.bf16.msra.mxu0 %v4688_v16 }
 0x385   :  { %2838 = vmatpush3.bf16.msra.mxu1 %v4688_v16  ;;  %2839 = vmatprep.subr.bf16.mxu0 %v3904_v15  ;;  %p3783_p10 = por %p3782_p6, %p3781_p3 }
 0x386   :  { %2845 = vmatprep.subr.bf16.mxu1 %v3904_v15 }
 0x387   :  { %2699 = vmatmul.mubr.f32.vlgmr.msra.gmra.mrb[0].mxu0 %v3903_v10  ;;  %p3784_p7 = pnand %p3783_p10, %p3777_p2 }
 0x388   :  { %2841 = vmatpush3.bf16.msra.mxu0 %v4680_v14  ;;  %2720 = vmatprep.mubr.msk.f32.mxu0 %vm3905_vm9, %v3903_v10 }
 0x389   :  { %2842 = vmatprep.subr.bf16.mxu0 %v3904_v15 }
 0x38c   :  { %2844 = vmatpush3.bf16.msra.mxu0 %v4688_v16 }
 0x38d   :  { %2851 = vmatprep.subr.bf16.mxu0 %v3904_v15 }
 0x45a   :  { %v855_v18 = vpop.f32.mrb[0].mxu0 }
 0x45b   :  { %v859_v19 = vadd.f32 %v855_v18, %v784_v17  ;;  %v2700_v20 = vpop.f32.mrb[1].mxu0  ;;  %v1083_v18 = vld [vmem:[#allocation2 + $0xc] sm:$0xf] }
 0x45d   :  { %v860_v21 = vmul.f32 0.5, %v859_v19 }
 0x45f   :  { %v861_v22 = vsel %vm4269_vm2, %v859_v19, %v860_v21 }
 0x460   :  { %2940 = vtanh.f32 %v861_v22 }
 0x46a   :  { %v2941_v23 = vpop.eup %2940 }
 0x46b   :  { %v863_v24 = vmul.f32 0.5, %v2941_v23 }
 0x46d   :  { %v864_v25 = vadd.f32 0.5, %v863_v24 }
 0x46f   :  { %v865_v26 = vsel %vm4269_vm2, %v2941_v23, %v864_v25 }
 0x470   :  { %868 = vrot.lane.b32.xlu0 %v865_v26, %s3906_s3  ;;  %v866_v29 = vmul.f32 0.0, %v865_v26 }
 0x4e2   :  { %v869_v27 = vpop.permute.xlu0 %868 }
 0x4e3   :  { %v871_v28 = vmul.f32 %v869_v27, %v865_v26 }
 0x4e5   :  { %873 = vrot.lane.b32.xlu0 %v871_v28, %s3907_s12 }
 0x557   :  { %v874_v30 = vpop.permute.xlu0 %873 }
 0x558   :  { %v876_v31 = vadd.f32 %v874_v30, %v866_v29 }
 0x55a   :  { %2942 = vtanh.f32 %v876_v31 }
 0x564   :  { %v2943_v32 = vpop.eup %2942 }
 0x565   :  { %879 = vrot.lane.b32.xlu1 %v2943_v32, %s3906_s3 }
 0x5d7   :  { %v880_v33 = vpop.permute.xlu1 %879 }
 0x5d8   :  { %v882_v34 = vmul.f32 %v880_v33, %v865_v26 }
 0x5da   :  { %885 = vrot.lane.b32.xlu1 %v882_v34, %s3907_s12 }
 0x64c   :  { %v886_v35 = vpop.permute.xlu1 %885 }
 0x64d   :  { %2710 = vmatmul.mubr.msk.f32.vlgmr.msra.gmra.mrb[0].mxu1 %vm785_vm10, %v886_v35 }
 0x64e   :  { %2847 = vmatpush3.bf16.msra.mxu1 %v4680_v14  ;;  %2731 = vmatprep.mubr.msk.f32.mxu1 %vm3905_vm9, %v3903_v10 }
 0x64f   :  { %2848 = vmatprep.subr.bf16.mxu1 %v3904_v15 }
 0x652   :  { %2850 = vmatpush3.bf16.msra.mxu1 %v4688_v16 }
 0x653   :  { %2857 = vmatprep.subr.bf16.mxu1 %v3904_v15 }
 0x720   :  { %v955_v37 = vpop.f32.mrb[0].mxu1 }
 0x721   :  { %v959_v38 = vadd.f32 %v955_v37, %v883_v36  ;;  %v2711_v39 = vpop.f32.mrb[1].mxu1  ;;  %v1183_v37 = vld [vmem:[#allocation2 + $0x10] sm:$0xf] }
 0x723   :  { %v960_v40 = vmul.f32 0.5, %v959_v38 }
 0x725   :  { %v961_v41 = vsel %vm4269_vm2, %v959_v38, %v960_v40 }
 0x726   :  { %2944 = vtanh.f32 %v961_v41 }
 0x730   :  { %v2945_v42 = vpop.eup %2944 }
 0x731   :  { %v963_v43 = vmul.f32 0.5, %v2945_v42 }
 0x733   :  { %v964_v44 = vadd.f32 0.5, %v963_v43 }
 0x735   :  { %v965_v45 = vsel %vm4269_vm2, %v2945_v42, %v964_v44 }
 0x736   :  { %968 = vrot.lane.b32.xlu0 %v965_v45, %s3906_s3  ;;  %v966_v48 = vmul.f32 %v965_v45, %v876_v31 }
 0x7a8   :  { %v969_v46 = vpop.permute.xlu0 %968 }
 0x7a9   :  { %v971_v47 = vmul.f32 %v969_v46, %v965_v45 }
 0x7ab   :  { %973 = vrot.lane.b32.xlu1 %v971_v47, %s3907_s12 }
 0x81d   :  { %v974_v49 = vpop.permute.xlu1 %973 }
 0x81e   :  { %v976_v50 = vadd.f32 %v974_v49, %v966_v48 }
 0x820   :  { %2946 = vtanh.f32 %v976_v50 }
 0x82a   :  { %v2947_v51 = vpop.eup %2946 }
 0x82b   :  { %979 = vrot.lane.b32.xlu0 %v2947_v51, %s3906_s3 }
 0x89d   :  { %v980_v52 = vpop.permute.xlu0 %979 }
 0x89e   :  { %v982_v53 = vmul.f32 %v980_v52, %v965_v45 }
 0x8a0   :  { %985 = vrot.lane.b32.xlu1 %v982_v53, %s3907_s12 }
 0x912   :  { %v986_v54 = vpop.permute.xlu1 %985 }
 0x913   :  { %2721 = vmatmul.mubr.msk.f32.vlgmr.msra.gmra.mrb[2].mxu0 %vm785_vm10, %v986_v54 }
 0x914   :  { %2853 = vmatpush3.bf16.msra.mxu0 %v4680_v14  ;;  %2742 = vmatprep.mubr.msk.f32.mxu0 %vm3905_vm9, %v3903_v10 }
 0x915   :  { %2854 = vmatprep.subr.bf16.mxu0 %v3904_v15 }
 0x918   :  { %2856 = vmatpush3.bf16.msra.mxu0 %v4688_v16 }
 0x919   :  { %2863 = vmatprep.subr.bf16.mxu0 %v3904_v15 }
 0x9e6   :  { %v1055_v56 = vpop.f32.mrb[2].mxu0 }
 0x9e7   :  { %v1059_v57 = vadd.f32 %v1055_v56, %v983_v55  ;;  %v2722_v58 = vpop.f32.mrb[3].mxu0  ;;  %v1283_v56 = vld [vmem:[#allocation2 + $0x14] sm:$0xf] }
 0x9e9   :  { %v1060_v59 = vmul.f32 0.5, %v1059_v57 }
 0x9eb   :  { %v1061_v60 = vsel %vm4269_vm2, %v1059_v57, %v1060_v59 }
 0x9ec   :  { %2948 = vtanh.f32 %v1061_v60 }
 0x9f6   :  { %v2949_v61 = vpop.eup %2948 }
 0x9f7   :  { %v1063_v62 = vmul.f32 0.5, %v2949_v61 }
 0x9f9   :  { %v1064_v63 = vadd.f32 0.5, %v1063_v62 }
 0x9fb   :  { %v1065_v0 = vsel %vm4269_vm2, %v2949_v61, %v1064_v63 }
 0x9fc   :  { %1068 = vrot.lane.b32.xlu0 %v1065_v0, %s3906_s3  ;;  %v1066_v3 = vmul.f32 %v1065_v0, %v976_v50 }
 0xa6e   :  { %v1069_v1 = vpop.permute.xlu0 %1068 }
 0xa6f   :  { %v1071_v2 = vmul.f32 %v1069_v1, %v1065_v0 }
 0xa71   :  { %1073 = vrot.lane.b32.xlu1 %v1071_v2, %s3907_s12 }
 0xae3   :  { %v1074_v4 = vpop.permute.xlu1 %1073 }
 0xae4   :  { %v1076_v5 = vadd.f32 %v1074_v4, %v1066_v3 }
 0xae6   :  { %2950 = vtanh.f32 %v1076_v5 }
 0xaf0   :  { %v2951_v7 = vpop.eup %2950 }
 0xaf1   :  { %1079 = vrot.lane.b32.xlu0 %v2951_v7, %s3906_s3 }
 0xb63   :  { %v1080_v8 = vpop.permute.xlu0 %1079 }
 0xb64   :  { %v1082_v9 = vmul.f32 %v1080_v8, %v1065_v0 }
 0xb66   :  { %1085 = vrot.lane.b32.xlu1 %v1082_v9, %s3907_s12 }
 0xbd8   :  { %v1086_v17 = vpop.permute.xlu1 %1085 }
 0xbd9   :  { %2732 = vmatmul.mubr.msk.f32.vlgmr.msra.gmra.mrb[2].mxu1 %vm785_vm10, %v1086_v17  ;;  %v1383_v17 = vld [vmem:[#allocation2 + $0x18] sm:$0xf] }
 0xbda   :  { %2859 = vmatpush3.bf16.msra.mxu1 %v4680_v14  ;;  %2753 = vmatprep.mubr.msk.f32.mxu1 %vm3905_vm9, %v3903_v10 }
 0xbdb   :  { %2860 = vmatprep.subr.bf16.mxu1 %v3904_v15 }
 0xbde   :  { %2862 = vmatpush3.bf16.msra.mxu1 %v4688_v16 }
 0xbdf   :  { %2869 = vmatprep.subr.bf16.mxu1 %v3904_v15 }
 0xcac   :  { %v1155_v19 = vpop.f32.mrb[2].mxu1 }
 0xcad   :  { %v1159_v20 = vadd.f32 %v1155_v19, %v1083_v18  ;;  %v2733_v21 = vpop.f32.mrb[3].mxu1 }
 0xcaf   :  { %v1160_v22 = vmul.f32 0.5, %v1159_v20 }
 0xcb1   :  { %v1161_v23 = vsel %vm4269_vm2, %v1159_v20, %v1160_v22 }
 0xcb2   :  { %2952 = vtanh.f32 %v1161_v23 }
 0xcbc   :  { %v2953_v24 = vpop.eup %2952 }
 0xcbd   :  { %v1163_v25 = vmul.f32 0.5, %v2953_v24 }
 0xcbf   :  { %v1164_v26 = vadd.f32 0.5, %v1163_v25 }
 0xcc1   :  { %v1165_v27 = vsel %vm4269_vm2, %v2953_v24, %v1164_v26 }
 0xcc2   :  { %1168 = vrot.lane.b32.xlu0 %v1165_v27, %s3906_s3  ;;  %v1166_v30 = vmul.f32 %v1165_v27, %v1076_v5 }
 0xd34   :  { %v1169_v28 = vpop.permute.xlu0 %1168 }
 0xd35   :  { %v1171_v29 = vmul.f32 %v1169_v28, %v1165_v27 }
 0xd37   :  { %1173 = vrot.lane.b32.xlu1 %v1171_v29, %s3907_s12 }
 0xda9   :  { %v1174_v31 = vpop.permute.xlu1 %1173 }
 0xdaa   :  { %v1176_v32 = vadd.f32 %v1174_v31, %v1166_v30 }
 0xdac   :  { %2954 = vtanh.f32 %v1176_v32 }
 0xdb6   :  { %v2955_v33 = vpop.eup %2954 }
 0xdb7   :  { %1179 = vrot.lane.b32.xlu0 %v2955_v33, %s3906_s3 }
 0xe29   :  { %v1180_v34 = vpop.permute.xlu0 %1179 }
 0xe2a   :  { %v1182_v35 = vmul.f32 %v1180_v34, %v1165_v27 }
 0xe2c   :  { %1185 = vrot.lane.b32.xlu1 %v1182_v35, %s3907_s12 }
 0xe9e   :  { %v1186_v36 = vpop.permute.xlu1 %1185 }
 0xe9f   :  { %2743 = vmatmul.mubr.msk.f32.vlgmr.msra.gmra.mrb[4].mxu0 %vm785_vm10, %v1186_v36  ;;  %v1483_v36 = vld [vmem:[#allocation2 + $0x1c] sm:$0xf] }
 0xea0   :  { %2865 = vmatpush3.bf16.msra.mxu0 %v4680_v14  ;;  %2764 = vmatprep.mubr.msk.f32.mxu0 %vm3905_vm9, %v3903_v10 }
 0xea1   :  { %2866 = vmatprep.subr.bf16.mxu0 %v3904_v15 }
 0xea4   :  { %2868 = vmatpush3.bf16.msra.mxu0 %v4688_v16 }
 0xea5   :  { %2875 = vmatprep.subr.bf16.mxu0 %v3904_v15 }
 0xf72   :  { %v1255_v38 = vpop.f32.mrb[4].mxu0 }
 0xf73   :  { %v1259_v39 = vadd.f32 %v1255_v38, %v1183_v37  ;;  %v2744_v40 = vpop.f32.mrb[5].mxu0 }
 0xf75   :  { %v1260_v41 = vmul.f32 0.5, %v1259_v39 }
 0xf77   :  { %v1261_v42 = vsel %vm4269_vm2, %v1259_v39, %v1260_v41 }
 0xf78   :  { %2956 = vtanh.f32 %v1261_v42 }
 0xf82   :  { %v2957_v43 = vpop.eup %2956 }
 0xf83   :  { %v1263_v44 = vmul.f32 0.5, %v2957_v43 }
 0xf85   :  { %v1264_v45 = vadd.f32 0.5, %v1263_v44 }
 0xf87   :  { %v1265_v46 = vsel %vm4269_vm2, %v2957_v43, %v1264_v45 }
 0xf88   :  { %1268 = vrot.lane.b32.xlu0 %v1265_v46, %s3906_s3  ;;  %v1266_v49 = vmul.f32 %v1265_v46, %v1176_v32 }
 0xffa   :  { %v1269_v47 = vpop.permute.xlu0 %1268 }
 0xffb   :  { %v1271_v48 = vmul.f32 %v1269_v47, %v1265_v46 }
 0xffd   :  { %1273 = vrot.lane.b32.xlu1 %v1271_v48, %s3907_s12 }
0x106f   :  { %v1274_v50 = vpop.permute.xlu1 %1273 }
0x1070   :  { %v1276_v51 = vadd.f32 %v1274_v50, %v1266_v49 }
0x1072   :  { %2958 = vtanh.f32 %v1276_v51 }
0x107c   :  { %v2959_v52 = vpop.eup %2958 }
0x107d   :  { %1279 = vrot.lane.b32.xlu0 %v2959_v52, %s3906_s3  ;;  %v1584_v52 = vld [vmem:[%s4911_s5 + $0x8] sm:$0xff] }
0x10ef   :  { %v1280_v53 = vpop.permute.xlu0 %1279 }
0x10f0   :  { %v1282_v54 = vmul.f32 %v1280_v53, %v1265_v46  ;;  %v2876_v53 = vpack.c.bf16 %v1585_v6, %v1584_v52 }
0x10f2   :  { %1285 = vrot.lane.b32.xlu1 %v1282_v54, %s3907_s12  ;;  %v1588_v54 = vld [vmem:[%s4911_s5 + $0x28] sm:$0xff] }
0x1164   :  { %v1286_v55 = vpop.permute.xlu1 %1285 }
0x1165   :  { %2754 = vmatmul.mubr.msk.f32.vlgmr.msra.gmra.mrb[4].mxu1 %vm785_vm10, %v1286_v55  ;;  %v1589_v55 = vld [vmem:[%s4911_s5 + $0x30] sm:$0xff] }
0x1166   :  { %2871 = vmatpush3.bf16.msra.mxu1 %v4680_v14  ;;  %2775 = vmatprep.mubr.msk.f32.mxu1 %vm3905_vm9, %v3903_v10 }
0x1167   :  { %2872 = vmatprep.subr.bf16.mxu1 %v3904_v15 }
0x116a   :  { %2874 = vmatpush3.bf16.msra.mxu1 %v4688_v16 }
0x116b   :  { %2789 = vmatprep.subr.mxu1 %v3903_v10 }
0x1238   :  { %v1355_v57 = vpop.f32.mrb[4].mxu1 }
0x1239   :  { %v1359_v58 = vadd.f32 %v1355_v57, %v1283_v56  ;;  %v2755_v59 = vpop.f32.mrb[5].mxu1  ;;  %v1586_v56 = vld [vmem:[%s4911_s5 + $0x18] sm:$0xff]  ;;  %v2882_v57 = vpack.c.bf16 %v1589_v55, %v1588_v54 }
0x123a   :  { %v1590_v59 = vld [vmem:[%s4911_s5 + $0x38] sm:$0xff] }
0x123b   :  { %v1360_v60 = vmul.f32 0.5, %v1359_v58 }
0x123d   :  { %v1361_v61 = vsel %vm4269_vm2, %v1359_v58, %v1360_v60  ;;  %v1587_v58 = vld [vmem:[%s4911_s5 + $0x20] sm:$0xff] }
0x123e   :  { %2960 = vtanh.f32 %v1361_v61  ;;  %v1591_v60 = vld [vmem:[%s4911_s5 + $0x40] sm:$0xff]  ;;  %v2879_v12 = vpack.c.bf16 %v1587_v58, %v1586_v56 }
0x123f   :  { %v2885_v11 = vpack.c.bf16 %v1591_v60, %v1590_v59 }
0x1248   :  { %v2961_v62 = vpop.eup %2960 }
0x1249   :  { %v1363_v14 = vmul.f32 0.5, %v2961_v62 }
0x124b   :  { %v1364_v63 = vadd.f32 0.5, %v1363_v14 }
0x124d   :  { %v1365_v0 = vsel %vm4269_vm2, %v2961_v62, %v1364_v63 }
0x124e   :  { %1368 = vrot.lane.b32.xlu0 %v1365_v0, %s3906_s3  ;;  %v1366_v2 = vmul.f32 %v1365_v0, %v1276_v51  ;;  %v1583_v51 = vld [vmem:[%s4911_s5] sm:$0xff] }
0x12c0   :  { %v1369_v16 = vpop.permute.xlu0 %1368 }
0x12c1   :  { %v1371_v1 = vmul.f32 %v1369_v16, %v1365_v0 }
0x12c3   :  { %1373 = vrot.lane.b32.xlu1 %v1371_v1, %s3907_s12 }
0x1335   :  { %v1374_v3 = vpop.permute.xlu1 %1373 }
0x1336   :  { %v1376_v4 = vadd.f32 %v1374_v3, %v1366_v2  ;;  %v1592_v2 = vld [vmem:[%s4911_s5 + $0x48] sm:$0xff]  ;;  %v1593_v3 = vld [vmem:[%s4911_s5 + $0x50] sm:$0xff] }
0x1338   :  { %2962 = vtanh.f32 %v1376_v4 }
0x1342   :  { %v2963_v5 = vpop.eup %2962 }
0x1343   :  { %1379 = vrot.lane.b32.xlu0 %v2963_v5, %s3906_s3  ;;  %v1594_v5 = vld [vmem:[%s4911_s5 + $0x58] sm:$0xff] }
0x13b5   :  { %v1380_v7 = vpop.permute.xlu0 %1379 }
0x13b6   :  { %v1382_v8 = vmul.f32 %v1380_v7, %v1365_v0 }
0x13b8   :  { %1385 = vrot.lane.b32.xlu1 %v1382_v8, %s3907_s12  ;;  %v1596_v8 = vld [vmem:[%s4911_s5 + $0x68] sm:$0xff] }
0x142a   :  { %v1386_v9 = vpop.permute.xlu1 %1385 }
0x142b   :  { %2765 = vmatmul.mubr.msk.f32.vlgmr.msra.gmra.mrb[6].mxu0 %vm785_vm10, %v1386_v9  ;;  %v1597_v9 = vld [vmem:[%s4911_s5 + $0x70] sm:$0xff] }
0x142c   :  { %2786 = vmatprep.mubr.msk.f32.mxu0 %vm3905_vm9, %v3903_v10  ;;  %2877 = vmatpush3.bf16.msra.mxu0 %v2876_v53 }
0x142d   :  { %2878 = vmatprep.subr.bf16.mxu0 %v3904_v15 }
0x1430   :  { %2880 = vmatpush3.bf16.msra.mxu0 %v2879_v12 }
0x1431   :  { %2887 = vmatprep.subr.bf16.mxu0 %v3904_v15 }
0x14fe   :  { %v1455_v18 = vpop.f32.mrb[6].mxu0 }
0x14ff   :  { %v1459_v19 = vadd.f32 %v1455_v18, %v1383_v17  ;;  %v2766_v20 = vpop.f32.mrb[7].mxu0  ;;  %v2894_v17 = vpack.c.bf16 %v1597_v9, %v1596_v8 }
0x1501   :  { %v1460_v21 = vmul.f32 0.5, %v1459_v19 }
0x1503   :  { %v1461_v22 = vsel %vm4269_vm2, %v1459_v19, %v1460_v21  ;;  %v2527_v21 = vld [vmem:[%s4911_s5 + $0x88] ss:$0 sm:$0xff] }
0x1504   :  { %2964 = vtanh.f32 %v1461_v22 }
0x150e   :  { %v2965_v23 = vpop.eup %2964 }
0x150f   :  { %v1463_v24 = vmul.f32 0.5, %v2965_v23 }
0x1511   :  { %v1464_v25 = vadd.f32 0.5, %v1463_v24 }
0x1513   :  { %v1465_v26 = vsel %vm4269_vm2, %v2965_v23, %v1464_v25 }
0x1514   :  { %1468 = vrot.lane.b32.xlu0 %v1465_v26, %s3906_s3  ;;  %v1466_v29 = vmul.f32 %v1465_v26, %v1376_v4  ;;  %v2888_v4 = vpack.c.bf16 %v1593_v3, %v1592_v2 }
0x1586   :  { %v1469_v27 = vpop.permute.xlu0 %1468 }
0x1587   :  { %v1471_v28 = vmul.f32 %v1469_v27, %v1465_v26  ;;  %v1598_v27 = vld [vmem:[%s4911_s5 + $0x78] sm:$0xff] }
0x1589   :  { %1473 = vrot.lane.b32.xlu1 %v1471_v28, %s3907_s12 }
0x15fb   :  { %v1474_v30 = vpop.permute.xlu1 %1473 }
0x15fc   :  { %v1476_v31 = vadd.f32 %v1474_v30, %v1466_v29  ;;  %v2528_v29 = vld [vmem:[%s4911_s5 + $0x89] ss:$0 sm:$0xff] }
0x15fe   :  { %2966 = vtanh.f32 %v1476_v31 }
0x1608   :  { %v2967_v32 = vpop.eup %2966 }
0x1609   :  { %1479 = vrot.lane.b32.xlu0 %v2967_v32, %s3906_s3 }
0x167b   :  { %v1480_v33 = vpop.permute.xlu0 %1479 }
0x167c   :  { %v1482_v34 = vmul.f32 %v1480_v33, %v1465_v26 }
0x167e   :  { %1485 = vrot.lane.b32.xlu1 %v1482_v34, %s3907_s12  ;;  %v2530_v34 = vld [vmem:[%s4911_s5 + $0x8a] ss:$0 sm:$0xff] }
0x16f0   :  { %v1486_v35 = vpop.permute.xlu1 %1485 }
0x16f1   :  { %2776 = vmatmul.mubr.msk.f32.vlgmr.msra.gmra.mrb[6].mxu1 %vm785_vm10, %v1486_v35 }
0x16f2   :  { %2791 = vmatprep.mubr.msk.f32.mxu1 %vm3905_vm9, %v3903_v10  ;;  %2790 = vmatpush3.msra.mxu1 %v1583_v51 }
0x16f3   :  { %2881 = vmatprep.subr.bf16.mxu1 %v3904_v15 }
0x16f5   :  { %2792 = vmatmul.mubr.msk.f32.vlgmr.msra.gmra.mrb[8].mxu1 %vm1678_vm11, %v718_v13 }
0x16f6   :  { %2802 = vmatprep.mubr.msk.f32.mxu1 %vm3905_vm9, %v3903_v10  ;;  %2883 = vmatpush3.bf16.msra.mxu1 %v2882_v57 }
0x16f7   :  { %2884 = vmatprep.subr.bf16.mxu1 %v3904_v15 }
0x16fa   :  { %2886 = vmatpush3.bf16.msra.mxu1 %v2885_v11 }
0x16fb   :  { %2893 = vmatprep.subr.bf16.mxu1 %v3904_v15 }
0x17c4   :  { %v1555_v37 = vpop.f32.mrb[6].mxu1 }
0x17c5   :  { %v1559_v38 = vadd.f32 %v1555_v37, %v1483_v36  ;;  %v2777_v39 = vpop.f32.mrb[7].mxu1 }
0x17c7   :  { %v1560_v40 = vmul.f32 0.5, %v1559_v38 }
0x17c8   :  { %v1748_v63 = vpop.f32.mrb[8].mxu1 }
0x17c9   :  { %v1561_v41 = vsel %vm4269_vm2, %v1559_v38, %v1560_v40  ;;  %v2793_v0 = vpop.f32.mrb[9].mxu1 }
0x17ca   :  { %2968 = vtanh.f32 %v1561_v41 }
0x17d4   :  { %v2969_v42 = vpop.eup %2968 }
0x17d5   :  { %v1563_v43 = vmul.f32 0.5, %v2969_v42 }
0x17d7   :  { %v1564_v44 = vadd.f32 0.5, %v1563_v43 }
0x17d9   :  { %v1565_v45 = vsel %vm4269_vm2, %v2969_v42, %v1564_v44 }
0x17da   :  { %1568 = vrot.lane.b32.xlu0 %v1565_v45, %s3906_s3  ;;  %v1566_v48 = vmul.f32 %v1565_v45, %v1476_v31 }
0x184c   :  { %v1569_v46 = vpop.permute.xlu0 %1568 }
0x184d   :  { %v1571_v47 = vmul.f32 %v1569_v46, %v1565_v45 }
0x184f   :  { %1573 = vrot.lane.b32.xlu1 %v1571_v47, %s3907_s12 }
0x18c1   :  { %v1574_v49 = vpop.permute.xlu1 %1573 }
0x18c2   :  { %v1576_v50 = vadd.f32 %v1574_v49, %v1566_v48 }
0x18c4   :  { %2970 = vtanh.f32 %v1576_v50 }
0x18ce   :  { %v2971_v13 = vpop.eup %2970 }
0x18cf   :  { %1579 = vrot.lane.b32.xlu0 %v2971_v13, %s3906_s3 }
0x1941   :  { %v1580_v61 = vpop.permute.xlu0 %1579 }
0x1942   :  { %v1582_v62 = vmul.f32 %v1580_v61, %v1565_v45 }
0x1944   :  { %v1752_v14 = vrot.slane %v1582_v62, 2  ;;  %1604 = vrot.lane.b32.xlu1 %v1582_v62, %s3907_s12 }
0x1946   :  { %1753 = vrot.lane.b32.xlu0 %v1752_v14, %s3907_s12 }
0x19b6   :  { %v1605_v16 = vpop.permute.xlu1 %1604 }
0x19b7   :  { %2787 = vmatmul.mubr.msk.f32.vlgmr.msra.gmra.mrb[8].mxu0 %vm785_vm10, %v1605_v16 }
0x19b8   :  { %v1754_v1 = vpop.permute.xlu0 %1753  ;;  %2813 = vmatprep.mubr.msk.f32.mxu0 %vm3905_vm9, %v3903_v10  ;;  %2889 = vmatpush3.bf16.msra.mxu0 %v2888_v4 }
0x19b9   :  { %2803 = vmatmul.mubr.msk.f32.vlgmr.msra.gmra.mrb[10].mxu1 %vm785_vm10, %v1754_v1  ;;  %2890 = vmatprep.subr.bf16.mxu0 %v3904_v15 }
0x19ba   :  { %2824 = vmatprep.mubr.msk.f32.mxu1 %vm3905_vm9, %v3903_v10  ;;  %v1595_v10 = vld [vmem:[%s4911_s5 + $0x60] sm:$0xff]  ;;  %2895 = vmatpush3.bf16.msra.mxu1 %v2894_v17 }
0x19bb   :  { %v2891_v7 = vpack.c.bf16 %v1595_v10, %v1594_v5  ;;  %2896 = vmatprep.subr.bf16.mxu1 %v3904_v15  ;;  %v1599_v15 = vld [vmem:[%s4911_s5 + $0x80] sm:$0xff] }
0x19bc   :  { %v2897_v28 = vpack.c.bf16 %v1599_v15, %v1598_v27 }
0x19bd   :  { %2892 = vmatpush3.bf16.msra.mxu0 %v2891_v7 }
0x19be   :  { %2898 = vmatpush3.bf16.msra.mxu1 %v2897_v28 }
0x1a8a   :  { %v1674_v18 = vpop.f32.mrb[8].mxu0 }
0x1a8b   :  { %v1749_v19 = vadd.f32 %v1748_v63, %v1674_v18  ;;  %v2788_v20 = vpop.f32.mrb[9].mxu0 }
0x1a8c   :  { %v1823_v22 = vpop.f32.mrb[10].mxu1 }
0x1a8d   :  { %v1827_v23 = vadd.f32 %v1823_v22, %v1749_v19  ;;  %v2804_v24 = vpop.f32.mrb[11].mxu1 }
0x1a8f   :  { %v1832_v25 = vadd.f32 %v2527_v21, %v1827_v23 }
0x1a91   :  { %v1833_v26 = vmax.f32 %v1832_v25, 0.0 }
0x1a93   :  { %2814 = vmatmul.mubr.msk.f32.vlgmr.msra.gmra.mrb[10].mxu0 %vm785_vm10, %v1833_v26 }
0x1b66   :  { %v1907_v30 = vpop.f32.mrb[10].mxu0 }
0x1b67   :  { %v1908_v31 = vadd.f32 %v2528_v29, %v1907_v30  ;;  %v2815_v32 = vpop.f32.mrb[11].mxu0 }
0x1b69   :  { %v1911_v33 = vmax.f32 %v1908_v31, 0.0 }
0x1b6b   :  { %2825 = vmatmul.mubr.msk.f32.vlgmr.msra.gmra.mrb[12].mxu1 %vm785_vm10, %v1911_v33 }
0x1c3e   :  { %v1985_v35 = vpop.f32.mrb[12].mxu1 }
0x1c3f   :  { %v1986_v36 = vadd.f32 %v2530_v34, %v1985_v35  ;;  %v2826_v37 = vpop.f32.mrb[13].mxu1 }
0x1c41   :  { %1990 = vst.msk [vmem:[#allocation10] sm:$0x3] %vm1989_vm12, %v1986_v36 }
0x1c42   :  { %3787 = shalt.err (!%p3784_p7)
}
0x1c43   :  { %s3788_s19 = scalar_lea.hbm %s4912_s6, 32 }
0x1c44   :  { %p3789_p8 = scmp.ne.s32.totalorder %s4912_s6, %s3788_s19  ;;  %p3792_p11 = scmp.lt.u32.totalorder %s3788_s19, %s4912_s6 }
0x1c46   :  { %p3794_p9 = pnand %p3792_p11, %p3789_p8 }
0x1c48   :  { %3797 = shalt.err (!%p3794_p9)
}
0x1c49   :  { %2000 = dma.vmem_to_hbm [thread:$0]  %s1998_s11, 32, %s4912_s6, [#allocation5]  }
0x1c4a   :  { %3866 = dma.done.wait [#allocation5], 32  }
0x1c4b   :  { %3867 = vsyncadd [#allocation5], 4294967264 }
0x1c4c   :  { %2004 = vsyncpa [#allocation5], 1 }
0x1c4d   :  { %2005 = vsyncpa [#allocation6], 1 }
0x1c4e   :  { %2006 = vsyncpa [#allocation8], 1 }
0x1c4f   :  { %2007 = vsyncmov [#allocation3] }
0x1c52   :  { %s2008_s17 = vpop.sfrf %2007 }
0x1c53   :  { %p2532_p5 = scmp.ne.s32.totalorder %s2008_s17, 0 }
0x1c55   :  { %2012 = shalt.err (%p2532_p5)  }
0x1c56   :  { %2014 = vsyncmov [#allocation3 + $0x1] }
0x1c59   :  { %s2015_s30 = vpop.sfrf %2014 }
0x1c5a   :  { %p2533_p12 = scmp.ne.s32.totalorder %s2015_s30, 0 }
0x1c5c   :  { %2019 = shalt.err (%p2533_p12)  }
0x1c5d   :  { %2021 = vsyncmov [#allocation3 + $0x2] }
0x1c60   :  { %s2022_s15 = vpop.sfrf %2021 }
0x1c61   :  { %p2534_p13 = scmp.ne.s32.totalorder %s2022_s15, 0 }
0x1c63   :  { %2026 = shalt.err (%p2534_p13)  }
0x1c64   :  { %2028 = vsyncmov [#allocation3 + $0x3] }
0x1c67   :  { %s2029_s26 = vpop.sfrf %2028 }
0x1c68   :  { %p2535_p4 = scmp.ne.s32.totalorder %s2029_s26, 0 }
0x1c6a   :  { %2033 = shalt.err (%p2535_p4)  }
0x1c6b   :  { %2035 = vsyncmov [#allocation3 + $0x4] }
0x1c6e   :  { %s2036_s6 = vpop.sfrf %2035 }
0x1c6f   :  { %p2536_p0 = scmp.ne.s32.totalorder %s2036_s6, 0 }
0x1c71   :  { %2040 = shalt.err (%p2536_p0)  }
0x1c72   :  { %2042 = vsyncmov [#allocation3 + $0x5] }
0x1c75   :  { %s2043_s8 = vpop.sfrf %2042 }
0x1c76   :  { %p2537_p1 = scmp.ne.s32.totalorder %s2043_s8, 0 }
0x1c78   :  { %2047 = shalt.err (%p2537_p1)  }
0x1c79   :  { %2049 = vsyncmov [#allocation3 + $0x6] }
0x1c7c   :  { %s2050_s3 = vpop.sfrf %2049 }
0x1c7d   :  { %p2538_p2 = scmp.ne.s32.totalorder %s2050_s3, 0 }
0x1c7f   :  { %2054 = shalt.err (%p2538_p2)  }
0x1c80   :  { %2056 = vsyncmov [#allocation3 + $0x7] }
0x1c83   :  { %s2057_s12 = vpop.sfrf %2056 }
0x1c84   :  { %p2539_p3 = scmp.ne.s32.totalorder %s2057_s12, 0 }
0x1c86   :  { %2061 = shalt.err (%p2539_p3)  }
0x1c87   :  { %2063 = vsyncmov [#allocation3 + $0x8] }
0x1c8a   :  { %s2064_s27 = vpop.sfrf %2063 }
0x1c8b   :  { %p2540_p6 = scmp.ne.s32.totalorder %s2064_s27, 0 }
0x1c8d   :  { %2068 = shalt.err (%p2540_p6)  }
0x1c8e   :  { %2070 = vsyncmov [#allocation3 + $0x9] }
0x1c91   :  { %s2071_s0 = vpop.sfrf %2070 }
0x1c92   :  { %p2541_p10 = scmp.ne.s32.totalorder %s2071_s0, 0 }
0x1c94   :  { %2075 = shalt.err (%p2541_p10)  }
0x1c95   :  { %2077 = vsyncmov [#allocation3 + $0xa] }
0x1c98   :  { %s2078_s23 = vpop.sfrf %2077 }
0x1c99   :  { %p2542_p7 = scmp.ne.s32.totalorder %s2078_s23, 0 }
0x1c9b   :  { %2082 = shalt.err (%p2542_p7)  }
0x1c9c   :  { %2084 = vsyncmov [#allocation3 + $0xb] }
0x1c9f   :  { %s2085_s28 = vpop.sfrf %2084 }
0x1ca0   :  { %p2543_p8 = scmp.ne.s32.totalorder %s2085_s28, 0 }
0x1ca2   :  { %2089 = shalt.err (%p2543_p8)  }
0x1ca3   :  { %2091 = vsyncmov [#allocation3 + $0xc] }
0x1ca6   :  { %s2092_s9 = vpop.sfrf %2091 }
0x1ca7   :  { %p2544_p11 = scmp.ne.s32.totalorder %s2092_s9, 0 }
0x1ca9   :  { %2096 = shalt.err (%p2544_p11)  }
0x1caa   :  { %2098 = vsyncmov [#allocation3 + $0xd] }
0x1cad   :  { %s2099_s20 = vpop.sfrf %2098 }
0x1cae   :  { %p2545_p9 = scmp.ne.s32.totalorder %s2099_s20, 0 }
0x1cb0   :  { %2103 = shalt.err (%p2545_p9)  }
0x1cb1   :  { %2105 = vsyncmov [#allocation3 + $0xe] }
0x1cb4   :  { %s2106_s13 = vpop.sfrf %2105 }
0x1cb5   :  { %p2546_p5 = scmp.ne.s32.totalorder %s2106_s13, 0 }
0x1cb7   :  { %2110 = shalt.err (%p2546_p5)  }
0x1cb8   :  { %2112 = vsyncmov [#allocation3 + $0xf] }
0x1cbb   :  { %s2113_s7 = vpop.sfrf %2112 }
0x1cbc   :  { %p2547_p12 = scmp.ne.s32.totalorder %s2113_s7, 0 }
0x1cbe   :  { %2117 = shalt.err (%p2547_p12)  }
0x1cbf   :  { %2119 = vsyncmov [#allocation3 + $0x10] }
0x1cc2   :  { %s2120_s24 = vpop.sfrf %2119 }
0x1cc3   :  { %p2548_p13 = scmp.ne.s32.totalorder %s2120_s24, 0 }
0x1cc5   :  { %2124 = shalt.err (%p2548_p13)  }
0x1cc6   :  { %2126 = vsyncmov [#allocation3 + $0x11] }
0x1cc9   :  { %s2127_s16 = vpop.sfrf %2126 }
0x1cca   :  { %p2549_p4 = scmp.ne.s32.totalorder %s2127_s16, 0 }
0x1ccc   :  { %2131 = shalt.err (%p2549_p4)  }
0x1ccd   :  { %2133 = vsyncmov [#allocation3 + $0x12] }
0x1cd0   :  { %s2134_s10 = vpop.sfrf %2133 }
0x1cd1   :  { %p2550_p0 = scmp.ne.s32.totalorder %s2134_s10, 0 }
0x1cd3   :  { %2138 = shalt.err (%p2550_p0)  }
0x1cd4   :  { %2140 = vsyncmov [#allocation3 + $0x13] }
0x1cd7   :  { %s2141_s18 = vpop.sfrf %2140 }
0x1cd8   :  { %p2551_p1 = scmp.ne.s32.totalorder %s2141_s18, 0 }
0x1cda   :  { %2145 = shalt.err (%p2551_p1)  }
0x1cdb   :  { %2147 = vsyncmov [#allocation3 + $0x14] }
0x1cde   :  { %s2148_s11 = vpop.sfrf %2147 }
0x1cdf   :  { %p2552_p2 = scmp.ne.s32.totalorder %s2148_s11, 0 }
0x1ce1   :  { %2152 = shalt.err (%p2552_p2)  }
0x1ce2   :  { %2154 = vsyncmov [#allocation3 + $0x15] }
0x1ce5   :  { %s2155_s1 = vpop.sfrf %2154 }
0x1ce6   :  { %p2553_p3 = scmp.ne.s32.totalorder %s2155_s1, 0 }
0x1ce8   :  { %2159 = shalt.err (%p2553_p3)  }
0x1ce9   :  { %2161 = vsyncmov [#allocation3 + $0x16] }
0x1cec   :  { %s2162_s29 = vpop.sfrf %2161 }
0x1ced   :  { %p2554_p6 = scmp.ne.s32.totalorder %s2162_s29, 0 }
0x1cef   :  { %2166 = shalt.err (%p2554_p6)  }
0x1cf0   :  { %2168 = vsyncmov [#allocation3 + $0x17] }
0x1cf3   :  { %s2169_s14 = vpop.sfrf %2168 }
0x1cf4   :  { %p2555_p10 = scmp.ne.s32.totalorder %s2169_s14, 0 }
0x1cf6   :  { %2173 = shalt.err (%p2555_p10)  }
0x1cf7   :  { %2175 = vsyncmov [#allocation3 + $0x18] }
0x1cfa   :  { %s2176_s19 = vpop.sfrf %2175 }
0x1cfb   :  { %p2556_p7 = scmp.ne.s32.totalorder %s2176_s19, 0 }
0x1cfd   :  { %2180 = shalt.err (%p2556_p7)  }
0x1cfe   :  { %2182 = vsyncmov [#allocation3 + $0x19] }
0x1d01   :  { %s2183_s5 = vpop.sfrf %2182 }
0x1d02   :  { %p2557_p8 = scmp.ne.s32.totalorder %s2183_s5, 0 }
0x1d04   :  { %2187 = shalt.err (%p2557_p8)  }
0x1d05   :  { %2189 = vsyncmov [#allocation3 + $0x1a] }
0x1d08   :  { %s2190_s22 = vpop.sfrf %2189 }
0x1d09   :  { %p2558_p11 = scmp.ne.s32.totalorder %s2190_s22, 0 }
0x1d0b   :  { %2194 = shalt.err (%p2558_p11)  }
0x1d0c   :  { %2196 = vsyncmov [#allocation3 + $0x1b] }
0x1d0f   :  { %s2197_s2 = vpop.sfrf %2196 }
0x1d10   :  { %p2559_p9 = scmp.ne.s32.totalorder %s2197_s2, 0 }
0x1d12   :  { %2201 = shalt.err (%p2559_p9)  }
0x1d13   :  { %2203 = vsyncmov [#allocation3 + $0x1c] }
0x1d16   :  { %s2204_s4 = vpop.sfrf %2203 }
0x1d17   :  { %p2560_p5 = scmp.ne.s32.totalorder %s2204_s4, 0 }
0x1d19   :  { %2208 = shalt.err (%p2560_p5)  }
0x1d1a   :  { %2210 = vsyncmov [#allocation3 + $0x1d] }
0x1d1d   :  { %s2211_s21 = vpop.sfrf %2210 }
0x1d1e   :  { %p2561_p12 = scmp.ne.s32.totalorder %s2211_s21, 0 }
0x1d20   :  { %2215 = shalt.err (%p2561_p12)  }
0x1d21   :  { %2217 = vsyncmov [#allocation3 + $0x1e] }
0x1d24   :  { %s2218_s25 = vpop.sfrf %2217 }
0x1d25   :  { %p2562_p13 = scmp.ne.s32.totalorder %s2218_s25, 0 }
0x1d27   :  { %2222 = shalt.err (%p2562_p13)  }
0x1d28   :  { %2224 = vsyncmov [#allocation3 + $0x1f] }
0x1d2b   :  { %s2225_s17 = vpop.sfrf %2224 }
0x1d2c   :  { %p2563_p4 = scmp.ne.s32.totalorder %s2225_s17, 0 }
0x1d2e   :  { %2229 = shalt.err (%p2563_p4)  }

</bundles_post_ra>
